<compile_context>
chip_gen: v7x
topology: tpu7x:2x2x1
jax: 0.10.0
libtpu: 0.0.40
codegen_flags: <defaults>
</compile_context>

<pallas_src>
import numpy as np
import jax
import jax.numpy as jnp
from jax.experimental import pallas as pl
from jax.experimental.pallas import tpu as pltpu

# ----------------------------- model dims -----------------------------------
S = 32                      # spatial size (stands in for 512)
PATCH_STRIDE = 4
HP = S // PATCH_STRIDE      # 8  (token grid side)
N_TOK = HP * HP             # 64 tokens
E = 64                      # encoder embed dim (b4 stage-1 dim)
MLP_H = 128                 # mix-FFN hidden dim
D_HEAD = 128                # decode-head hidden dim (stands in for 768)
NUM_CELL_CLASSES = 3

_MXU_DTYPE = jnp.bfloat16   # bf16 MXU inputs, f32 accumulation (v6e/v7x native)


# ------------------- static interpolation matrices (host, numpy) -------------
def _bilinear_matrix_np(n_in, n_out):
    """(n_out, n_in) matrix matching F.interpolate(..., mode='bilinear', align_corners=True)."""
    if n_in == 1:
        return np.ones((n_out, 1), np.float32)
    idx = np.arange(n_out)
    src = idx * (n_in - 1) / (n_out - 1) if n_out > 1 else np.zeros((1,))
    i0 = np.clip(np.floor(src).astype(np.int64), 0, n_in - 2)
    frac = (src - i0).astype(np.float32)
    w = np.zeros((n_out, n_in), np.float32)
    w[idx, i0] = 1.0 - frac
    w[idx, i0 + 1] = frac
    return w


_UP_NP = _bilinear_matrix_np(HP, S)                                   # (32, 8)
# expanded forms so classifier+upsample fuse without any in-kernel reshape:
_UP_YE = jnp.asarray(np.repeat(_UP_NP, HP, axis=1))                   # (32, 64): [yo, i*8+j] = UY[yo, i]
_UP_XET = jnp.asarray(np.tile(_UP_NP, (1, HP)).T)                     # (64, 32): [i*8+j, xo] = UX[xo, j]
# Kronecker upsample operator (transposed) for the lane-dense cell output:
_BIG_UT = jnp.asarray(np.einsum("yi,xj->ijyx", _UP_NP, _UP_NP).reshape(N_TOK, S * S))   # (64, 1024)


# ----------------- space-to-depth im2col for the 7x7/stride-4 conv -----------
def _kpad(c):
    return ((4 * c * 16 + 127) // 128) * 128


def _im2col_s2d(x):
    """x: (B, C, 32, 32) -> lane-aligned im2col patches (B, 64, KPAD)."""
    b, c = x.shape[0], x.shape[1]
    xp = jnp.pad(x, ((0, 0), (0, 0), (3, 5), (3, 5)))                 # (B, C, 40, 40)
    xs = xp.reshape(b, c, 10, 4, 10, 4).transpose(0, 2, 4, 1, 3, 5)   # (B, 10, 10, C, 4, 4)
    xs = xs.reshape(b, 10, 10, c * 16)
    parts = [xs[:, dy:dy + HP, dx:dx + HP, :].reshape(b, N_TOK, c * 16)
             for dy in (0, 1) for dx in (0, 1)]
    patches = jnp.concatenate(parts, axis=-1)                         # (B, 64, 4*C*16)
    k = _kpad(c)
    if patches.shape[-1] < k:
        patches = jnp.pad(patches, ((0, 0), (0, 0), (0, k - patches.shape[-1])))
    return patches


def _repack_patch_weight(wconv):
    """Conv2d weight (E, C, 7, 7) -> space-to-depth matmul weight (KPAD, E)."""
    e, c = wconv.shape[0], wconv.shape[1]
    wpad = np.zeros((e, c, 8, 8), np.float32)
    wpad[:, :, :7, :7] = wconv
    w2 = wpad.reshape(e, c, 2, 4, 2, 4).transpose(2, 4, 1, 3, 5, 0).reshape(4 * c * 16, e)
    out = np.zeros((_kpad(c), e), np.float32)
    out[:4 * c * 16] = w2
    return out


# --------------------- device-side bbox -> crop-resize matrices --------------
def _axis_crop_matrix(has):
    """has: (S,) bool occupancy -> (S, S) bilinear matrix resampling the [min, max]
    span of `has` back to S points (align_corners=True).  All-zero masks degenerate
    gracefully to the full-image span."""
    idx = jnp.arange(S, dtype=jnp.int32)
    lo = jnp.argmax(has).astype(jnp.int32)
    hi = (S - 1) - jnp.argmax(has[::-1]).astype(jnp.int32)
    span = (hi - lo).astype(jnp.float32)
    src = lo.astype(jnp.float32) + idx.astype(jnp.float32) * (span / float(S - 1))
    i0 = jnp.clip(jnp.floor(src).astype(jnp.int32), lo, jnp.maximum(hi - 1, lo))
    frac = src - i0.astype(jnp.float32)
    cols = idx[None, :]
    return ((cols == i0[:, None]).astype(jnp.float32) * (1.0 - frac)[:, None]
            + (cols == (i0 + 1)[:, None]).astype(jnp.float32) * frac[:, None])


def _crop_matrices(pos):
    """pos: (1, S, S) binary mask -> (Ry, Rx), replacing the torch.where host sync."""
    mask = pos[0] == 1.0
    ry = _axis_crop_matrix(jnp.any(mask, axis=1))   # rows  (y / dim 2 in the reference)
    rx = _axis_crop_matrix(jnp.any(mask, axis=0))   # cols  (x / dim 3 in the reference)
    return ry, rx


# ------------------------------ in-kernel math --------------------------------
def _mm(a, b):
    """(M, K) @ (K, N) on the MXU, bf16 inputs / f32 accumulation."""
    return jnp.dot(a.astype(_MXU_DTYPE), b.astype(_MXU_DTYPE),
                   preferred_element_type=jnp.float32)


def _mm_nt(a, b):
    """(M, K) @ (N, K)^T on the MXU without materializing a transpose."""
    return jax.lax.dot_general(a.astype(_MXU_DTYPE), b.astype(_MXU_DTYPE),
                               (((1,), (1,)), ((), ())),
                               preferred_element_type=jnp.float32)


def _layernorm(x, g, b):
    mu = jnp.mean(x, axis=-1, keepdims=True)
    var = jnp.mean(jnp.square(x - mu), axis=-1, keepdims=True)
    return (x - mu) * jax.lax.rsqrt(var + 1e-5) * g + b


def _encoder(patches, pe_w, pe_b, ln_g, ln_b, wqkv, bqkv, wo, bo,
             w1, b1, w2, b2, head_w, head_b):
    """Fused mini-Segformer encoder + decode-head MLP: (N_TOK, KPAD) -> (N_TOK, D_HEAD)."""
    # overlapping 7x7/stride-4 patch embedding (pre-im2col'd, K padded to 128-multiple)
    tok = _mm(patches, pe_w) + pe_b
    tok = _layernorm(tok, ln_g[0:1], ln_b[0:1])

    # transformer block: fused-QKV self-attention
    h = _layernorm(tok, ln_g[1:2], ln_b[1:2])
    qkv = _mm(h, wqkv) + bqkv                              # (N, 3E)
    q = qkv[:, 0:E]
    k = qkv[:, E:2 * E]
    v = qkv[:, 2 * E:3 * E]
    s = _mm_nt(q, k) * (1.0 / float(np.sqrt(E)))           # (N, N)
    s = s - jnp.max(s, axis=-1, keepdims=True)
    p = jnp.exp(s)
    p = p / jnp.sum(p, axis=-1, keepdims=True)
    a = _mm(p, v)
    tok = tok + _mm(a, wo) + bo

    # transformer block: Mix-FFN
    h = _layernorm(tok, ln_g[2:3], ln_b[2:3])
    h = jax.nn.gelu(_mm(h, w1) + b1, approximate=True)     # TODO(synk): exact erf GELU
    tok = tok + _mm(h, w2) + b2

    tok = _layernorm(tok, ln_g[3:4], ln_b[3:4])

    # decode head: linear E -> D_HEAD + GELU
    return jax.nn.gelu(_mm(tok, head_w) + head_b, approximate=True)   # (N, D_HEAD)


# ------------------------------ fused kernels ---------------------------------
def _tissue_kernel(patches_ref, ry_ref, rx_ref,
                   pe_w, pe_b, ln_g, ln_b, wqkv, bqkv, wo, bo,
                   w1, b1, w2, b2, head_w, head_b,
                   cls_wt, cls_b, up_ye, up_xet, out_ref):
    feat = _encoder(patches_ref[0], pe_w[...], pe_b[...], ln_g[...], ln_b[...],
                    wqkv[...], bqkv[...], wo[...], bo[...],
                    w1[...], b1[...], w2[...], b2[...], head_w[...], head_b[...])
    # transposed 1-class classifier fused with the 8->32 bilinear upsample
    t_row = jax.lax.dot_general(cls_wt[...], feat, (((1,), (1,)), ((), ())),
                                preferred_element_type=jnp.float32)          # (1, 64)
    seg32 = jnp.dot(up_ye[...] * t_row, up_xet[...],
                    preferred_element_type=jnp.float32) + cls_b[...]         # (32, 32)
    seg32 = jax.nn.sigmoid(seg32)
    # data-dependent bbox crop + resize back to 32x32:  Ry @ seg @ Rx^T
    tmp = jax.lax.dot_general(seg32, rx_ref[0], (((1,), (1,)), ((), ())),
                              preferred_element_type=jnp.float32)
    out_ref[0] = jnp.dot(ry_ref[0], tmp, preferred_element_type=jnp.float32)


def _cell_kernel(patches_ref,
                 pe_w, pe_b, ln_g, ln_b, wqkv, bqkv, wo, bo,
                 w1, b1, w2, b2, head_w, head_b,
                 cls_wt, cls_b, big_ut, out_ref):
    feat = _encoder(patches_ref[0], pe_w[...], pe_b[...], ln_g[...], ln_b[...],
                    wqkv[...], bqkv[...], wo[...], bo[...],
                    w1[...], b1[...], w2[...], b2[...], head_w[...], head_b[...])
    # transposed 3-class classifier fused with the bilinear upsample via the Kronecker
    # operator; output block is lane-dense (3, 1024).
    logits_t = jax.lax.dot_general(cls_wt[...], feat, (((1,), (1,)), ((), ())),
                                   preferred_element_type=jnp.float32)       # (3, 64)
    out_ref[0] = jnp.dot(logits_t, big_ut[...],
                         preferred_element_type=jnp.float32) + cls_b[...]    # (3, 1024)


# ------------------------------ pallas_call wrappers ---------------------------
_ENC_KEYS = ("pe_w", "pe_b", "ln_g", "ln_b", "wqkv", "bqkv", "wo", "bo",
             "w1", "b1", "w2", "b2", "head_w", "head_b")


def _full_spec(arr):
    nd = arr.ndim
    return pl.BlockSpec(arr.shape, lambda b, _nd=nd: (0,) * _nd)


def _batch_spec(per_sample_shape):
    nd = len(per_sample_shape)
    return pl.BlockSpec((1,) + tuple(per_sample_shape),
                        lambda b, _nd=nd: (b,) + (0,) * _nd)


def _run_tissue(patches, ry, rx, p):
    b = patches.shape[0]
    weights = [p[k] for k in _ENC_KEYS] + [p["cls_wt"], p["cls_b"], _UP_YE, _UP_XET]
    in_specs = ([_batch_spec(patches.shape[1:]), _batch_spec((S, S)), _batch_spec((S, S))]
                + [_full_spec(w) for w in weights])
    return pl.pallas_call(
        _tissue_kernel,
        grid=(b,),
        in_specs=in_specs,
        out_specs=_batch_spec((S, S)),
        out_shape=jax.ShapeDtypeStruct((b, S, S), jnp.float32),
        compiler_params=pltpu.CompilerParams(dimension_semantics=("parallel",)),
    )(patches, ry, rx, *weights)


def _run_cell(patches, p):
    b = patches.shape[0]
    weights = [p[k] for k in _ENC_KEYS] + [p["cls_wt"], p["cls_b"], _BIG_UT]
    in_specs = [_batch_spec(patches.shape[1:])] + [_full_spec(w) for w in weights]
    return pl.pallas_call(
        _cell_kernel,
        grid=(b,),
        in_specs=in_specs,
        out_specs=_batch_spec((NUM_CELL_CLASSES, S * S)),
        out_shape=jax.ShapeDtypeStruct((b, NUM_CELL_CLASSES, S * S), jnp.float32),
        compiler_params=pltpu.CompilerParams(dimension_semantics=("parallel",)),
    )(patches, *weights)


# ------------------------- Tissue_Cell_Segformer forward ----------------------
@jax.jit
def tissue_cell_segformer_forward(tissue, cell, position, t_params, c_params):
    """tissue: (B,3,S,S), cell: (B,3,S,S), position: (B,1,S,S) -> (B,3,S,S)."""
    b = tissue.shape[0]

    # device-side replacement of torch.where(p == 1) + crop/interpolate
    ry, rx = jax.vmap(_crop_matrices)(position)                  # (B, S, S) each

    # --- tissue model (frozen in the reference): whole batch in ONE fused kernel ---
    t_patches = _im2col_s2d(tissue)                              # (B, 64, 256)
    t_seg = _run_tissue(t_patches, ry, rx, t_params)             # (B, S, S) sigmoid + cropped

    # --- cell model on concat([cell, t_seg], channel dim): one fused kernel -------
    x = jnp.concatenate([cell, t_seg[:, None]], axis=1)          # (B, 4, S, S)
    c_patches = _im2col_s2d(x)                                   # (B, 64, 256)
    out_flat = _run_cell(c_patches, c_params)                    # (B, 3, 1024) lane-dense
    return out_flat.reshape(b, NUM_CELL_CLASSES, S, S)


# ------------------------------ parameter init --------------------------------
def init_segformer_params(key, in_ch, num_classes):
    ks = jax.random.split(key, 10)

    def w(k, shape, scale=0.05):
        return jax.random.normal(k, shape, jnp.float32) * scale

    conv_w = np.asarray(w(ks[0], (E, in_ch, 7, 7)))
    return {
        "pe_w": jnp.asarray(_repack_patch_weight(conv_w)),        # (KPAD, E)
        "pe_b": jnp.zeros((1, E), jnp.float32),
        "ln_g": jnp.ones((4, E), jnp.float32),                    # pe_ln, ln1, ln2, lnf
        "ln_b": jnp.zeros((4, E), jnp.float32),
        "wqkv": jnp.concatenate([w(ks[1], (E, E)), w(ks[2], (E, E)), w(ks[3], (E, E))], axis=1),
        "bqkv": jnp.zeros((1, 3 * E), jnp.float32),
        "wo": w(ks[4], (E, E)), "bo": jnp.zeros((1, E), jnp.float32),
        "w1": w(ks[5], (E, MLP_H)), "b1": jnp.zeros((1, MLP_H), jnp.float32),
        "w2": w(ks[6], (MLP_H, E)), "b2": jnp.zeros((1, E), jnp.float32),
        "head_w": w(ks[7], (E, D_HEAD)), "head_b": jnp.zeros((1, D_HEAD), jnp.float32),
        "cls_wt": w(ks[8], (num_classes, D_HEAD)),                # transposed classifier weight
        "cls_b": jnp.zeros((num_classes, 1), jnp.float32),
    }


# ----------------------------------- main -------------------------------------
if __name__ == "__main__":
    key = jax.random.PRNGKey(0)
    k_t, k_c, k_x1, k_x2 = jax.random.split(key, 4)

    t_params = init_segformer_params(k_t, in_ch=3, num_classes=1)                # tissue model
    c_params = init_segformer_params(k_c, in_ch=4, num_classes=NUM_CELL_CLASSES)  # cell model

    B = 2
    tissue = jax.random.normal(k_x1, (B, 3, S, S), jnp.float32)
    cell = jax.random.normal(k_x2, (B, 3, S, S), jnp.float32)

    # deterministic position masks (binary boxes of different sizes)
    pos_np = np.zeros((B, 1, S, S), np.float32)
    pos_np[0, 0, 4:20, 6:22] = 1.0
    pos_np[1, 0, 10:27, 2:21] = 1.0
    position = jnp.asarray(pos_np)

    out = tissue_cell_segformer_forward(tissue, cell, position, t_params, c_params)
    out = jax.block_until_ready(out)
    assert out.shape == (B, 3, S, S) and out.dtype == jnp.float32
    assert bool(jnp.all(jnp.isfinite(out)))
    print("KERNEL_OK")
</pallas_src>

<mosaic_0001>
module attributes {stable_mosaic.version = 11 : i64} {
  func.func @_tissue_kernel(%arg0: i32, %arg1: memref<1x64x256xf32, #tpu.memory_space<vmem>>, %arg2: memref<1x32x32xf32, #tpu.memory_space<vmem>>, %arg3: memref<1x32x32xf32, #tpu.memory_space<vmem>>, %arg4: memref<256x64xf32, #tpu.memory_space<vmem>>, %arg5: memref<1x64xf32, #tpu.memory_space<vmem>>, %arg6: memref<4x64xf32, #tpu.memory_space<vmem>>, %arg7: memref<4x64xf32, #tpu.memory_space<vmem>>, %arg8: memref<64x192xf32, #tpu.memory_space<vmem>>, %arg9: memref<1x192xf32, #tpu.memory_space<vmem>>, %arg10: memref<64x64xf32, #tpu.memory_space<vmem>>, %arg11: memref<1x64xf32, #tpu.memory_space<vmem>>, %arg12: memref<64x128xf32, #tpu.memory_space<vmem>>, %arg13: memref<1x128xf32, #tpu.memory_space<vmem>>, %arg14: memref<128x64xf32, #tpu.memory_space<vmem>>, %arg15: memref<1x64xf32, #tpu.memory_space<vmem>>, %arg16: memref<64x128xf32, #tpu.memory_space<vmem>>, %arg17: memref<1x128xf32, #tpu.memory_space<vmem>>, %arg18: memref<1x128xf32, #tpu.memory_space<vmem>>, %arg19: memref<1x1xf32, #tpu.memory_space<vmem>>, %arg20: memref<32x64xf32, #tpu.memory_space<vmem>>, %arg21: memref<64x32xf32, #tpu.memory_space<vmem>>, %arg22: memref<1x32x32xf32, #tpu.memory_space<vmem>>) attributes {dimension_semantics = [#tpu.dimension_semantics<parallel>], iteration_bounds = array<i64: 2>, scalar_prefetch = 0 : i64, scratch_operands = 0 : i64, tpu.core_type = #tpu.core_type<tc>, window_params = [{transform_indices = @transform_0, window_bounds = array<i64: 1, 64, 256>}, {transform_indices = @transform_1, window_bounds = array<i64: 1, 32, 32>}, {transform_indices = @transform_2, window_bounds = array<i64: 1, 32, 32>}, {pipeline_mode = #tpu.pipeline_mode<synchronous>, transform_indices = @transform_3, window_bounds = array<i64: 256, 64>}, {pipeline_mode = #tpu.pipeline_mode<synchronous>, transform_indices = @transform_4, window_bounds = array<i64: 1, 64>}, {pipeline_mode = #tpu.pipeline_mode<synchronous>, transform_indices = @transform_5, window_bounds = array<i64: 4, 64>}, {pipeline_mode = #tpu.pipeline_mode<synchronous>, transform_indices = @transform_6, window_bounds = array<i64: 4, 64>}, {pipeline_mode = #tpu.pipeline_mode<synchronous>, transform_indices = @transform_7, window_bounds = array<i64: 64, 192>}, {pipeline_mode = #tpu.pipeline_mode<synchronous>, transform_indices = @transform_8, window_bounds = array<i64: 1, 192>}, {pipeline_mode = #tpu.pipeline_mode<synchronous>, transform_indices = @transform_9, window_bounds = array<i64: 64, 64>}, {pipeline_mode = #tpu.pipeline_mode<synchronous>, transform_indices = @transform_10, window_bounds = array<i64: 1, 64>}, {pipeline_mode = #tpu.pipeline_mode<synchronous>, transform_indices = @transform_11, window_bounds = array<i64: 64, 128>}, {pipeline_mode = #tpu.pipeline_mode<synchronous>, transform_indices = @transform_12, window_bounds = array<i64: 1, 128>}, {pipeline_mode = #tpu.pipeline_mode<synchronous>, transform_indices = @transform_13, window_bounds = array<i64: 128, 64>}, {pipeline_mode = #tpu.pipeline_mode<synchronous>, transform_indices = @transform_14, window_bounds = array<i64: 1, 64>}, {pipeline_mode = #tpu.pipeline_mode<synchronous>, transform_indices = @transform_15, window_bounds = array<i64: 64, 128>}, {pipeline_mode = #tpu.pipeline_mode<synchronous>, transform_indices = @transform_16, window_bounds = array<i64: 1, 128>}, {pipeline_mode = #tpu.pipeline_mode<synchronous>, transform_indices = @transform_17, window_bounds = array<i64: 1, 128>}, {pipeline_mode = #tpu.pipeline_mode<synchronous>, transform_indices = @transform_18, window_bounds = array<i64: 1, 1>}, {pipeline_mode = #tpu.pipeline_mode<synchronous>, transform_indices = @transform_19, window_bounds = array<i64: 32, 64>}, {pipeline_mode = #tpu.pipeline_mode<synchronous>, transform_indices = @transform_20, window_bounds = array<i64: 64, 32>}, {transform_indices = @transform_21, window_bounds = array<i64: 1, 32, 32>}]} {
    %c0 = arith.constant 0 : index
    %c0_0 = arith.constant 0 : index
    %c0_1 = arith.constant 0 : index
    %0 = vector.load %arg1[%c0, %c0_0, %c0_1] : memref<1x64x256xf32, #tpu.memory_space<vmem>>, vector<1x64x256xf32>
    %1 = vector.shape_cast %0 : vector<1x64x256xf32> to vector<64x256xf32>
    %c0_2 = arith.constant 0 : index
    %c0_3 = arith.constant 0 : index
    %2 = vector.load %arg4[%c0_2, %c0_3] : memref<256x64xf32, #tpu.memory_space<vmem>>, vector<256x64xf32>
    %c0_4 = arith.constant 0 : index
    %c0_5 = arith.constant 0 : index
    %3 = vector.load %arg5[%c0_4, %c0_5] : memref<1x64xf32, #tpu.memory_space<vmem>>, vector<1x64xf32>
    %c0_6 = arith.constant 0 : index
    %c0_7 = arith.constant 0 : index
    %4 = vector.load %arg6[%c0_6, %c0_7] : memref<4x64xf32, #tpu.memory_space<vmem>>, vector<4x64xf32>
    %c0_8 = arith.constant 0 : index
    %c0_9 = arith.constant 0 : index
    %5 = vector.load %arg7[%c0_8, %c0_9] : memref<4x64xf32, #tpu.memory_space<vmem>>, vector<4x64xf32>
    %c0_10 = arith.constant 0 : index
    %c0_11 = arith.constant 0 : index
    %6 = vector.load %arg8[%c0_10, %c0_11] : memref<64x192xf32, #tpu.memory_space<vmem>>, vector<64x192xf32>
    %c0_12 = arith.constant 0 : index
    %c0_13 = arith.constant 0 : index
    %7 = vector.load %arg9[%c0_12, %c0_13] : memref<1x192xf32, #tpu.memory_space<vmem>>, vector<1x192xf32>
    %c0_14 = arith.constant 0 : index
    %c0_15 = arith.constant 0 : index
    %8 = vector.load %arg10[%c0_14, %c0_15] : memref<64x64xf32, #tpu.memory_space<vmem>>, vector<64x64xf32>
    %c0_16 = arith.constant 0 : index
    %c0_17 = arith.constant 0 : index
    %9 = vector.load %arg11[%c0_16, %c0_17] : memref<1x64xf32, #tpu.memory_space<vmem>>, vector<1x64xf32>
    %c0_18 = arith.constant 0 : index
    %c0_19 = arith.constant 0 : index
    %10 = vector.load %arg12[%c0_18, %c0_19] : memref<64x128xf32, #tpu.memory_space<vmem>>, vector<64x128xf32>
    %c0_20 = arith.constant 0 : index
    %c0_21 = arith.constant 0 : index
    %11 = vector.load %arg13[%c0_20, %c0_21] : memref<1x128xf32, #tpu.memory_space<vmem>>, vector<1x128xf32>
    %c0_22 = arith.constant 0 : index
    %c0_23 = arith.constant 0 : index
    %12 = vector.load %arg14[%c0_22, %c0_23] : memref<128x64xf32, #tpu.memory_space<vmem>>, vector<128x64xf32>
    %c0_24 = arith.constant 0 : index
    %c0_25 = arith.constant 0 : index
    %13 = vector.load %arg15[%c0_24, %c0_25] : memref<1x64xf32, #tpu.memory_space<vmem>>, vector<1x64xf32>
    %c0_26 = arith.constant 0 : index
    %c0_27 = arith.constant 0 : index
    %14 = vector.load %arg16[%c0_26, %c0_27] : memref<64x128xf32, #tpu.memory_space<vmem>>, vector<64x128xf32>
    %c0_28 = arith.constant 0 : index
    %c0_29 = arith.constant 0 : index
    %15 = vector.load %arg17[%c0_28, %c0_29] : memref<1x128xf32, #tpu.memory_space<vmem>>, vector<1x128xf32>
    %16 = arith.truncf %1 : vector<64x256xf32> to vector<64x256xbf16>
    %17 = arith.truncf %2 : vector<256x64xf32> to vector<256x64xbf16>
    %cst = arith.constant dense<0.000000e+00> : vector<64x64xf32>
    %18 = tpu.matmul %16, %17, %cst {dimension_numbers = #tpu.dot_dimension_numbers<[1], [0], [0], [1], [0, 0, 1, 1], [], []>} : vector<64x256xbf16>, vector<256x64xbf16>, vector<64x64xf32> -> vector<64x64xf32>
    %19 = vector.broadcast %3 : vector<1x64xf32> to vector<64x64xf32>
    %20 = arith.addf %18, %19 : vector<64x64xf32>
    %21 = vector.extract_strided_slice %4 {offsets = [0, 0], sizes = [1, 64], strides = [1, 1]} : vector<4x64xf32> to vector<1x64xf32>
    %22 = vector.extract_strided_slice %5 {offsets = [0, 0], sizes = [1, 64], strides = [1, 1]} : vector<4x64xf32> to vector<1x64xf32>
    %cst_30 = arith.constant dense<0.000000e+00> : vector<64xf32>
    %23 = vector.multi_reduction <add>, %20, %cst_30 [1] : vector<64x64xf32> to vector<64xf32>
    %24 = vector.shape_cast %23 : vector<64xf32> to vector<64x1xf32>
    %cst_31 = arith.constant 6.400000e+01 : f32
    %25 = vector.broadcast %cst_31 : f32 to vector<64x1xf32>
    %26 = arith.divf %24, %25 : vector<64x1xf32>
    %27 = vector.broadcast %26 : vector<64x1xf32> to vector<64x64xf32>
    %28 = arith.subf %20, %27 : vector<64x64xf32>
    %29 = arith.mulf %28, %28 : vector<64x64xf32>
    %cst_32 = arith.constant dense<0.000000e+00> : vector<64xf32>
    %30 = vector.multi_reduction <add>, %29, %cst_32 [1] : vector<64x64xf32> to vector<64xf32>
    %31 = vector.shape_cast %30 : vector<64xf32> to vector<64x1xf32>
    %cst_33 = arith.constant 6.400000e+01 : f32
    %32 = vector.broadcast %cst_33 : f32 to vector<64x1xf32>
    %33 = arith.divf %31, %32 : vector<64x1xf32>
    %34 = vector.broadcast %26 : vector<64x1xf32> to vector<64x64xf32>
    %35 = arith.subf %20, %34 : vector<64x64xf32>
    %cst_34 = arith.constant 9.99999974E-6 : f32
    %36 = vector.broadcast %cst_34 : f32 to vector<64x1xf32>
    %37 = arith.addf %33, %36 : vector<64x1xf32>
    %38 = math.rsqrt %37 : vector<64x1xf32>
    %39 = vector.broadcast %38 : vector<64x1xf32> to vector<64x64xf32>
    %40 = arith.mulf %35, %39 : vector<64x64xf32>
    %41 = vector.broadcast %21 : vector<1x64xf32> to vector<64x64xf32>
    %42 = arith.mulf %40, %41 : vector<64x64xf32>
    %43 = vector.broadcast %22 : vector<1x64xf32> to vector<64x64xf32>
    %44 = arith.addf %42, %43 : vector<64x64xf32>
    %45 = vector.extract_strided_slice %4 {offsets = [1, 0], sizes = [1, 64], strides = [1, 1]} : vector<4x64xf32> to vector<1x64xf32>
    %46 = vector.extract_strided_slice %5 {offsets = [1, 0], sizes = [1, 64], strides = [1, 1]} : vector<4x64xf32> to vector<1x64xf32>
    %cst_35 = arith.constant dense<0.000000e+00> : vector<64xf32>
    %47 = vector.multi_reduction <add>, %44, %cst_35 [1] : vector<64x64xf32> to vector<64xf32>
    %48 = vector.shape_cast %47 : vector<64xf32> to vector<64x1xf32>
    %cst_36 = arith.constant 6.400000e+01 : f32
    %49 = vector.broadcast %cst_36 : f32 to vector<64x1xf32>
    %50 = arith.divf %48, %49 : vector<64x1xf32>
    %51 = vector.broadcast %50 : vector<64x1xf32> to vector<64x64xf32>
    %52 = arith.subf %44, %51 : vector<64x64xf32>
    %53 = arith.mulf %52, %52 : vector<64x64xf32>
    %cst_37 = arith.constant dense<0.000000e+00> : vector<64xf32>
    %54 = vector.multi_reduction <add>, %53, %cst_37 [1] : vector<64x64xf32> to vector<64xf32>
    %55 = vector.shape_cast %54 : vector<64xf32> to vector<64x1xf32>
    %cst_38 = arith.constant 6.400000e+01 : f32
    %56 = vector.broadcast %cst_38 : f32 to vector<64x1xf32>
    %57 = arith.divf %55, %56 : vector<64x1xf32>
    %58 = vector.broadcast %50 : vector<64x1xf32> to vector<64x64xf32>
    %59 = arith.subf %44, %58 : vector<64x64xf32>
    %cst_39 = arith.constant 9.99999974E-6 : f32
    %60 = vector.broadcast %cst_39 : f32 to vector<64x1xf32>
    %61 = arith.addf %57, %60 : vector<64x1xf32>
    %62 = math.rsqrt %61 : vector<64x1xf32>
    %63 = vector.broadcast %62 : vector<64x1xf32> to vector<64x64xf32>
    %64 = arith.mulf %59, %63 : vector<64x64xf32>
    %65 = vector.broadcast %45 : vector<1x64xf32> to vector<64x64xf32>
    %66 = arith.mulf %64, %65 : vector<64x64xf32>
    %67 = vector.broadcast %46 : vector<1x64xf32> to vector<64x64xf32>
    %68 = arith.addf %66, %67 : vector<64x64xf32>
    %69 = arith.truncf %68 : vector<64x64xf32> to vector<64x64xbf16>
    %70 = arith.truncf %6 : vector<64x192xf32> to vector<64x192xbf16>
    %cst_40 = arith.constant dense<0.000000e+00> : vector<64x192xf32>
    %71 = tpu.matmul %69, %70, %cst_40 {dimension_numbers = #tpu.dot_dimension_numbers<[1], [0], [0], [1], [0, 0, 1, 1], [], []>} : vector<64x64xbf16>, vector<64x192xbf16>, vector<64x192xf32> -> vector<64x192xf32>
    %72 = vector.broadcast %7 : vector<1x192xf32> to vector<64x192xf32>
    %73 = arith.addf %71, %72 : vector<64x192xf32>
    %74 = vector.extract_strided_slice %73 {offsets = [0, 0], sizes = [64, 64], strides = [1, 1]} : vector<64x192xf32> to vector<64x64xf32>
    %75 = vector.extract_strided_slice %73 {offsets = [0, 64], sizes = [64, 64], strides = [1, 1]} : vector<64x192xf32> to vector<64x64xf32>
    %76 = vector.extract_strided_slice %73 {offsets = [0, 128], sizes = [64, 64], strides = [1, 1]} : vector<64x192xf32> to vector<64x64xf32>
    %77 = arith.truncf %74 : vector<64x64xf32> to vector<64x64xbf16>
    %78 = arith.truncf %75 : vector<64x64xf32> to vector<64x64xbf16>
    %cst_41 = arith.constant dense<0.000000e+00> : vector<64x64xf32>
    %79 = tpu.matmul %77, %78, %cst_41 {dimension_numbers = #tpu.dot_dimension_numbers<[1], [1], [0], [0], [0, 0, 1, 0], [], []>} : vector<64x64xbf16>, vector<64x64xbf16>, vector<64x64xf32> -> vector<64x64xf32>
    %cst_42 = arith.constant 1.250000e-01 : f32
    %80 = vector.broadcast %cst_42 : f32 to vector<64x64xf32>
    %81 = arith.mulf %79, %80 : vector<64x64xf32>
    %cst_43 = arith.constant dense<0xFF800000> : vector<64xf32>
    %82 = vector.multi_reduction <maximumf>, %81, %cst_43 [1] : vector<64x64xf32> to vector<64xf32>
    %83 = vector.shape_cast %82 : vector<64xf32> to vector<64x1xf32>
    %84 = vector.broadcast %83 : vector<64x1xf32> to vector<64x64xf32>
    %85 = arith.subf %81, %84 : vector<64x64xf32>
    %86 = math.exp %85 : vector<64x64xf32>
    %cst_44 = arith.constant dense<0.000000e+00> : vector<64xf32>
    %87 = vector.multi_reduction <add>, %86, %cst_44 [1] : vector<64x64xf32> to vector<64xf32>
    %88 = vector.shape_cast %87 : vector<64xf32> to vector<64x1xf32>
    %89 = vector.broadcast %88 : vector<64x1xf32> to vector<64x64xf32>
    %90 = arith.divf %86, %89 : vector<64x64xf32>
    %91 = arith.truncf %90 : vector<64x64xf32> to vector<64x64xbf16>
    %92 = arith.truncf %76 : vector<64x64xf32> to vector<64x64xbf16>
    %cst_45 = arith.constant dense<0.000000e+00> : vector<64x64xf32>
    %93 = tpu.matmul %91, %92, %cst_45 {dimension_numbers = #tpu.dot_dimension_numbers<[1], [0], [0], [1], [0, 0, 1, 1], [], []>} : vector<64x64xbf16>, vector<64x64xbf16>, vector<64x64xf32> -> vector<64x64xf32>
    %94 = arith.truncf %93 : vector<64x64xf32> to vector<64x64xbf16>
    %95 = arith.truncf %8 : vector<64x64xf32> to vector<64x64xbf16>
    %cst_46 = arith.constant dense<0.000000e+00> : vector<64x64xf32>
    %96 = tpu.matmul %94, %95, %cst_46 {dimension_numbers = #tpu.dot_dimension_numbers<[1], [0], [0], [1], [0, 0, 1, 1], [], []>} : vector<64x64xbf16>, vector<64x64xbf16>, vector<64x64xf32> -> vector<64x64xf32>
    %97 = arith.addf %44, %96 : vector<64x64xf32>
    %98 = vector.broadcast %9 : vector<1x64xf32> to vector<64x64xf32>
    %99 = arith.addf %97, %98 : vector<64x64xf32>
    %100 = vector.extract_strided_slice %4 {offsets = [2, 0], sizes = [1, 64], strides = [1, 1]} : vector<4x64xf32> to vector<1x64xf32>
    %101 = vector.extract_strided_slice %5 {offsets = [2, 0], sizes = [1, 64], strides = [1, 1]} : vector<4x64xf32> to vector<1x64xf32>
    %cst_47 = arith.constant dense<0.000000e+00> : vector<64xf32>
    %102 = vector.multi_reduction <add>, %99, %cst_47 [1] : vector<64x64xf32> to vector<64xf32>
    %103 = vector.shape_cast %102 : vector<64xf32> to vector<64x1xf32>
    %cst_48 = arith.constant 6.400000e+01 : f32
    %104 = vector.broadcast %cst_48 : f32 to vector<64x1xf32>
    %105 = arith.divf %103, %104 : vector<64x1xf32>
    %106 = vector.broadcast %105 : vector<64x1xf32> to vector<64x64xf32>
    %107 = arith.subf %99, %106 : vector<64x64xf32>
    %108 = arith.mulf %107, %107 : vector<64x64xf32>
    %cst_49 = arith.constant dense<0.000000e+00> : vector<64xf32>
    %109 = vector.multi_reduction <add>, %108, %cst_49 [1] : vector<64x64xf32> to vector<64xf32>
    %110 = vector.shape_cast %109 : vector<64xf32> to vector<64x1xf32>
    %cst_50 = arith.constant 6.400000e+01 : f32
    %111 = vector.broadcast %cst_50 : f32 to vector<64x1xf32>
    %112 = arith.divf %110, %111 : vector<64x1xf32>
    %113 = vector.broadcast %105 : vector<64x1xf32> to vector<64x64xf32>
    %114 = arith.subf %99, %113 : vector<64x64xf32>
    %cst_51 = arith.constant 9.99999974E-6 : f32
    %115 = vector.broadcast %cst_51 : f32 to vector<64x1xf32>
    %116 = arith.addf %112, %115 : vector<64x1xf32>
    %117 = math.rsqrt %116 : vector<64x1xf32>
    %118 = vector.broadcast %117 : vector<64x1xf32> to vector<64x64xf32>
    %119 = arith.mulf %114, %118 : vector<64x64xf32>
    %120 = vector.broadcast %100 : vector<1x64xf32> to vector<64x64xf32>
    %121 = arith.mulf %119, %120 : vector<64x64xf32>
    %122 = vector.broadcast %101 : vector<1x64xf32> to vector<64x64xf32>
    %123 = arith.addf %121, %122 : vector<64x64xf32>
    %124 = arith.truncf %123 : vector<64x64xf32> to vector<64x64xbf16>
    %125 = arith.truncf %10 : vector<64x128xf32> to vector<64x128xbf16>
    %cst_52 = arith.constant dense<0.000000e+00> : vector<64x128xf32>
    %126 = tpu.matmul %124, %125, %cst_52 {dimension_numbers = #tpu.dot_dimension_numbers<[1], [0], [0], [1], [0, 0, 1, 1], [], []>} : vector<64x64xbf16>, vector<64x128xbf16>, vector<64x128xf32> -> vector<64x128xf32>
    %127 = vector.broadcast %11 : vector<1x128xf32> to vector<64x128xf32>
    %128 = arith.addf %126, %127 : vector<64x128xf32>
    %129 = arith.mulf %128, %128 : vector<64x128xf32>
    %130 = arith.mulf %128, %129 : vector<64x128xf32>
    %cst_53 = arith.constant 4.471500e-02 : f32
    %131 = vector.broadcast %cst_53 : f32 to vector<64x128xf32>
    %132 = arith.mulf %131, %130 : vector<64x128xf32>
    %133 = arith.addf %128, %132 : vector<64x128xf32>
    %cst_54 = arith.constant 0.797884583 : f32
    %134 = vector.broadcast %cst_54 : f32 to vector<64x128xf32>
    %135 = arith.mulf %134, %133 : vector<64x128xf32>
    %136 = math.tanh %135 : vector<64x128xf32>
    %cst_55 = arith.constant 1.000000e+00 : f32
    %137 = vector.broadcast %cst_55 : f32 to vector<64x128xf32>
    %138 = arith.addf %137, %136 : vector<64x128xf32>
    %cst_56 = arith.constant 5.000000e-01 : f32
    %139 = vector.broadcast %cst_56 : f32 to vector<64x128xf32>
    %140 = arith.mulf %139, %138 : vector<64x128xf32>
    %141 = arith.mulf %128, %140 : vector<64x128xf32>
    %142 = arith.truncf %141 : vector<64x128xf32> to vector<64x128xbf16>
    %143 = arith.truncf %12 : vector<128x64xf32> to vector<128x64xbf16>
    %cst_57 = arith.constant dense<0.000000e+00> : vector<64x64xf32>
    %144 = tpu.matmul %142, %143, %cst_57 {dimension_numbers = #tpu.dot_dimension_numbers<[1], [0], [0], [1], [0, 0, 1, 1], [], []>} : vector<64x128xbf16>, vector<128x64xbf16>, vector<64x64xf32> -> vector<64x64xf32>
    %145 = arith.addf %99, %144 : vector<64x64xf32>
    %146 = vector.broadcast %13 : vector<1x64xf32> to vector<64x64xf32>
    %147 = arith.addf %145, %146 : vector<64x64xf32>
    %148 = vector.extract_strided_slice %4 {offsets = [3, 0], sizes = [1, 64], strides = [1, 1]} : vector<4x64xf32> to vector<1x64xf32>
    %149 = vector.extract_strided_slice %5 {offsets = [3, 0], sizes = [1, 64], strides = [1, 1]} : vector<4x64xf32> to vector<1x64xf32>
    %cst_58 = arith.constant dense<0.000000e+00> : vector<64xf32>
    %150 = vector.multi_reduction <add>, %147, %cst_58 [1] : vector<64x64xf32> to vector<64xf32>
    %151 = vector.shape_cast %150 : vector<64xf32> to vector<64x1xf32>
    %cst_59 = arith.constant 6.400000e+01 : f32
    %152 = vector.broadcast %cst_59 : f32 to vector<64x1xf32>
    %153 = arith.divf %151, %152 : vector<64x1xf32>
    %154 = vector.broadcast %153 : vector<64x1xf32> to vector<64x64xf32>
    %155 = arith.subf %147, %154 : vector<64x64xf32>
    %156 = arith.mulf %155, %155 : vector<64x64xf32>
    %cst_60 = arith.constant dense<0.000000e+00> : vector<64xf32>
    %157 = vector.multi_reduction <add>, %156, %cst_60 [1] : vector<64x64xf32> to vector<64xf32>
    %158 = vector.shape_cast %157 : vector<64xf32> to vector<64x1xf32>
    %cst_61 = arith.constant 6.400000e+01 : f32
    %159 = vector.broadcast %cst_61 : f32 to vector<64x1xf32>
    %160 = arith.divf %158, %159 : vector<64x1xf32>
    %161 = vector.broadcast %153 : vector<64x1xf32> to vector<64x64xf32>
    %162 = arith.subf %147, %161 : vector<64x64xf32>
    %cst_62 = arith.constant 9.99999974E-6 : f32
    %163 = vector.broadcast %cst_62 : f32 to vector<64x1xf32>
    %164 = arith.addf %160, %163 : vector<64x1xf32>
    %165 = math.rsqrt %164 : vector<64x1xf32>
    %166 = vector.broadcast %165 : vector<64x1xf32> to vector<64x64xf32>
    %167 = arith.mulf %162, %166 : vector<64x64xf32>
    %168 = vector.broadcast %148 : vector<1x64xf32> to vector<64x64xf32>
    %169 = arith.mulf %167, %168 : vector<64x64xf32>
    %170 = vector.broadcast %149 : vector<1x64xf32> to vector<64x64xf32>
    %171 = arith.addf %169, %170 : vector<64x64xf32>
    %172 = arith.truncf %171 : vector<64x64xf32> to vector<64x64xbf16>
    %173 = arith.truncf %14 : vector<64x128xf32> to vector<64x128xbf16>
    %cst_63 = arith.constant dense<0.000000e+00> : vector<64x128xf32>
    %174 = tpu.matmul %172, %173, %cst_63 {dimension_numbers = #tpu.dot_dimension_numbers<[1], [0], [0], [1], [0, 0, 1, 1], [], []>} : vector<64x64xbf16>, vector<64x128xbf16>, vector<64x128xf32> -> vector<64x128xf32>
    %175 = vector.broadcast %15 : vector<1x128xf32> to vector<64x128xf32>
    %176 = arith.addf %174, %175 : vector<64x128xf32>
    %177 = arith.mulf %176, %176 : vector<64x128xf32>
    %178 = arith.mulf %176, %177 : vector<64x128xf32>
    %cst_64 = arith.constant 4.471500e-02 : f32
    %179 = vector.broadcast %cst_64 : f32 to vector<64x128xf32>
    %180 = arith.mulf %179, %178 : vector<64x128xf32>
    %181 = arith.addf %176, %180 : vector<64x128xf32>
    %cst_65 = arith.constant 0.797884583 : f32
    %182 = vector.broadcast %cst_65 : f32 to vector<64x128xf32>
    %183 = arith.mulf %182, %181 : vector<64x128xf32>
    %184 = math.tanh %183 : vector<64x128xf32>
    %cst_66 = arith.constant 1.000000e+00 : f32
    %185 = vector.broadcast %cst_66 : f32 to vector<64x128xf32>
    %186 = arith.addf %185, %184 : vector<64x128xf32>
    %cst_67 = arith.constant 5.000000e-01 : f32
    %187 = vector.broadcast %cst_67 : f32 to vector<64x128xf32>
    %188 = arith.mulf %187, %186 : vector<64x128xf32>
    %189 = arith.mulf %176, %188 : vector<64x128xf32>
    %c0_68 = arith.constant 0 : index
    %c0_69 = arith.constant 0 : index
    %190 = vector.load %arg18[%c0_68, %c0_69] : memref<1x128xf32, #tpu.memory_space<vmem>>, vector<1x128xf32>
    %cst_70 = arith.constant dense<0.000000e+00> : vector<1x64xf32>
    %191 = tpu.matmul %190, %189, %cst_70 {dimension_numbers = #tpu.dot_dimension_numbers<[1], [1], [0], [0], [0, 0, 1, 0], [], []>} : vector<1x128xf32>, vector<64x128xf32>, vector<1x64xf32> -> vector<1x64xf32>
    %c0_71 = arith.constant 0 : index
    %c0_72 = arith.constant 0 : index
    %192 = vector.load %arg20[%c0_71, %c0_72] : memref<32x64xf32, #tpu.memory_space<vmem>>, vector<32x64xf32>
    %193 = vector.broadcast %191 : vector<1x64xf32> to vector<32x64xf32>
    %194 = arith.mulf %192, %193 : vector<32x64xf32>
    %c0_73 = arith.constant 0 : index
    %c0_74 = arith.constant 0 : index
    %195 = vector.load %arg21[%c0_73, %c0_74] : memref<64x32xf32, #tpu.memory_space<vmem>>, vector<64x32xf32>
    %cst_75 = arith.constant dense<0.000000e+00> : vector<32x32xf32>
    %196 = tpu.matmul %194, %195, %cst_75 {dimension_numbers = #tpu.dot_dimension_numbers<[1], [0], [0], [1], [0, 0, 1, 1], [], []>} : vector<32x64xf32>, vector<64x32xf32>, vector<32x32xf32> -> vector<32x32xf32>
    %c0_76 = arith.constant 0 : index
    %c0_77 = arith.constant 0 : index
    %197 = vector.load %arg19[%c0_76, %c0_77] : memref<1x1xf32, #tpu.memory_space<vmem>>, vector<1x1xf32>
    %198 = vector.broadcast %197 : vector<1x1xf32> to vector<32x32xf32>
    %199 = arith.addf %196, %198 : vector<32x32xf32>
    %200 = arith.negf %199 : vector<32x32xf32>
    %201 = math.exp %200 : vector<32x32xf32>
    %cst_78 = arith.constant 1.000000e+00 : f32
    %202 = vector.broadcast %cst_78 : f32 to vector<32x32xf32>
    %203 = arith.addf %202, %201 : vector<32x32xf32>
    %204 = arith.divf %202, %203 : vector<32x32xf32>
    %c0_79 = arith.constant 0 : index
    %c0_80 = arith.constant 0 : index
    %c0_81 = arith.constant 0 : index
    %205 = vector.load %arg3[%c0_79, %c0_80, %c0_81] : memref<1x32x32xf32, #tpu.memory_space<vmem>>, vector<1x32x32xf32>
    %206 = vector.shape_cast %205 : vector<1x32x32xf32> to vector<32x32xf32>
    %cst_82 = arith.constant dense<0.000000e+00> : vector<32x32xf32>
    %207 = tpu.matmul %204, %206, %cst_82 {dimension_numbers = #tpu.dot_dimension_numbers<[1], [1], [0], [0], [0, 0, 1, 0], [], []>} : vector<32x32xf32>, vector<32x32xf32>, vector<32x32xf32> -> vector<32x32xf32>
    %c0_83 = arith.constant 0 : index
    %c0_84 = arith.constant 0 : index
    %c0_85 = arith.constant 0 : index
    %208 = vector.load %arg2[%c0_83, %c0_84, %c0_85] : memref<1x32x32xf32, #tpu.memory_space<vmem>>, vector<1x32x32xf32>
    %209 = vector.shape_cast %208 : vector<1x32x32xf32> to vector<32x32xf32>
    %cst_86 = arith.constant dense<0.000000e+00> : vector<32x32xf32>
    %210 = tpu.matmul %209, %207, %cst_86 {dimension_numbers = #tpu.dot_dimension_numbers<[1], [0], [0], [1], [0, 0, 1, 1], [], []>} : vector<32x32xf32>, vector<32x32xf32>, vector<32x32xf32> -> vector<32x32xf32>
    %c0_87 = arith.constant 0 : index
    %c0_88 = arith.constant 0 : index
    %c0_89 = arith.constant 0 : index
    %211 = vector.load %arg22[%c0_87, %c0_88, %c0_89] : memref<1x32x32xf32, #tpu.memory_space<vmem>>, vector<1x32x32xf32>
    %212 = vector.shape_cast %211 : vector<1x32x32xf32> to vector<32x32xf32>
    %213 = vector.shape_cast %210 : vector<32x32xf32> to vector<1x32x32xf32>
    tpu.vector_store %arg22[%c0_87, %c0_88, %c0_89], %213 {strides = array<i32>} : memref<1x32x32xf32, #tpu.memory_space<vmem>>, vector<1x32x32xf32>,
    return
  }
  func.func @transform_0(%arg0: i32) -> (i32, i32, i32) {
    %c0_i32 = arith.constant 0 : i32
    %c0_i32_0 = arith.constant 0 : i32
    %c0_i32_1 = arith.constant 0 : i32
    return %arg0, %c0_i32, %c0_i32_0 : i32, i32, i32
  }
  func.func @transform_1(%arg0: i32) -> (i32, i32, i32) {
    %c0_i32 = arith.constant 0 : i32
    %c0_i32_0 = arith.constant 0 : i32
    %c0_i32_1 = arith.constant 0 : i32
    return %arg0, %c0_i32, %c0_i32_0 : i32, i32, i32
  }
  func.func @transform_2(%arg0: i32) -> (i32, i32, i32) {
    %c0_i32 = arith.constant 0 : i32
    %c0_i32_0 = arith.constant 0 : i32
    %c0_i32_1 = arith.constant 0 : i32
    return %arg0, %c0_i32, %c0_i32_0 : i32, i32, i32
  }
  func.func @transform_3(%arg0: i32) -> (i32, i32) {
    %c0_i32 = arith.constant 0 : i32
    %c0_i32_0 = arith.constant 0 : i32
    %c0_i32_1 = arith.constant 0 : i32
    return %c0_i32, %c0_i32_0 : i32, i32
  }
  func.func @transform_4(%arg0: i32) -> (i32, i32) {
    %c0_i32 = arith.constant 0 : i32
    %c0_i32_0 = arith.constant 0 : i32
    %c0_i32_1 = arith.constant 0 : i32
    return %c0_i32, %c0_i32_0 : i32, i32
  }
  func.func @transform_5(%arg0: i32) -> (i32, i32) {
    %c0_i32 = arith.constant 0 : i32
    %c0_i32_0 = arith.constant 0 : i32
    %c0_i32_1 = arith.constant 0 : i32
    return %c0_i32, %c0_i32_0 : i32, i32
  }
  func.func @transform_6(%arg0: i32) -> (i32, i32) {
    %c0_i32 = arith.constant 0 : i32
    %c0_i32_0 = arith.constant 0 : i32
    %c0_i32_1 = arith.constant 0 : i32
    return %c0_i32, %c0_i32_0 : i32, i32
  }
  func.func @transform_7(%arg0: i32) -> (i32, i32) {
    %c0_i32 = arith.constant 0 : i32
    %c0_i32_0 = arith.constant 0 : i32
    %c0_i32_1 = arith.constant 0 : i32
    return %c0_i32, %c0_i32_0 : i32, i32
  }
  func.func @transform_8(%arg0: i32) -> (i32, i32) {
    %c0_i32 = arith.constant 0 : i32
    %c0_i32_0 = arith.constant 0 : i32
    %c0_i32_1 = arith.constant 0 : i32
    return %c0_i32, %c0_i32_0 : i32, i32
  }
  func.func @transform_9(%arg0: i32) -> (i32, i32) {
    %c0_i32 = arith.constant 0 : i32
    %c0_i32_0 = arith.constant 0 : i32
    %c0_i32_1 = arith.constant 0 : i32
    return %c0_i32, %c0_i32_0 : i32, i32
  }
  func.func @transform_10(%arg0: i32) -> (i32, i32) {
    %c0_i32 = arith.constant 0 : i32
    %c0_i32_0 = arith.constant 0 : i32
    %c0_i32_1 = arith.constant 0 : i32
    return %c0_i32, %c0_i32_0 : i32, i32
  }
  func.func @transform_11(%arg0: i32) -> (i32, i32) {
    %c0_i32 = arith.constant 0 : i32
    %c0_i32_0 = arith.constant 0 : i32
    %c0_i32_1 = arith.constant 0 : i32
    return %c0_i32, %c0_i32_0 : i32, i32
  }
  func.func @transform_12(%arg0: i32) -> (i32, i32) {
    %c0_i32 = arith.constant 0 : i32
    %c0_i32_0 = arith.constant 0 : i32
    %c0_i32_1 = arith.constant 0 : i32
    return %c0_i32, %c0_i32_0 : i32, i32
  }
  func.func @transform_13(%arg0: i32) -> (i32, i32) {
    %c0_i32 = arith.constant 0 : i32
    %c0_i32_0 = arith.constant 0 : i32
    %c0_i32_1 = arith.constant 0 : i32
    return %c0_i32, %c0_i32_0 : i32, i32
  }
  func.func @transform_14(%arg0: i32) -> (i32, i32) {
    %c0_i32 = arith.constant 0 : i32
    %c0_i32_0 = arith.constant 0 : i32
    %c0_i32_1 = arith.constant 0 : i32
    return %c0_i32, %c0_i32_0 : i32, i32
  }
  func.func @transform_15(%arg0: i32) -> (i32, i32) {
    %c0_i32 = arith.constant 0 : i32
    %c0_i32_0 = arith.constant 0 : i32
    %c0_i32_1 = arith.constant 0 : i32
    return %c0_i32, %c0_i32_0 : i32, i32
  }
  func.func @transform_16(%arg0: i32) -> (i32, i32) {
    %c0_i32 = arith.constant 0 : i32
    %c0_i32_0 = arith.constant 0 : i32
    %c0_i32_1 = arith.constant 0 : i32
    return %c0_i32, %c0_i32_0 : i32, i32
  }
  func.func @transform_17(%arg0: i32) -> (i32, i32) {
    %c0_i32 = arith.constant 0 : i32
    %c0_i32_0 = arith.constant 0 : i32
    %c0_i32_1 = arith.constant 0 : i32
    return %c0_i32, %c0_i32_0 : i32, i32
  }
  func.func @transform_18(%arg0: i32) -> (i32, i32) {
    %c0_i32 = arith.constant 0 : i32
    %c0_i32_0 = arith.constant 0 : i32
    %c0_i32_1 = arith.constant 0 : i32
    return %c0_i32, %c0_i32_0 : i32, i32
  }
  func.func @transform_19(%arg0: i32) -> (i32, i32) {
    %c0_i32 = arith.constant 0 : i32
    %c0_i32_0 = arith.constant 0 : i32
    %c0_i32_1 = arith.constant 0 : i32
    return %c0_i32, %c0_i32_0 : i32, i32
  }
  func.func @transform_20(%arg0: i32) -> (i32, i32) {
    %c0_i32 = arith.constant 0 : i32
    %c0_i32_0 = arith.constant 0 : i32
    %c0_i32_1 = arith.constant 0 : i32
    return %c0_i32, %c0_i32_0 : i32, i32
  }
  func.func @transform_21(%arg0: i32) -> (i32, i32, i32) {
    %c0_i32 = arith.constant 0 : i32
    %c0_i32_0 = arith.constant 0 : i32
    %c0_i32_1 = arith.constant 0 : i32
    return %arg0, %c0_i32, %c0_i32_0 : i32, i32, i32
  }
}

module attributes {stable_mosaic.version = 11 : i64} {
  func.func @_cell_kernel(%arg0: i32, %arg1: memref<1x64x256xf32, #tpu.memory_space<vmem>>, %arg2: memref<256x64xf32, #tpu.memory_space<vmem>>, %arg3: memref<1x64xf32, #tpu.memory_space<vmem>>, %arg4: memref<4x64xf32, #tpu.memory_space<vmem>>, %arg5: memref<4x64xf32, #tpu.memory_space<vmem>>, %arg6: memref<64x192xf32, #tpu.memory_space<vmem>>, %arg7: memref<1x192xf32, #tpu.memory_space<vmem>>, %arg8: memref<64x64xf32, #tpu.memory_space<vmem>>, %arg9: memref<1x64xf32, #tpu.memory_space<vmem>>, %arg10: memref<64x128xf32, #tpu.memory_space<vmem>>, %arg11: memref<1x128xf32, #tpu.memory_space<vmem>>, %arg12: memref<128x64xf32, #tpu.memory_space<vmem>>, %arg13: memref<1x64xf32, #tpu.memory_space<vmem>>, %arg14: memref<64x128xf32, #tpu.memory_space<vmem>>, %arg15: memref<1x128xf32, #tpu.memory_space<vmem>>, %arg16: memref<3x128xf32, #tpu.memory_space<vmem>>, %arg17: memref<3x1xf32, #tpu.memory_space<vmem>>, %arg18: memref<64x1024xf32, #tpu.memory_space<vmem>>, %arg19: memref<1x3x1024xf32, #tpu.memory_space<vmem>>) attributes {dimension_semantics = [#tpu.dimension_semantics<parallel>], iteration_bounds = array<i64: 2>, scalar_prefetch = 0 : i64, scratch_operands = 0 : i64, tpu.core_type = #tpu.core_type<tc>, window_params = [{transform_indices = @transform_0, window_bounds = array<i64: 1, 64, 256>}, {pipeline_mode = #tpu.pipeline_mode<synchronous>, transform_indices = @transform_1, window_bounds = array<i64: 256, 64>}, {pipeline_mode = #tpu.pipeline_mode<synchronous>, transform_indices = @transform_2, window_bounds = array<i64: 1, 64>}, {pipeline_mode = #tpu.pipeline_mode<synchronous>, transform_indices = @transform_3, window_bounds = array<i64: 4, 64>}, {pipeline_mode = #tpu.pipeline_mode<synchronous>, transform_indices = @transform_4, window_bounds = array<i64: 4, 64>}, {pipeline_mode = #tpu.pipeline_mode<synchronous>, transform_indices = @transform_5, window_bounds = array<i64: 64, 192>}, {pipeline_mode = #tpu.pipeline_mode<synchronous>, transform_indices = @transform_6, window_bounds = array<i64: 1, 192>}, {pipeline_mode = #tpu.pipeline_mode<synchronous>, transform_indices = @transform_7, window_bounds = array<i64: 64, 64>}, {pipeline_mode = #tpu.pipeline_mode<synchronous>, transform_indices = @transform_8, window_bounds = array<i64: 1, 64>}, {pipeline_mode = #tpu.pipeline_mode<synchronous>, transform_indices = @transform_9, window_bounds = array<i64: 64, 128>}, {pipeline_mode = #tpu.pipeline_mode<synchronous>, transform_indices = @transform_10, window_bounds = array<i64: 1, 128>}, {pipeline_mode = #tpu.pipeline_mode<synchronous>, transform_indices = @transform_11, window_bounds = array<i64: 128, 64>}, {pipeline_mode = #tpu.pipeline_mode<synchronous>, transform_indices = @transform_12, window_bounds = array<i64: 1, 64>}, {pipeline_mode = #tpu.pipeline_mode<synchronous>, transform_indices = @transform_13, window_bounds = array<i64: 64, 128>}, {pipeline_mode = #tpu.pipeline_mode<synchronous>, transform_indices = @transform_14, window_bounds = array<i64: 1, 128>}, {pipeline_mode = #tpu.pipeline_mode<synchronous>, transform_indices = @transform_15, window_bounds = array<i64: 3, 128>}, {pipeline_mode = #tpu.pipeline_mode<synchronous>, transform_indices = @transform_16, window_bounds = array<i64: 3, 1>}, {pipeline_mode = #tpu.pipeline_mode<synchronous>, transform_indices = @transform_17, window_bounds = array<i64: 64, 1024>}, {transform_indices = @transform_18, window_bounds = array<i64: 1, 3, 1024>}]} {
    %c0 = arith.constant 0 : index
    %c0_0 = arith.constant 0 : index
    %c0_1 = arith.constant 0 : index
    %0 = vector.load %arg1[%c0, %c0_0, %c0_1] : memref<1x64x256xf32, #tpu.memory_space<vmem>>, vector<1x64x256xf32>
    %1 = vector.shape_cast %0 : vector<1x64x256xf32> to vector<64x256xf32>
    %c0_2 = arith.constant 0 : index
    %c0_3 = arith.constant 0 : index
    %2 = vector.load %arg2[%c0_2, %c0_3] : memref<256x64xf32, #tpu.memory_space<vmem>>, vector<256x64xf32>
    %c0_4 = arith.constant 0 : index
    %c0_5 = arith.constant 0 : index
    %3 = vector.load %arg3[%c0_4, %c0_5] : memref<1x64xf32, #tpu.memory_space<vmem>>, vector<1x64xf32>
    %c0_6 = arith.constant 0 : index
    %c0_7 = arith.constant 0 : index
    %4 = vector.load %arg4[%c0_6, %c0_7] : memref<4x64xf32, #tpu.memory_space<vmem>>, vector<4x64xf32>
    %c0_8 = arith.constant 0 : index
    %c0_9 = arith.constant 0 : index
    %5 = vector.load %arg5[%c0_8, %c0_9] : memref<4x64xf32, #tpu.memory_space<vmem>>, vector<4x64xf32>
    %c0_10 = arith.constant 0 : index
    %c0_11 = arith.constant 0 : index
    %6 = vector.load %arg6[%c0_10, %c0_11] : memref<64x192xf32, #tpu.memory_space<vmem>>, vector<64x192xf32>
    %c0_12 = arith.constant 0 : index
    %c0_13 = arith.constant 0 : index
    %7 = vector.load %arg7[%c0_12, %c0_13] : memref<1x192xf32, #tpu.memory_space<vmem>>, vector<1x192xf32>
    %c0_14 = arith.constant 0 : index
    %c0_15 = arith.constant 0 : index
    %8 = vector.load %arg8[%c0_14, %c0_15] : memref<64x64xf32, #tpu.memory_space<vmem>>, vector<64x64xf32>
    %c0_16 = arith.constant 0 : index
    %c0_17 = arith.constant 0 : index
    %9 = vector.load %arg9[%c0_16, %c0_17] : memref<1x64xf32, #tpu.memory_space<vmem>>, vector<1x64xf32>
    %c0_18 = arith.constant 0 : index
    %c0_19 = arith.constant 0 : index
    %10 = vector.load %arg10[%c0_18, %c0_19] : memref<64x128xf32, #tpu.memory_space<vmem>>, vector<64x128xf32>
    %c0_20 = arith.constant 0 : index
    %c0_21 = arith.constant 0 : index
    %11 = vector.load %arg11[%c0_20, %c0_21] : memref<1x128xf32, #tpu.memory_space<vmem>>, vector<1x128xf32>
    %c0_22 = arith.constant 0 : index
    %c0_23 = arith.constant 0 : index
    %12 = vector.load %arg12[%c0_22, %c0_23] : memref<128x64xf32, #tpu.memory_space<vmem>>, vector<128x64xf32>
    %c0_24 = arith.constant 0 : index
    %c0_25 = arith.constant 0 : index
    %13 = vector.load %arg13[%c0_24, %c0_25] : memref<1x64xf32, #tpu.memory_space<vmem>>, vector<1x64xf32>
    %c0_26 = arith.constant 0 : index
    %c0_27 = arith.constant 0 : index
    %14 = vector.load %arg14[%c0_26, %c0_27] : memref<64x128xf32, #tpu.memory_space<vmem>>, vector<64x128xf32>
    %c0_28 = arith.constant 0 : index
    %c0_29 = arith.constant 0 : index
    %15 = vector.load %arg15[%c0_28, %c0_29] : memref<1x128xf32, #tpu.memory_space<vmem>>, vector<1x128xf32>
    %16 = arith.truncf %1 : vector<64x256xf32> to vector<64x256xbf16>
    %17 = arith.truncf %2 : vector<256x64xf32> to vector<256x64xbf16>
    %cst = arith.constant dense<0.000000e+00> : vector<64x64xf32>
    %18 = tpu.matmul %16, %17, %cst {dimension_numbers = #tpu.dot_dimension_numbers<[1], [0], [0], [1], [0, 0, 1, 1], [], []>} : vector<64x256xbf16>, vector<256x64xbf16>, vector<64x64xf32> -> vector<64x64xf32>
    %19 = vector.broadcast %3 : vector<1x64xf32> to vector<64x64xf32>
    %20 = arith.addf %18, %19 : vector<64x64xf32>
    %21 = vector.extract_strided_slice %4 {offsets = [0, 0], sizes = [1, 64], strides = [1, 1]} : vector<4x64xf32> to vector<1x64xf32>
    %22 = vector.extract_strided_slice %5 {offsets = [0, 0], sizes = [1, 64], strides = [1, 1]} : vector<4x64xf32> to vector<1x64xf32>
    %cst_30 = arith.constant dense<0.000000e+00> : vector<64xf32>
    %23 = vector.multi_reduction <add>, %20, %cst_30 [1] : vector<64x64xf32> to vector<64xf32>
    %24 = vector.shape_cast %23 : vector<64xf32> to vector<64x1xf32>
    %cst_31 = arith.constant 6.400000e+01 : f32
    %25 = vector.broadcast %cst_31 : f32 to vector<64x1xf32>
    %26 = arith.divf %24, %25 : vector<64x1xf32>
    %27 = vector.broadcast %26 : vector<64x1xf32> to vector<64x64xf32>
    %28 = arith.subf %20, %27 : vector<64x64xf32>
    %29 = arith.mulf %28, %28 : vector<64x64xf32>
    %cst_32 = arith.constant dense<0.000000e+00> : vector<64xf32>
    %30 = vector.multi_reduction <add>, %29, %cst_32 [1] : vector<64x64xf32> to vector<64xf32>
    %31 = vector.shape_cast %30 : vector<64xf32> to vector<64x1xf32>
    %cst_33 = arith.constant 6.400000e+01 : f32
    %32 = vector.broadcast %cst_33 : f32 to vector<64x1xf32>
    %33 = arith.divf %31, %32 : vector<64x1xf32>
    %34 = vector.broadcast %26 : vector<64x1xf32> to vector<64x64xf32>
    %35 = arith.subf %20, %34 : vector<64x64xf32>
    %cst_34 = arith.constant 9.99999974E-6 : f32
    %36 = vector.broadcast %cst_34 : f32 to vector<64x1xf32>
    %37 = arith.addf %33, %36 : vector<64x1xf32>
    %38 = math.rsqrt %37 : vector<64x1xf32>
    %39 = vector.broadcast %38 : vector<64x1xf32> to vector<64x64xf32>
    %40 = arith.mulf %35, %39 : vector<64x64xf32>
    %41 = vector.broadcast %21 : vector<1x64xf32> to vector<64x64xf32>
    %42 = arith.mulf %40, %41 : vector<64x64xf32>
    %43 = vector.broadcast %22 : vector<1x64xf32> to vector<64x64xf32>
    %44 = arith.addf %42, %43 : vector<64x64xf32>
    %45 = vector.extract_strided_slice %4 {offsets = [1, 0], sizes = [1, 64], strides = [1, 1]} : vector<4x64xf32> to vector<1x64xf32>
    %46 = vector.extract_strided_slice %5 {offsets = [1, 0], sizes = [1, 64], strides = [1, 1]} : vector<4x64xf32> to vector<1x64xf32>
    %cst_35 = arith.constant dense<0.000000e+00> : vector<64xf32>
    %47 = vector.multi_reduction <add>, %44, %cst_35 [1] : vector<64x64xf32> to vector<64xf32>
    %48 = vector.shape_cast %47 : vector<64xf32> to vector<64x1xf32>
    %cst_36 = arith.constant 6.400000e+01 : f32
    %49 = vector.broadcast %cst_36 : f32 to vector<64x1xf32>
    %50 = arith.divf %48, %49 : vector<64x1xf32>
    %51 = vector.broadcast %50 : vector<64x1xf32> to vector<64x64xf32>
    %52 = arith.subf %44, %51 : vector<64x64xf32>
    %53 = arith.mulf %52, %52 : vector<64x64xf32>
    %cst_37 = arith.constant dense<0.000000e+00> : vector<64xf32>
    %54 = vector.multi_reduction <add>, %53, %cst_37 [1] : vector<64x64xf32> to vector<64xf32>
    %55 = vector.shape_cast %54 : vector<64xf32> to vector<64x1xf32>
    %cst_38 = arith.constant 6.400000e+01 : f32
    %56 = vector.broadcast %cst_38 : f32 to vector<64x1xf32>
    %57 = arith.divf %55, %56 : vector<64x1xf32>
    %58 = vector.broadcast %50 : vector<64x1xf32> to vector<64x64xf32>
    %59 = arith.subf %44, %58 : vector<64x64xf32>
    %cst_39 = arith.constant 9.99999974E-6 : f32
    %60 = vector.broadcast %cst_39 : f32 to vector<64x1xf32>
    %61 = arith.addf %57, %60 : vector<64x1xf32>
    %62 = math.rsqrt %61 : vector<64x1xf32>
    %63 = vector.broadcast %62 : vector<64x1xf32> to vector<64x64xf32>
    %64 = arith.mulf %59, %63 : vector<64x64xf32>
    %65 = vector.broadcast %45 : vector<1x64xf32> to vector<64x64xf32>
    %66 = arith.mulf %64, %65 : vector<64x64xf32>
    %67 = vector.broadcast %46 : vector<1x64xf32> to vector<64x64xf32>
    %68 = arith.addf %66, %67 : vector<64x64xf32>
    %69 = arith.truncf %68 : vector<64x64xf32> to vector<64x64xbf16>
    %70 = arith.truncf %6 : vector<64x192xf32> to vector<64x192xbf16>
    %cst_40 = arith.constant dense<0.000000e+00> : vector<64x192xf32>
    %71 = tpu.matmul %69, %70, %cst_40 {dimension_numbers = #tpu.dot_dimension_numbers<[1], [0], [0], [1], [0, 0, 1, 1], [], []>} : vector<64x64xbf16>, vector<64x192xbf16>, vector<64x192xf32> -> vector<64x192xf32>
    %72 = vector.broadcast %7 : vector<1x192xf32> to vector<64x192xf32>
    %73 = arith.addf %71, %72 : vector<64x192xf32>
    %74 = vector.extract_strided_slice %73 {offsets = [0, 0], sizes = [64, 64], strides = [1, 1]} : vector<64x192xf32> to vector<64x64xf32>
    %75 = vector.extract_strided_slice %73 {offsets = [0, 64], sizes = [64, 64], strides = [1, 1]} : vector<64x192xf32> to vector<64x64xf32>
    %76 = vector.extract_strided_slice %73 {offsets = [0, 128], sizes = [64, 64], strides = [1, 1]} : vector<64x192xf32> to vector<64x64xf32>
    %77 = arith.truncf %74 : vector<64x64xf32> to vector<64x64xbf16>
    %78 = arith.truncf %75 : vector<64x64xf32> to vector<64x64xbf16>
    %cst_41 = arith.constant dense<0.000000e+00> : vector<64x64xf32>
    %79 = tpu.matmul %77, %78, %cst_41 {dimension_numbers = #tpu.dot_dimension_numbers<[1], [1], [0], [0], [0, 0, 1, 0], [], []>} : vector<64x64xbf16>, vector<64x64xbf16>, vector<64x64xf32> -> vector<64x64xf32>
    %cst_42 = arith.constant 1.250000e-01 : f32
    %80 = vector.broadcast %cst_42 : f32 to vector<64x64xf32>
    %81 = arith.mulf %79, %80 : vector<64x64xf32>
    %cst_43 = arith.constant dense<0xFF800000> : vector<64xf32>
    %82 = vector.multi_reduction <maximumf>, %81, %cst_43 [1] : vector<64x64xf32> to vector<64xf32>
    %83 = vector.shape_cast %82 : vector<64xf32> to vector<64x1xf32>
    %84 = vector.broadcast %83 : vector<64x1xf32> to vector<64x64xf32>
    %85 = arith.subf %81, %84 : vector<64x64xf32>
    %86 = math.exp %85 : vector<64x64xf32>
    %cst_44 = arith.constant dense<0.000000e+00> : vector<64xf32>
    %87 = vector.multi_reduction <add>, %86, %cst_44 [1] : vector<64x64xf32> to vector<64xf32>
    %88 = vector.shape_cast %87 : vector<64xf32> to vector<64x1xf32>
    %89 = vector.broadcast %88 : vector<64x1xf32> to vector<64x64xf32>
    %90 = arith.divf %86, %89 : vector<64x64xf32>
    %91 = arith.truncf %90 : vector<64x64xf32> to vector<64x64xbf16>
    %92 = arith.truncf %76 : vector<64x64xf32> to vector<64x64xbf16>
    %cst_45 = arith.constant dense<0.000000e+00> : vector<64x64xf32>
    %93 = tpu.matmul %91, %92, %cst_45 {dimension_numbers = #tpu.dot_dimension_numbers<[1], [0], [0], [1], [0, 0, 1, 1], [], []>} : vector<64x64xbf16>, vector<64x64xbf16>, vector<64x64xf32> -> vector<64x64xf32>
    %94 = arith.truncf %93 : vector<64x64xf32> to vector<64x64xbf16>
    %95 = arith.truncf %8 : vector<64x64xf32> to vector<64x64xbf16>
    %cst_46 = arith.constant dense<0.000000e+00> : vector<64x64xf32>
    %96 = tpu.matmul %94, %95, %cst_46 {dimension_numbers = #tpu.dot_dimension_numbers<[1], [0], [0], [1], [0, 0, 1, 1], [], []>} : vector<64x64xbf16>, vector<64x64xbf16>, vector<64x64xf32> -> vector<64x64xf32>
    %97 = arith.addf %44, %96 : vector<64x64xf32>
    %98 = vector.broadcast %9 : vector<1x64xf32> to vector<64x64xf32>
    %99 = arith.addf %97, %98 : vector<64x64xf32>
    %100 = vector.extract_strided_slice %4 {offsets = [2, 0], sizes = [1, 64], strides = [1, 1]} : vector<4x64xf32> to vector<1x64xf32>
    %101 = vector.extract_strided_slice %5 {offsets = [2, 0], sizes = [1, 64], strides = [1, 1]} : vector<4x64xf32> to vector<1x64xf32>
    %cst_47 = arith.constant dense<0.000000e+00> : vector<64xf32>
    %102 = vector.multi_reduction <add>, %99, %cst_47 [1] : vector<64x64xf32> to vector<64xf32>
    %103 = vector.shape_cast %102 : vector<64xf32> to vector<64x1xf32>
    %cst_48 = arith.constant 6.400000e+01 : f32
    %104 = vector.broadcast %cst_48 : f32 to vector<64x1xf32>
    %105 = arith.divf %103, %104 : vector<64x1xf32>
    %106 = vector.broadcast %105 : vector<64x1xf32> to vector<64x64xf32>
    %107 = arith.subf %99, %106 : vector<64x64xf32>
    %108 = arith.mulf %107, %107 : vector<64x64xf32>
    %cst_49 = arith.constant dense<0.000000e+00> : vector<64xf32>
    %109 = vector.multi_reduction <add>, %108, %cst_49 [1] : vector<64x64xf32> to vector<64xf32>
    %110 = vector.shape_cast %109 : vector<64xf32> to vector<64x1xf32>
    %cst_50 = arith.constant 6.400000e+01 : f32
    %111 = vector.broadcast %cst_50 : f32 to vector<64x1xf32>
    %112 = arith.divf %110, %111 : vector<64x1xf32>
    %113 = vector.broadcast %105 : vector<64x1xf32> to vector<64x64xf32>
    %114 = arith.subf %99, %113 : vector<64x64xf32>
    %cst_51 = arith.constant 9.99999974E-6 : f32
    %115 = vector.broadcast %cst_51 : f32 to vector<64x1xf32>
    %116 = arith.addf %112, %115 : vector<64x1xf32>
    %117 = math.rsqrt %116 : vector<64x1xf32>
    %118 = vector.broadcast %117 : vector<64x1xf32> to vector<64x64xf32>
    %119 = arith.mulf %114, %118 : vector<64x64xf32>
    %120 = vector.broadcast %100 : vector<1x64xf32> to vector<64x64xf32>
    %121 = arith.mulf %119, %120 : vector<64x64xf32>
    %122 = vector.broadcast %101 : vector<1x64xf32> to vector<64x64xf32>
    %123 = arith.addf %121, %122 : vector<64x64xf32>
    %124 = arith.truncf %123 : vector<64x64xf32> to vector<64x64xbf16>
    %125 = arith.truncf %10 : vector<64x128xf32> to vector<64x128xbf16>
    %cst_52 = arith.constant dense<0.000000e+00> : vector<64x128xf32>
    %126 = tpu.matmul %124, %125, %cst_52 {dimension_numbers = #tpu.dot_dimension_numbers<[1], [0], [0], [1], [0, 0, 1, 1], [], []>} : vector<64x64xbf16>, vector<64x128xbf16>, vector<64x128xf32> -> vector<64x128xf32>
    %127 = vector.broadcast %11 : vector<1x128xf32> to vector<64x128xf32>
    %128 = arith.addf %126, %127 : vector<64x128xf32>
    %129 = arith.mulf %128, %128 : vector<64x128xf32>
    %130 = arith.mulf %128, %129 : vector<64x128xf32>
    %cst_53 = arith.constant 4.471500e-02 : f32
    %131 = vector.broadcast %cst_53 : f32 to vector<64x128xf32>
    %132 = arith.mulf %131, %130 : vector<64x128xf32>
    %133 = arith.addf %128, %132 : vector<64x128xf32>
    %cst_54 = arith.constant 0.797884583 : f32
    %134 = vector.broadcast %cst_54 : f32 to vector<64x128xf32>
    %135 = arith.mulf %134, %133 : vector<64x128xf32>
    %136 = math.tanh %135 : vector<64x128xf32>
    %cst_55 = arith.constant 1.000000e+00 : f32
    %137 = vector.broadcast %cst_55 : f32 to vector<64x128xf32>
    %138 = arith.addf %137, %136 : vector<64x128xf32>
    %cst_56 = arith.constant 5.000000e-01 : f32
    %139 = vector.broadcast %cst_56 : f32 to vector<64x128xf32>
    %140 = arith.mulf %139, %138 : vector<64x128xf32>
    %141 = arith.mulf %128, %140 : vector<64x128xf32>
    %142 = arith.truncf %141 : vector<64x128xf32> to vector<64x128xbf16>
    %143 = arith.truncf %12 : vector<128x64xf32> to vector<128x64xbf16>
    %cst_57 = arith.constant dense<0.000000e+00> : vector<64x64xf32>
    %144 = tpu.matmul %142, %143, %cst_57 {dimension_numbers = #tpu.dot_dimension_numbers<[1], [0], [0], [1], [0, 0, 1, 1], [], []>} : vector<64x128xbf16>, vector<128x64xbf16>, vector<64x64xf32> -> vector<64x64xf32>
    %145 = arith.addf %99, %144 : vector<64x64xf32>
    %146 = vector.broadcast %13 : vector<1x64xf32> to vector<64x64xf32>
    %147 = arith.addf %145, %146 : vector<64x64xf32>
    %148 = vector.extract_strided_slice %4 {offsets = [3, 0], sizes = [1, 64], strides = [1, 1]} : vector<4x64xf32> to vector<1x64xf32>
    %149 = vector.extract_strided_slice %5 {offsets = [3, 0], sizes = [1, 64], strides = [1, 1]} : vector<4x64xf32> to vector<1x64xf32>
    %cst_58 = arith.constant dense<0.000000e+00> : vector<64xf32>
    %150 = vector.multi_reduction <add>, %147, %cst_58 [1] : vector<64x64xf32> to vector<64xf32>
    %151 = vector.shape_cast %150 : vector<64xf32> to vector<64x1xf32>
    %cst_59 = arith.constant 6.400000e+01 : f32
    %152 = vector.broadcast %cst_59 : f32 to vector<64x1xf32>
    %153 = arith.divf %151, %152 : vector<64x1xf32>
    %154 = vector.broadcast %153 : vector<64x1xf32> to vector<64x64xf32>
    %155 = arith.subf %147, %154 : vector<64x64xf32>
    %156 = arith.mulf %155, %155 : vector<64x64xf32>
    %cst_60 = arith.constant dense<0.000000e+00> : vector<64xf32>
    %157 = vector.multi_reduction <add>, %156, %cst_60 [1] : vector<64x64xf32> to vector<64xf32>
    %158 = vector.shape_cast %157 : vector<64xf32> to vector<64x1xf32>
    %cst_61 = arith.constant 6.400000e+01 : f32
    %159 = vector.broadcast %cst_61 : f32 to vector<64x1xf32>
    %160 = arith.divf %158, %159 : vector<64x1xf32>
    %161 = vector.broadcast %153 : vector<64x1xf32> to vector<64x64xf32>
    %162 = arith.subf %147, %161 : vector<64x64xf32>
    %cst_62 = arith.constant 9.99999974E-6 : f32
    %163 = vector.broadcast %cst_62 : f32 to vector<64x1xf32>
    %164 = arith.addf %160, %163 : vector<64x1xf32>
    %165 = math.rsqrt %164 : vector<64x1xf32>
    %166 = vector.broadcast %165 : vector<64x1xf32> to vector<64x64xf32>
    %167 = arith.mulf %162, %166 : vector<64x64xf32>
    %168 = vector.broadcast %148 : vector<1x64xf32> to vector<64x64xf32>
    %169 = arith.mulf %167, %168 : vector<64x64xf32>
    %170 = vector.broadcast %149 : vector<1x64xf32> to vector<64x64xf32>
    %171 = arith.addf %169, %170 : vector<64x64xf32>
    %172 = arith.truncf %171 : vector<64x64xf32> to vector<64x64xbf16>
    %173 = arith.truncf %14 : vector<64x128xf32> to vector<64x128xbf16>
    %cst_63 = arith.constant dense<0.000000e+00> : vector<64x128xf32>
    %174 = tpu.matmul %172, %173, %cst_63 {dimension_numbers = #tpu.dot_dimension_numbers<[1], [0], [0], [1], [0, 0, 1, 1], [], []>} : vector<64x64xbf16>, vector<64x128xbf16>, vector<64x128xf32> -> vector<64x128xf32>
    %175 = vector.broadcast %15 : vector<1x128xf32> to vector<64x128xf32>
    %176 = arith.addf %174, %175 : vector<64x128xf32>
    %177 = arith.mulf %176, %176 : vector<64x128xf32>
    %178 = arith.mulf %176, %177 : vector<64x128xf32>
    %cst_64 = arith.constant 4.471500e-02 : f32
    %179 = vector.broadcast %cst_64 : f32 to vector<64x128xf32>
    %180 = arith.mulf %179, %178 : vector<64x128xf32>
    %181 = arith.addf %176, %180 : vector<64x128xf32>
    %cst_65 = arith.constant 0.797884583 : f32
    %182 = vector.broadcast %cst_65 : f32 to vector<64x128xf32>
    %183 = arith.mulf %182, %181 : vector<64x128xf32>
    %184 = math.tanh %183 : vector<64x128xf32>
    %cst_66 = arith.constant 1.000000e+00 : f32
    %185 = vector.broadcast %cst_66 : f32 to vector<64x128xf32>
    %186 = arith.addf %185, %184 : vector<64x128xf32>
    %cst_67 = arith.constant 5.000000e-01 : f32
    %187 = vector.broadcast %cst_67 : f32 to vector<64x128xf32>
    %188 = arith.mulf %187, %186 : vector<64x128xf32>
    %189 = arith.mulf %176, %188 : vector<64x128xf32>
    %c0_68 = arith.constant 0 : index
    %c0_69 = arith.constant 0 : index
    %190 = vector.load %arg16[%c0_68, %c0_69] : memref<3x128xf32, #tpu.memory_space<vmem>>, vector<3x128xf32>
    %cst_70 = arith.constant dense<0.000000e+00> : vector<3x64xf32>
    %191 = tpu.matmul %190, %189, %cst_70 {dimension_numbers = #tpu.dot_dimension_numbers<[1], [1], [0], [0], [0, 0, 1, 0], [], []>} : vector<3x128xf32>, vector<64x128xf32>, vector<3x64xf32> -> vector<3x64xf32>
    %c0_71 = arith.constant 0 : index
    %c0_72 = arith.constant 0 : index
    %192 = vector.load %arg18[%c0_71, %c0_72] : memref<64x1024xf32, #tpu.memory_space<vmem>>, vector<64x1024xf32>
    %cst_73 = arith.constant dense<0.000000e+00> : vector<3x1024xf32>
    %193 = tpu.matmul %191, %192, %cst_73 {dimension_numbers = #tpu.dot_dimension_numbers<[1], [0], [0], [1], [0, 0, 1, 1], [], []>} : vector<3x64xf32>, vector<64x1024xf32>, vector<3x1024xf32> -> vector<3x1024xf32>
    %c0_74 = arith.constant 0 : index
    %c0_75 = arith.constant 0 : index
    %194 = vector.load %arg17[%c0_74, %c0_75] : memref<3x1xf32, #tpu.memory_space<vmem>>, vector<3x1xf32>
    %195 = vector.broadcast %194 : vector<3x1xf32> to vector<3x1024xf32>
    %196 = arith.addf %193, %195 : vector<3x1024xf32>
    %c0_76 = arith.constant 0 : index
    %c0_77 = arith.constant 0 : index
    %c0_78 = arith.constant 0 : index
    %197 = vector.load %arg19[%c0_76, %c0_77, %c0_78] : memref<1x3x1024xf32, #tpu.memory_space<vmem>>, vector<1x3x1024xf32>
    %198 = vector.shape_cast %197 : vector<1x3x1024xf32> to vector<3x1024xf32>
    %199 = vector.shape_cast %196 : vector<3x1024xf32> to vector<1x3x1024xf32>
    tpu.vector_store %arg19[%c0_76, %c0_77, %c0_78], %199 {strides = array<i32>} : memref<1x3x1024xf32, #tpu.memory_space<vmem>>, vector<1x3x1024xf32>,
    return
  }
  func.func @transform_0(%arg0: i32) -> (i32, i32, i32) {
    %c0_i32 = arith.constant 0 : i32
    %c0_i32_0 = arith.constant 0 : i32
    %c0_i32_1 = arith.constant 0 : i32
    return %arg0, %c0_i32, %c0_i32_0 : i32, i32, i32
  }
  func.func @transform_1(%arg0: i32) -> (i32, i32) {
    %c0_i32 = arith.constant 0 : i32
    %c0_i32_0 = arith.constant 0 : i32
    %c0_i32_1 = arith.constant 0 : i32
    return %c0_i32, %c0_i32_0 : i32, i32
  }
  func.func @transform_2(%arg0: i32) -> (i32, i32) {
    %c0_i32 = arith.constant 0 : i32
    %c0_i32_0 = arith.constant 0 : i32
    %c0_i32_1 = arith.constant 0 : i32
    return %c0_i32, %c0_i32_0 : i32, i32
  }
  func.func @transform_3(%arg0: i32) -> (i32, i32) {
    %c0_i32 = arith.constant 0 : i32
    %c0_i32_0 = arith.constant 0 : i32
    %c0_i32_1 = arith.constant 0 : i32
    return %c0_i32, %c0_i32_0 : i32, i32
  }
  func.func @transform_4(%arg0: i32) -> (i32, i32) {
    %c0_i32 = arith.constant 0 : i32
    %c0_i32_0 = arith.constant 0 : i32
    %c0_i32_1 = arith.constant 0 : i32
    return %c0_i32, %c0_i32_0 : i32, i32
  }
  func.func @transform_5(%arg0: i32) -> (i32, i32) {
    %c0_i32 = arith.constant 0 : i32
    %c0_i32_0 = arith.constant 0 : i32
    %c0_i32_1 = arith.constant 0 : i32
    return %c0_i32, %c0_i32_0 : i32, i32
  }
  func.func @transform_6(%arg0: i32) -> (i32, i32) {
    %c0_i32 = arith.constant 0 : i32
    %c0_i32_0 = arith.constant 0 : i32
    %c0_i32_1 = arith.constant 0 : i32
    return %c0_i32, %c0_i32_0 : i32, i32
  }
  func.func @transform_7(%arg0: i32) -> (i32, i32) {
    %c0_i32 = arith.constant 0 : i32
    %c0_i32_0 = arith.constant 0 : i32
    %c0_i32_1 = arith.constant 0 : i32
    return %c0_i32, %c0_i32_0 : i32, i32
  }
  func.func @transform_8(%arg0: i32) -> (i32, i32) {
    %c0_i32 = arith.constant 0 : i32
    %c0_i32_0 = arith.constant 0 : i32
    %c0_i32_1 = arith.constant 0 : i32
    return %c0_i32, %c0_i32_0 : i32, i32
  }
  func.func @transform_9(%arg0: i32) -> (i32, i32) {
    %c0_i32 = arith.constant 0 : i32
    %c0_i32_0 = arith.constant 0 : i32
    %c0_i32_1 = arith.constant 0 : i32
    return %c0_i32, %c0_i32_0 : i32, i32
  }
  func.func @transform_10(%arg0: i32) -> (i32, i32) {
    %c0_i32 = arith.constant 0 : i32
    %c0_i32_0 = arith.constant 0 : i32
    %c0_i32_1 = arith.constant 0 : i32
    return %c0_i32, %c0_i32_0 : i32, i32
  }
  func.func @transform_11(%arg0: i32) -> (i32, i32) {
    %c0_i32 = arith.constant 0 : i32
    %c0_i32_0 = arith.constant 0 : i32
    %c0_i32_1 = arith.constant 0 : i32
    return %c0_i32, %c0_i32_0 : i32, i32
  }
  func.func @transform_12(%arg0: i32) -> (i32, i32) {
    %c0_i32 = arith.constant 0 : i32
    %c0_i32_0 = arith.constant 0 : i32
    %c0_i32_1 = arith.constant 0 : i32
    return %c0_i32, %c0_i32_0 : i32, i32
  }
  func.func @transform_13(%arg0: i32) -> (i32, i32) {
    %c0_i32 = arith.constant 0 : i32
    %c0_i32_0 = arith.constant 0 : i32
    %c0_i32_1 = arith.constant 0 : i32
    return %c0_i32, %c0_i32_0 : i32, i32
  }
  func.func @transform_14(%arg0: i32) -> (i32, i32) {
    %c0_i32 = arith.constant 0 : i32
    %c0_i32_0 = arith.constant 0 : i32
    %c0_i32_1 = arith.constant 0 : i32
    return %c0_i32, %c0_i32_0 : i32, i32
  }
  func.func @transform_15(%arg0: i32) -> (i32, i32) {
    %c0_i32 = arith.constant 0 : i32
    %c0_i32_0 = arith.constant 0 : i32
    %c0_i32_1 = arith.constant 0 : i32
    return %c0_i32, %c0_i32_0 : i32, i32
  }
  func.func @transform_16(%arg0: i32) -> (i32, i32) {
    %c0_i32 = arith.constant 0 : i32
    %c0_i32_0 = arith.constant 0 : i32
    %c0_i32_1 = arith.constant 0 : i32
    return %c0_i32, %c0_i32_0 : i32, i32
  }
  func.func @transform_17(%arg0: i32) -> (i32, i32) {
    %c0_i32 = arith.constant 0 : i32
    %c0_i32_0 = arith.constant 0 : i32
    %c0_i32_1 = arith.constant 0 : i32
    return %c0_i32, %c0_i32_0 : i32, i32
  }
  func.func @transform_18(%arg0: i32) -> (i32, i32, i32) {
    %c0_i32 = arith.constant 0 : i32
    %c0_i32_0 = arith.constant 0 : i32
    %c0_i32_1 = arith.constant 0 : i32
    return %arg0, %c0_i32, %c0_i32_0 : i32, i32, i32
  }
}

</mosaic_0001>

<bundles_post_ra>
// kernel: tissue_cell_segformer_forward.2
= control target key start
LH: loop header
LB: loop body
LE: loop exit
PB: predicated region body
PF: predicated region fallthrough
CT: control target
= control target key end

     0   :  { %s3580_s26 = smov 0   ;;  %s4481_s0 = inlined_call_operand.vmem [shape: f32[2,64,256], index: 0, kind: input, shape index: {}]   ;;  %s4482_s1 = inlined_call_operand.vmem [shape: f32[2,32,32], index: 1, kind: input, shape index: {}]   ;;  %s4483_s2 = inlined_call_operand.vmem [shape: f32[2,32,32], index: 2, kind: input, shape index: {}]   ;;  %s4484_s3 = inlined_call_operand.vmem [shape: f32[256,64], index: 3, kind: input, shape index: {}]   ;;  %s4485_s4 = inlined_call_operand.vmem [shape: f32[1,64], index: 4, kind: input, shape index: {}]   ;;  %s4486_s5 = inlined_call_operand.vmem [shape: f32[4,64], index: 5, kind: input, shape index: {}]   ;;  %s4487_s6 = inlined_call_operand.vmem [shape: f32[4,64], index: 6, kind: input, shape index: {}]   ;;  %s4488_s7 = inlined_call_operand.vmem [shape: f32[64,192], index: 7, kind: input, shape index: {}]   ;;  %s4489_s8 = inlined_call_operand.vmem [shape: f32[1,192], index: 8, kind: input, shape index: {}]   ;;  %s4490_s9 = inlined_call_operand.vmem [shape: f32[64,64], index: 9, kind: input, shape index: {}]   ;;  %s4491_s10 = inlined_call_operand.vmem [shape: f32[1,64], index: 10, kind: input, shape index: {}]   ;;  %s4492_s11 = inlined_call_operand.vmem [shape: f32[64,128], index: 11, kind: input, shape index: {}]   ;;  %s4493_s12 = inlined_call_operand.vmem [shape: f32[1,128], index: 12, kind: input, shape index: {}]   ;;  %s4494_s13 = inlined_call_operand.vmem [shape: f32[128,64], index: 13, kind: input, shape index: {}]   ;;  %s4495_s14 = inlined_call_operand.vmem [shape: f32[1,64], index: 14, kind: input, shape index: {}]   ;;  %s4496_s15 = inlined_call_operand.vmem [shape: f32[64,128], index: 15, kind: input, shape index: {}]   ;;  %s4497_s16 = inlined_call_operand.vmem [shape: f32[1,128], index: 16, kind: input, shape index: {}]   ;;  %s4498_s17 = inlined_call_operand.vmem [shape: f32[1,128], index: 17, kind: input, shape index: {}]   ;;  %s4499_s18 = inlined_call_operand.<no memory space> [shape: f32[1,1], index: 18, kind: input, shape index: {}]   ;;  %s4500_s19 = inlined_call_operand.vmem [shape: f32[32,64], index: 19, kind: input, shape index: {}]   ;;  %s4501_s20 = inlined_call_operand.vmem [shape: f32[64,32], index: 20, kind: input, shape index: {}]   ;;  %s4502_s21 = inlined_call_operand.vmem [shape: f32[2,32,32], index: 21, kind: output, shape index: {}]  }
   0x1   :  { %4505 = sst [smem:[#allocation3_spill]] %s4481_s0  ;;  %v26_v0 = vstv %s4499_s18 }
   0x2   :  { %4506 = sst [smem:[#allocation4_spill]] %s4482_s1  ;;  %27 = vst [vmem:[#allocation2] sm:$0x1] %v26_v0 }
   0x3   :  { %4507 = sst [smem:[#allocation5_spill]] %s4483_s2 }
   0x4   :  { %4508 = sst [smem:[#allocation6_spill]] %s4484_s3 }
   0x5   :  { %4509 = sst [smem:[#allocation7_spill]] %s4485_s4 }
   0x6   :  { %4510 = sst [smem:[#allocation8_spill]] %s4486_s5 }
   0x7 LB: > { %s2867_s27 = sadd.s32 4294967295, %s3460_s26   ;;  %p2871_p0 = scmp.ge.s32.totalorder %s3460_s26, 1  ;;  %s3460_s26 = sphi %s3580_s26, %s33_s26  }
   0x8   : > { %p609_p1 = scmp.lt.s32.totalorder %s3460_s26, 3 }
   0xa   : > { %p610_p2 = pnand %p2871_p0, %p609_p1 }
   0xb   : > { %s4511_s29 = sld [smem:[#allocation6_spill]] (!%p610_p2)  ;;  %p679_p3 = scmp.lt.s32.totalorder (!%p610_p2), %s2867_s27, 1  ;;  %vm907_vm0 = vcmask (!%p610_p2), 523264   ;;  %vm3465_vm1 = vmmov (!%p610_p2), 0   ;;  %vm2573_vm2 = vcmask (!%p610_p2), 261120  }
   0xc   : > { %613 = sbr.rel (%p610_p2) target bundleno = 4519 (0x11a7), region = 104  ;;  %s4512_s30 = sld [smem:[#allocation3_spill]] (!%p610_p2)  ;;  %vm3267_vm3 = vmpackc.low (!%p610_p2), %vm2573_vm2, %vm2573_vm2 }
   0xd   : > { %s4513_s24 = sld [smem:[#allocation7_spill]] (!%p610_p2)  ;;  %s4514_s25 = sld [smem:[#allocation8_spill]] (!%p610_p2) }
   0xe   : > { %s3463_s3 = smov (!%p610_p2), 64   ;;  %s4515_s28 = sld [smem:[#allocation5_spill]] (!%p610_p2) }
   0xf   : > { %s4516_s4 = sld [smem:[#allocation4_spill]] (!%p610_p2) }
  0x11   : > { %v732_v1 = vld [vmem:[%s4511_s29 + $0x80] sm:$0xff] (!%p610_p2)  ;;  %v733_v2 = vld [vmem:[%s4511_s29 + $0x88] sm:$0xff] (!%p610_p2)  ;;  %v734_v6 = vld [vmem:[%s4511_s29 + $0x90] sm:$0xff] (!%p610_p2) }
  0x12   : > { %v716_v3 = vld [vmem:[%s4511_s29] sm:$0xff] (!%p610_p2)  ;;  %v828_v4 = vpack.c.bf16 (!%p610_p2), %v733_v2, %v732_v1  ;;  %v717_v5 = vld [vmem:[%s4511_s29 + $0x8] sm:$0xff] (!%p610_p2)  ;;  %v735_v7 = vld [vmem:[%s4511_s29 + $0x98] sm:$0xff] (!%p610_p2) }
  0x13   : > { %v820_v8 = vpack.c.bf16 %v717_v5, %v716_v3  ;;  %v829_v9 = vpack.c.bf16 %v735_v7, %v734_v6  ;;  %v718_v10 = vld [vmem:[%s4511_s29 + $0x10] sm:$0xff]  ;;  %v719_v11 = vld [vmem:[%s4511_s29 + $0x18] sm:$0xff]  ;;  %v736_v12 = vld [vmem:[%s4511_s29 + $0xa0] sm:$0xff]  ;;  %s4518_s27 = smov (!%p679_p3, %s2867_s27), 1 }
  0x14   : > { %2936 = vmatprep.subr.bf16.mxu0 %v828_v4  ;;  %v737_v13 = vld [vmem:[%s4511_s29 + $0xa8] sm:$0xff]  ;;  %v821_v14 = vpack.c.bf16 %v719_v11, %v718_v10  ;;  %s2932_s22 = sshll.u32 %s4518_s27, 7  ;;  %v720_v16 = vld [vmem:[%s4511_s29 + $0x20] sm:$0xff]  ;;  %v738_v18 = vld [vmem:[%s4511_s29 + $0xb0] sm:$0xff]  ;;  %s4450_s2 = sshll.u32 %s4518_s27, 5 }
  0x15   : > { %2937 = vmatpush3.bf16.msra.mxu0 %v820_v8  ;;  %v830_v15 = vpack.c.bf16 %v737_v13, %v736_v12  ;;  %v721_v17 = vld [vmem:[%s4511_s29 + $0x28] sm:$0xff]  ;;  %v739_v19 = vld [vmem:[%s4511_s29 + $0xb8] sm:$0xff]  ;;  %s3636_s5 = scalar_lea.vmem %s4512_s30, %s2932_s22  ;;  %v722_v22 = vld [vmem:[%s4511_s29 + $0x30] sm:$0xff]  ;;  %s693_s18 = scalar_lea.vmem %s4515_s28, %s4450_s2 }
  0x16   : > { %2938 = vmatprep.subr.bf16.mxu0 %v829_v9  ;;  %v822_v20 = vpack.c.bf16 %v721_v17, %v720_v16  ;;  %v831_v21 = vpack.c.bf16 %v739_v19, %v738_v18  ;;  %v723_v23 = vld [vmem:[%s4511_s29 + $0x38] sm:$0xff]  ;;  %v740_v24 = vld [vmem:[%s4511_s29 + $0xc0] sm:$0xff]  ;;  %v741_v25 = vld [vmem:[%s4511_s29 + $0xc8] sm:$0xff]  ;;  %s688_s30 = scalar_lea.vmem %s4516_s4, %s4450_s2 }
  0x17   : > { %v701_v26 = vld [vmem:[%s3636_s5 + $0x8] sm:$0xff]  ;;  %v703_v27 = vld [vmem:[%s3636_s5 + $0x18] sm:$0xff]  ;;  %v823_v28 = vpack.c.bf16 %v723_v23, %v722_v22  ;;  %v832_v30 = vpack.c.bf16 %v741_v25, %v740_v24  ;;  %v724_v31 = vld [vmem:[%s4511_s29 + $0x40] sm:$0xff] }
  0x18   : > { %v813_v29 = vpack.c.bf16 %v703_v27, %v701_v26  ;;  %v725_v32 = vld [vmem:[%s4511_s29 + $0x48] sm:$0xff]  ;;  %v742_v33 = vld [vmem:[%s4511_s29 + $0xd0] sm:$0xff]  ;;  %v743_v34 = vld [vmem:[%s4511_s29 + $0xd8] sm:$0xff] }
  0x19   : > { %2939 = vmatpush3.bf16.msra.mxu0 %v821_v14  ;;  %v824_v35 = vpack.c.bf16 %v725_v32, %v724_v31  ;;  %v833_v36 = vpack.c.bf16 %v743_v34, %v742_v33  ;;  %v726_v37 = vld [vmem:[%s4511_s29 + $0x50] sm:$0xff]  ;;  %v727_v38 = vld [vmem:[%s4511_s29 + $0x58] sm:$0xff]  ;;  %v744_v39 = vld [vmem:[%s4511_s29 + $0xe0] sm:$0xff] }
  0x1a   : > { %2940 = vmatprep.subr.bf16.mxu0 %v830_v15  ;;  %874 = vmatprep.mubr.bf16.mxu0 %v813_v29  ;;  %v745_v40 = vld [vmem:[%s4511_s29 + $0xe8] sm:$0xff]  ;;  %v825_v41 = vpack.c.bf16 %v727_v38, %v726_v37  ;;  %v728_v43 = vld [vmem:[%s4511_s29 + $0x60] sm:$0xff]  ;;  %v746_v45 = vld [vmem:[%s4511_s29 + $0xf0] sm:$0xff] }
  0x1b   : > { %v834_v42 = vpack.c.bf16 %v745_v40, %v744_v39  ;;  %v729_v44 = vld [vmem:[%s4511_s29 + $0x68] sm:$0xff]  ;;  %v747_v46 = vld [vmem:[%s4511_s29 + $0xf8] sm:$0xff]  ;;  %v730_v49 = vld [vmem:[%s4511_s29 + $0x70] sm:$0xff] }
  0x1c   : > { %v826_v47 = vpack.c.bf16 %v729_v44, %v728_v43  ;;  %v835_v48 = vpack.c.bf16 %v747_v46, %v746_v45  ;;  %v731_v50 = vld [vmem:[%s4511_s29 + $0x78] sm:$0xff]  ;;  %v700_v52 = vld [vmem:[%s3636_s5] sm:$0xff]  ;;  %v702_v53 = vld [vmem:[%s3636_s5 + $0x10] sm:$0xff] }
  0x1d   : > { %2941 = vmatpush3.bf16.msra.mxu0 %v822_v20  ;;  %v827_v51 = vpack.c.bf16 %v731_v50, %v730_v49  ;;  %v705_v54 = vld [vmem:[%s3636_s5 + $0x28] sm:$0xff]  ;;  %v707_v55 = vld [vmem:[%s3636_s5 + $0x38] sm:$0xff]  ;;  %v812_v56 = vpack.c.bf16 %v702_v53, %v700_v52  ;;  %v704_v58 = vld [vmem:[%s3636_s5 + $0x20] sm:$0xff] }
  0x1e   : > { %2942 = vmatprep.subr.bf16.mxu0 %v831_v21  ;;  %v815_v57 = vpack.c.bf16 %v707_v55, %v705_v54  ;;  %v706_v59 = vld [vmem:[%s3636_s5 + $0x30] sm:$0xff]  ;;  %v709_v60 = vld [vmem:[%s3636_s5 + $0x48] sm:$0xff]  ;;  %v711_v61 = vld [vmem:[%s3636_s5 + $0x58] sm:$0xff] }
  0x1f   : > { %v814_v62 = vpack.c.bf16 %v706_v59, %v704_v58  ;;  %v817_v63 = vpack.c.bf16 %v711_v61, %v709_v60  ;;  %v708_v0 = vld [vmem:[%s3636_s5 + $0x40] sm:$0xff]  ;;  %v710_v1 = vld [vmem:[%s3636_s5 + $0x50] sm:$0xff]  ;;  %v713_v2 = vld [vmem:[%s3636_s5 + $0x68] sm:$0xff] }
  0x20   : > { %v715_v3 = vld [vmem:[%s3636_s5 + $0x78] sm:$0xff]  ;;  %v816_v4 = vpack.c.bf16 %v710_v1, %v708_v0  ;;  %v712_v6 = vld [vmem:[%s3636_s5 + $0x60] sm:$0xff]  ;;  %v714_v7 = vld [vmem:[%s3636_s5 + $0x70] sm:$0xff] }
  0x21   : > { %2943 = vmatpush3.bf16.msra.mxu0 %v823_v28  ;;  %v819_v5 = vpack.c.bf16 %v715_v3, %v713_v2  ;;  %v818_v8 = vpack.c.bf16 %v714_v7, %v712_v6  ;;  %v2880_v11 = vld [vmem:[%s4513_s24] ss:$0 sm:$0xff]  ;;  %s698_s24 = scalar_lea.vmem %s4502_s21, %s4450_s2 }
  0x22   : > { %2944 = vmatprep.subr.bf16.mxu0 %v832_v30 }
  0x25   : > { %2945 = vmatpush3.bf16.msra.mxu0 %v824_v35 }
  0x26   : > { %2946 = vmatprep.subr.bf16.mxu0 %v833_v36 }
  0x29   : > { %2947 = vmatpush3.bf16.msra.mxu0 %v825_v41 }
  0x2a   : > { %2948 = vmatprep.subr.bf16.mxu0 %v834_v42 }
  0x2d   : > { %2949 = vmatpush3.bf16.msra.mxu0 %v826_v47 }
  0x2e   : > { %2950 = vmatprep.subr.bf16.mxu0 %v835_v48 }
  0x31   : > { %2951 = vmatpush3.bf16.msra.mxu0 %v827_v51 }
  0x34   : > { %875 = vmatmul.mubr.bf16.vlgmr.msra.gmra.mrb[0].mxu0 %v812_v56 }
  0x35   : > { %882 = vmatprep.mubr.bf16.mxu0 %v815_v57 }
  0x3c   : > { %883 = vmatmul.mubr.bf16.gmra.mrb[4].mxu0 %v814_v62 }
  0x3d   : > { %890 = vmatprep.mubr.bf16.mxu0 %v817_v63 }
  0x44   : > { %891 = vmatmul.mubr.bf16.gmra.mrb[8].mxu0 %v816_v4 }
  0x45   : > { %898 = vmatprep.mubr.bf16.mxu0 %v819_v5 }
  0x4c   : > { %899 = vmatmul.mubr.bf16.gmra.mrb[12].mxu0 %v818_v8 }
 0x107   : > { %v2952_v9 = vpop.f32.mrb[0].mxu0 }
 0x108   : > { %v2953_v10 = vpop.f32.mrb[1].mxu0 }
 0x109   : > { %v2954_v12 = vadd.f32 %v2953_v10, %v2952_v9  ;;  %v2955_v13 = vpop.f32.mrb[2].mxu0 }
 0x10a   : > { %v2956_v14 = vpop.f32.mrb[3].mxu0 }
 0x10b   : > { %v2957_v15 = vadd.f32 %v2956_v14, %v2955_v13  ;;  %v877_v16 = vadd.f32 %v2954_v12, %v2880_v11 }
 0x10d   : > { %v908_v17 = vsel %vm907_vm0, %v877_v16, 0.0  ;;  %v880_v18 = vadd.f32 %v2957_v15, %v2880_v11 }
 0x10e   : > { %909 = vadd.xlane.f32.xlu0 %v908_v17 }
 0x10f   : > { %v2958_v19 = vpop.f32.mrb[4].mxu0  ;;  %v911_v23 = vsel %vm907_vm0, %v880_v18, 0.0 }
 0x110   : > { %v2959_v20 = vpop.f32.mrb[5].mxu0 }
 0x111   : > { %v2960_v21 = vadd.f32 %v2959_v20, %v2958_v19  ;;  %v2961_v22 = vpop.f32.mrb[6].mxu0 }
 0x112   : > { %v2962_v24 = vpop.f32.mrb[7].mxu0  ;;  %912 = vadd.xlane.f32.xlu0 %v911_v23 }
 0x113   : > { %v2963_v25 = vadd.f32 %v2962_v24, %v2961_v22  ;;  %v885_v26 = vadd.f32 %v2960_v21, %v2880_v11 }
 0x115   : > { %v914_v27 = vsel %vm907_vm0, %v885_v26, 0.0  ;;  %v888_v28 = vadd.f32 %v2963_v25, %v2880_v11 }
 0x116   : > { %915 = vadd.xlane.f32.xlu1 %v914_v27 }
 0x117   : > { %v2964_v29 = vpop.f32.mrb[8].mxu0  ;;  %v917_v33 = vsel %vm907_vm0, %v888_v28, 0.0 }
 0x118   : > { %v2965_v30 = vpop.f32.mrb[9].mxu0 }
 0x119   : > { %v2966_v31 = vadd.f32 %v2965_v30, %v2964_v29  ;;  %v2967_v32 = vpop.f32.mrb[10].mxu0 }
 0x11a   : > { %v2968_v34 = vpop.f32.mrb[11].mxu0  ;;  %918 = vadd.xlane.f32.xlu1 %v917_v33 }
 0x11b   : > { %v2969_v35 = vadd.f32 %v2968_v34, %v2967_v32  ;;  %v893_v36 = vadd.f32 %v2966_v31, %v2880_v11 }
 0x11d   : > { %v920_v37 = vsel %vm907_vm0, %v893_v36, 0.0  ;;  %v896_v38 = vadd.f32 %v2969_v35, %v2880_v11 }
 0x11e   : > { %921 = vadd.xlane.f32.xlu0 %v920_v37 }
 0x11f   : > { %v2970_v39 = vpop.f32.mrb[12].mxu0  ;;  %v923_v40 = vsel %vm907_vm0, %v896_v38, 0.0 }
 0x120   : > { %v2971_v41 = vpop.f32.mrb[13].mxu0  ;;  %924 = vadd.xlane.f32.xlu1 %v923_v40 }
 0x121   : > { %v2972_v42 = vadd.f32 %v2971_v41, %v2970_v39  ;;  %v2973_v43 = vpop.f32.mrb[14].mxu0  ;;  %v3772_v41 = vld [vmem:[%s4487_s6] sm:$0xf] }
 0x122   : > { %v2974_v44 = vpop.f32.mrb[15].mxu0 }
 0x123   : > { %v2975_v45 = vadd.f32 %v2974_v44, %v2973_v43  ;;  %v901_v46 = vadd.f32 %v2972_v42, %v2880_v11 }
 0x125   : > { %v926_v47 = vsel %vm907_vm0, %v901_v46, 0.0  ;;  %v904_v48 = vadd.f32 %v2975_v45, %v2880_v11 }
 0x126   : > { %927 = vadd.xlane.f32.xlu0 %v926_v47 }
 0x127   : > { %v929_v49 = vsel %vm907_vm0, %v904_v48, 0.0 }
 0x128   : > { %930 = vadd.xlane.f32.xlu1 %v929_v49 }
 0x19b   : > { %v910_v50 = vpop.xlane.xlu0 %909 }
 0x19c   : > { %v933_v51 = vmul.f32 0.015625, %v910_v50 }
 0x19e   : > { %v3719_v52 = vsub.f32 %v877_v16, %v933_v51 }
 0x19f   : > { %v913_v53 = vpop.xlane.xlu0 %912 }
 0x1a0   : > { %v934_v54 = vmul.f32 0.015625, %v913_v53  ;;  %v949_v55 = vmul.f32 %v3719_v52, %v3719_v52 }
 0x1a2   : > { %v3723_v56 = vsub.f32 %v880_v18, %v934_v54  ;;  %v957_v57 = vsel %vm907_vm0, %v949_v55, 0.0 }
 0x1a3   : > { %v916_v58 = vpop.xlane.xlu1 %915  ;;  %958 = vadd.xlane.f32.xlu0 %v957_v57 }
 0x1a4   : > { %v935_v59 = vmul.f32 0.015625, %v916_v58  ;;  %v950_v60 = vmul.f32 %v3723_v56, %v3723_v56 }
 0x1a6   : > { %v3728_v61 = vsub.f32 %v885_v26, %v935_v59  ;;  %v960_v62 = vsel %vm907_vm0, %v950_v60, 0.0 }
 0x1a7   : > { %v919_v63 = vpop.xlane.xlu1 %918  ;;  %961 = vadd.xlane.f32.xlu1 %v960_v62 }
 0x1a8   : > { %v936_v0 = vmul.f32 0.015625, %v919_v63  ;;  %v951_v1 = vmul.f32 %v3728_v61, %v3728_v61 }
 0x1aa   : > { %v3733_v2 = vsub.f32 %v888_v28, %v936_v0  ;;  %v963_v3 = vsel %vm907_vm0, %v951_v1, 0.0  ;;  %v1013_v28 = vlaneseq }
 0x1ab   : > { %964 = vadd.xlane.f32.xlu0 %v963_v3  ;;  %v922_v4 = vpop.xlane.xlu0 %921 }
 0x1ac   : > { %v937_v5 = vmul.f32 0.015625, %v922_v4  ;;  %v952_v6 = vmul.f32 %v3733_v2, %v3733_v2  ;;  %v3759_v32 = vshrl.u32 %v1013_v28, 7 }
 0x1ad   : > { %v925_v7 = vpop.xlane.xlu1 %924 }
 0x1ae   : > { %v3738_v8 = vsub.f32 %v893_v36, %v937_v5  ;;  %v938_v9 = vmul.f32 0.015625, %v925_v7  ;;  %v966_v10 = vsel %vm907_vm0, %v952_v6, 0.0  ;;  %v3762_v36 = vsub.s32 0, %v3759_v32 }
 0x1af   : > { %967 = vadd.xlane.f32.xlu1 %v966_v10 }
 0x1b0   : > { %v3741_v11 = vsub.f32 %v896_v38, %v938_v9  ;;  %v953_v12 = vmul.f32 %v3738_v8, %v3738_v8  ;;  %v3767_v38 = vld [vmem:[%s4514_s25] sm:$0xf]  ;;  %v1028_v47 = vrot.slane %v3772_v41, %v3762_v36 }
 0x1b1   : > { %v1016_v42 = vrot.slane %v3767_v38, %v3762_v36 }
 0x1b2   : > { %v969_v13 = vsel %vm907_vm0, %v953_v12, 0.0  ;;  %v954_v14 = vmul.f32 %v3741_v11, %v3741_v11 }
 0x1b3   : > { %970 = vadd.xlane.f32.xlu0 %v969_v13  ;;  %v928_v15 = vpop.xlane.xlu0 %927 }
 0x1b4   : > { %v939_v16 = vmul.f32 0.015625, %v928_v15  ;;  %v972_v17 = vsel %vm907_vm0, %v954_v14, 0.0 }
 0x1b5   : > { %v931_v18 = vpop.xlane.xlu1 %930  ;;  %973 = vadd.xlane.f32.xlu1 %v972_v17 }
 0x1b6   : > { %v3749_v19 = vsub.f32 %v901_v46, %v939_v16  ;;  %v940_v20 = vmul.f32 0.015625, %v931_v18 }
 0x1b8   : > { %v3751_v21 = vsub.f32 %v904_v48, %v940_v20  ;;  %v955_v22 = vmul.f32 %v3749_v19, %v3749_v19 }
 0x1ba   : > { %v975_v23 = vsel %vm907_vm0, %v955_v22, 0.0  ;;  %v956_v24 = vmul.f32 %v3751_v21, %v3751_v21 }
 0x1bb   : > { %976 = vadd.xlane.f32.xlu0 %v975_v23 }
 0x1bc   : > { %v978_v25 = vsel %vm907_vm0, %v956_v24, 0.0 }
 0x1bd   : > { %979 = vadd.xlane.f32.xlu1 %v978_v25 }
 0x230   : > { %v959_v26 = vpop.xlane.xlu0 %958 }
 0x231   : > { %v981_v27 = vmul.f32 0.015625, %v959_v26 }
 0x233   : > { %v989_v29 = vadd.f32 1e-05, %v981_v27 }
 0x234   : > { %v962_v30 = vpop.xlane.xlu1 %961 }
 0x235   : > { %3308 = vrsqrt.f32 %v989_v29  ;;  %v982_v31 = vmul.f32 0.015625, %v962_v30 }
 0x237   : > { %v990_v33 = vadd.f32 1e-05, %v982_v31 }
 0x238   : > { %v965_v34 = vpop.xlane.xlu0 %964 }
 0x239   : > { %3310 = vrsqrt.f32 %v990_v33  ;;  %v983_v35 = vmul.f32 0.015625, %v965_v34 }
 0x23b   : > { %v991_v37 = vadd.f32 1e-05, %v983_v35 }
 0x23c   : > { %v968_v39 = vpop.xlane.xlu1 %967 }
 0x23d   : > { %3312 = vrsqrt.f32 %v991_v37  ;;  %v984_v40 = vmul.f32 0.015625, %v968_v39 }
 0x23f   : > { %v3309_v43 = vpop.eup %3308  ;;  %v992_v44 = vadd.f32 1e-05, %v984_v40 }
 0x240   : > { %v971_v45 = vpop.xlane.xlu0 %970  ;;  %v1005_v46 = vmul.f32 %v3309_v43, %v3719_v52 }
 0x241   : > { %3314 = vrsqrt.f32 %v992_v44  ;;  %v985_v48 = vmul.f32 0.015625, %v971_v45 }
 0x242   : > { %v974_v49 = vpop.xlane.xlu1 %973  ;;  %v1017_v50 = vmul.f32 %v1016_v42, %v1005_v46 }
 0x243   : > { %v3311_v51 = vpop.eup %3310  ;;  %v993_v53 = vadd.f32 1e-05, %v985_v48  ;;  %v986_v54 = vmul.f32 0.015625, %v974_v49 }
 0x244   : > { %v3779_v55 = vadd.f32 %v1028_v47, %v1017_v50  ;;  %v1006_v57 = vmul.f32 %v3311_v51, %v3723_v56 }
 0x245   : > { %3316 = vrsqrt.f32 %v993_v53  ;;  %v994_v58 = vadd.f32 1e-05, %v986_v54 }
 0x246   : > { %v1037_v59 = vsel %vm907_vm0, %v3779_v55, 0.0  ;;  %v1018_v52 = vmul.f32 %v1016_v42, %v1006_v57 }
 0x247   : > { %v3313_v60 = vpop.eup %3312  ;;  %3318 = vrsqrt.f32 %v994_v58  ;;  %1038 = vadd.xlane.f32.xlu0 %v1037_v59 }
 0x248   : > { %v977_v62 = vpop.xlane.xlu0 %976  ;;  %v3784_v63 = vadd.f32 %v1028_v47, %v1018_v52  ;;  %v1007_v0 = vmul.f32 %v3313_v60, %v3728_v61 }
 0x249   : > { %v987_v1 = vmul.f32 0.015625, %v977_v62 }
 0x24a   : > { %v980_v3 = vpop.xlane.xlu1 %979  ;;  %v1040_v4 = vsel %vm907_vm0, %v3784_v63, 0.0  ;;  %v1019_v56 = vmul.f32 %v1016_v42, %v1007_v0 }
 0x24b   : > { %v3315_v5 = vpop.eup %3314  ;;  %v995_v6 = vadd.f32 1e-05, %v987_v1  ;;  %v988_v7 = vmul.f32 0.015625, %v980_v3  ;;  %1041 = vadd.xlane.f32.xlu1 %v1040_v4 }
 0x24c   : > { %v3789_v9 = vadd.f32 %v1028_v47, %v1019_v56  ;;  %v1008_v10 = vmul.f32 %v3315_v5, %v3733_v2 }
 0x24d   : > { %3320 = vrsqrt.f32 %v995_v6  ;;  %v996_v12 = vadd.f32 1e-05, %v988_v7 }
 0x24e   : > { %v1043_v13 = vsel %vm907_vm0, %v3789_v9, 0.0  ;;  %v1020_v61 = vmul.f32 %v1016_v42, %v1008_v10 }
 0x24f   : > { %v3317_v14 = vpop.eup %3316  ;;  %3322 = vrsqrt.f32 %v996_v12  ;;  %1044 = vadd.xlane.f32.xlu0 %v1043_v13 }
 0x250   : > { %v3794_v15 = vadd.f32 %v1028_v47, %v1020_v61  ;;  %v1009_v16 = vmul.f32 %v3317_v14, %v3738_v8 }
 0x251   : > { %v3319_v17 = vpop.eup %3318 }
 0x252   : > { %v1046_v18 = vsel %vm907_vm0, %v3794_v15, 0.0  ;;  %v1021_v20 = vmul.f32 %v1016_v42, %v1009_v16  ;;  %v1010_v2 = vmul.f32 %v3319_v17, %v3741_v11  ;;  %v752_v17 = vld [vmem:[%s4488_s7 + $0x8] sm:$0xff] }
 0x253   : > { %1047 = vadd.xlane.f32.xlu1 %v1046_v18  ;;  %v754_v18 = vld [vmem:[%s4488_s7 + $0x18] sm:$0xff] }
 0x254   : > { %v3800_v22 = vadd.f32 %v1028_v47, %v1021_v20  ;;  %v1022_v23 = vmul.f32 %v1016_v42, %v1010_v2 }
 0x256   : > { %v1049_v24 = vsel %vm907_vm0, %v3800_v22, 0.0  ;;  %v3804_v25 = vadd.f32 %v1028_v47, %v1022_v23  ;;  %v1170_v23 = vpack.c.bf16 %v754_v18, %v752_v17 }
 0x257   : > { %v3321_v26 = vpop.eup %3320  ;;  %1050 = vadd.xlane.f32.xlu0 %v1049_v24  ;;  %v751_v24 = vld [vmem:[%s4488_s7] sm:$0xff] }
 0x258   : > { %v1052_v8 = vsel %vm907_vm0, %v3804_v25, 0.0  ;;  %v1011_v27 = vmul.f32 %v3321_v26, %v3749_v19  ;;  %v753_v26 = vld [vmem:[%s4488_s7 + $0x10] sm:$0xff]  ;;  %1200 = vmatprep.subr.bf16.mxu1 %v1170_v23 }
 0x259   : > { %v3323_v28 = vpop.eup %3322  ;;  %1053 = vadd.xlane.f32.xlu1 %v1052_v8  ;;  %v1169_v8 = vpack.c.bf16 %v753_v26, %v751_v24 }
 0x25a   : > { %v1023_v29 = vmul.f32 %v1016_v42, %v1011_v27  ;;  %v1012_v11 = vmul.f32 %v3323_v28, %v3751_v21  ;;  %v756_v28 = vld [vmem:[%s4488_s7 + $0x28] sm:$0xff] }
 0x25b   : > { %1201 = vmatpush1.bf16.msra.mxu1 %v1169_v8 }
 0x25c   : > { %v3810_v30 = vadd.f32 %v1028_v47, %v1023_v29  ;;  %v1024_v31 = vmul.f32 %v1016_v42, %v1012_v11  ;;  %v758_v29 = vld [vmem:[%s4488_s7 + $0x38] sm:$0xff] }
 0x25d   : > { %v1172_v11 = vpack.c.bf16 %v758_v29, %v756_v28 }
 0x25e   : > { %v1055_v33 = vsel %vm907_vm0, %v3810_v30, 0.0  ;;  %v3814_v34 = vadd.f32 %v1028_v47, %v1024_v31  ;;  %v755_v31 = vld [vmem:[%s4488_s7 + $0x20] sm:$0xff] }
 0x25f   : > { %1056 = vadd.xlane.f32.xlu0 %v1055_v33  ;;  %v757_v33 = vld [vmem:[%s4488_s7 + $0x30] sm:$0xff]  ;;  %1202 = vmatprep.subr.bf16.mxu1 %v1172_v11 }
 0x260   : > { %v1058_v35 = vsel %vm907_vm0, %v3814_v34, 0.0 }
 0x261   : > { %1059 = vadd.xlane.f32.xlu1 %v1058_v35  ;;  %v1171_v35 = vpack.c.bf16 %v757_v33, %v755_v31 }
 0x263   : > { %1203 = vmatpush1.bf16.msra.mxu1 %v1171_v35 }
 0x2d4   : > { %v1039_v37 = vpop.xlane.xlu0 %1038 }
 0x2d5   : > { %v1061_v19 = vmul.f32 0.015625, %v1039_v37  ;;  %v760_v37 = vld [vmem:[%s4488_s7 + $0x48] sm:$0xff] }
 0x2d7   : > { %v3819_v39 = vsub.f32 %v3779_v55, %v1061_v19  ;;  %v762_v19 = vld [vmem:[%s4488_s7 + $0x58] sm:$0xff] }
 0x2d8   : > { %v1042_v40 = vpop.xlane.xlu1 %1041 }
 0x2d9   : > { %v1062_v21 = vmul.f32 0.015625, %v1042_v40  ;;  %v1077_v42 = vmul.f32 %v3819_v39, %v3819_v39  ;;  %v1174_v40 = vpack.c.bf16 %v762_v19, %v760_v37 }
 0x2db   : > { %v3824_v43 = vsub.f32 %v3784_v63, %v1062_v21  ;;  %v1085_v44 = vsel %vm907_vm0, %v1077_v42, 0.0  ;;  %v759_v21 = vld [vmem:[%s4488_s7 + $0x40] sm:$0xff]  ;;  %v761_v42 = vld [vmem:[%s4488_s7 + $0x50] sm:$0xff]  ;;  %1204 = vmatprep.subr.bf16.mxu1 %v1174_v40 }
 0x2dc   : > { %1086 = vadd.xlane.f32.xlu0 %v1085_v44  ;;  %v1045_v45 = vpop.xlane.xlu0 %1044  ;;  %v1173_v44 = vpack.c.bf16 %v761_v42, %v759_v21 }
 0x2dd   : > { %v1063_v46 = vmul.f32 0.015625, %v1045_v45  ;;  %v1078_v47 = vmul.f32 %v3824_v43, %v3824_v43  ;;  %v764_v45 = vld [vmem:[%s4488_s7 + $0x68] sm:$0xff] }
 0x2de   : > { %1205 = vmatpush1.bf16.msra.mxu1 %v1173_v44 }
 0x2df   : > { %v3830_v48 = vsub.f32 %v3789_v9, %v1063_v46  ;;  %v1088_v49 = vsel %vm907_vm0, %v1078_v47, 0.0  ;;  %v766_v46 = vld [vmem:[%s4488_s7 + $0x78] sm:$0xff] }
 0x2e0   : > { %1089 = vadd.xlane.f32.xlu1 %v1088_v49  ;;  %v1048_v50 = vpop.xlane.xlu1 %1047  ;;  %v1176_v47 = vpack.c.bf16 %v766_v46, %v764_v45  ;;  %v763_v49 = vld [vmem:[%s4488_s7 + $0x60] sm:$0xff] }
 0x2e1   : > { %v1064_v51 = vmul.f32 0.015625, %v1048_v50  ;;  %v1079_v53 = vmul.f32 %v3830_v48, %v3830_v48  ;;  %v765_v50 = vld [vmem:[%s4488_s7 + $0x70] sm:$0xff] }
 0x2e2   : > { %1206 = vmatprep.subr.bf16.mxu1 %v1176_v47 }
 0x2e3   : > { %v3836_v54 = vsub.f32 %v3794_v15, %v1064_v51  ;;  %v1091_v57 = vsel %vm907_vm0, %v1079_v53, 0.0  ;;  %v1175_v51 = vpack.c.bf16 %v765_v50, %v763_v49  ;;  %v3462_v53 = vmov 0  }
 0x2e4   : > { %1092 = vadd.xlane.f32.xlu0 %v1091_v57  ;;  %v1051_v58 = vpop.xlane.xlu0 %1050  ;;  %1232 = vmatprep.mubr.bf16.mxu1 %v3462_v53 }
 0x2e5   : > { %v1065_v59 = vmul.f32 0.015625, %v1051_v58  ;;  %v1080_v52 = vmul.f32 %v3836_v54, %v3836_v54  ;;  %1207 = vmatpush1.bf16.msra.mxu1 %v1175_v51  ;;  %3307 = vset.pattern.permute.xlu0 %v3462_v53 }
 0x2e6   : > { %v1054_v60 = vpop.xlane.xlu1 %1053 }
 0x2e7   : > { %v3842_v62 = vsub.f32 %v3800_v22, %v1065_v59  ;;  %v1066_v0 = vmul.f32 0.015625, %v1054_v60  ;;  %v1094_v1 = vsel %vm907_vm0, %v1080_v52, 0.0 }
 0x2e8   : > { %1095 = vadd.xlane.f32.xlu1 %v1094_v1 }
 0x2e9   : > { %v3846_v3 = vsub.f32 %v3804_v25, %v1066_v0  ;;  %v1081_v4 = vmul.f32 %v3842_v62, %v3842_v62 }
 0x2eb   : > { %v1097_v56 = vsel %vm907_vm0, %v1081_v4, 0.0  ;;  %v1082_v5 = vmul.f32 %v3846_v3, %v3846_v3 }
 0x2ec   : > { %1098 = vadd.xlane.f32.xlu0 %v1097_v56  ;;  %v1057_v6 = vpop.xlane.xlu0 %1056 }
 0x2ed   : > { %v1067_v7 = vmul.f32 0.015625, %v1057_v6  ;;  %v1100_v10 = vsel %vm907_vm0, %v1082_v5, 0.0  ;;  %v3917_v6 = vsub.s32 1, %v3759_v32 }
 0x2ee   : > { %1101 = vadd.xlane.f32.xlu1 %v1100_v10  ;;  %v1060_v12 = vpop.xlane.xlu1 %1059 }
 0x2ef   : > { %v3855_v13 = vsub.f32 %v3810_v30, %v1067_v7  ;;  %v1068_v61 = vmul.f32 0.015625, %v1060_v12  ;;  %v1144_v17 = vrot.slane %v3767_v38, %v3917_v6 }
 0x2f1   : > { %v3858_v14 = vsub.f32 %v3814_v34, %v1068_v61  ;;  %v1083_v16 = vmul.f32 %v3855_v13, %v3855_v13 }
 0x2f3   : > { %v1103_v20 = vsel %vm907_vm0, %v1083_v16, 0.0  ;;  %v1084_v2 = vmul.f32 %v3858_v14, %v3858_v14 }
 0x2f4   : > { %1104 = vadd.xlane.f32.xlu0 %v1103_v20 }
 0x2f5   : > { %v1106_v27 = vsel %vm907_vm0, %v1084_v2, 0.0 }
 0x2f6   : > { %1107 = vadd.xlane.f32.xlu1 %v1106_v27  ;;  %v1156_v27 = vrot.slane %v3772_v41, %v3917_v6 }
 0x369   : > { %v1087_v57 = vpop.xlane.xlu0 %1086 }
 0x36a   : > { %v1109_v58 = vmul.f32 0.015625, %v1087_v57 }
 0x36c   : > { %v1117_v59 = vadd.f32 1e-05, %v1109_v58 }
 0x36d   : > { %v1090_v52 = vpop.xlane.xlu1 %1089 }
 0x36e   : > { %3324 = vrsqrt.f32 %v1117_v59  ;;  %v1110_v60 = vmul.f32 0.015625, %v1090_v52 }
 0x370   : > { %v1118_v0 = vadd.f32 1e-05, %v1110_v60 }
 0x371   : > { %v1093_v1 = vpop.xlane.xlu0 %1092 }
 0x372   : > { %3326 = vrsqrt.f32 %v1118_v0  ;;  %v1111_v4 = vmul.f32 0.015625, %v1093_v1 }
 0x374   : > { %v1119_v56 = vadd.f32 1e-05, %v1111_v4 }
 0x375   : > { %v1096_v5 = vpop.xlane.xlu1 %1095 }
 0x376   : > { %3328 = vrsqrt.f32 %v1119_v56  ;;  %v1112_v7 = vmul.f32 0.015625, %v1096_v5 }
 0x378   : > { %v3325_v10 = vpop.eup %3324  ;;  %v1120_v12 = vadd.f32 1e-05, %v1112_v7 }
 0x379   : > { %v1133_v61 = vmul.f32 %v3325_v10, %v3819_v39  ;;  %v1099_v16 = vpop.xlane.xlu0 %1098 }
 0x37a   : > { %3330 = vrsqrt.f32 %v1120_v12  ;;  %v1113_v18 = vmul.f32 0.015625, %v1099_v16 }
 0x37b   : > { %v1102_v20 = vpop.xlane.xlu1 %1101  ;;  %v1145_v8 = vmul.f32 %v1144_v17, %v1133_v61 }
 0x37c   : > { %v3327_v2 = vpop.eup %3326  ;;  %v1121_v23 = vadd.f32 1e-05, %v1113_v18  ;;  %v1114_v24 = vmul.f32 0.015625, %v1102_v20 }
 0x37d   : > { %v1134_v26 = vmul.f32 %v3327_v2, %v3824_v43  ;;  %v1157_v31 = vadd.f32 %v1156_v27, %v1145_v8 }
 0x37e   : > { %3332 = vrsqrt.f32 %v1121_v23  ;;  %v1122_v28 = vadd.f32 1e-05, %v1114_v24 }
 0x37f   : > { %v1146_v29 = vmul.f32 %v1144_v17, %v1134_v26 }
 0x380   : > { %v3329_v39 = vpop.eup %3328  ;;  %3334 = vrsqrt.f32 %v1122_v28 }
 0x381   : > { %v1135_v11 = vmul.f32 %v3329_v39, %v3830_v48  ;;  %v1105_v38 = vpop.xlane.xlu0 %1104  ;;  %v1158_v33 = vadd.f32 %v1156_v27, %v1146_v29 }
 0x382   : > { %v1115_v35 = vmul.f32 0.015625, %v1105_v38 }
 0x383   : > { %v1108_v37 = vpop.xlane.xlu1 %1107  ;;  %v1165_v19 = vpack.c.bf16 %v1158_v33, %v1157_v31  ;;  %v1147_v41 = vmul.f32 %v1144_v17, %v1135_v11 }
 0x384   : > { %v3331_v40 = vpop.eup %3330  ;;  %v1123_v21 = vadd.f32 1e-05, %v1115_v35  ;;  %v1116_v43 = vmul.f32 0.015625, %v1108_v37 }
 0x385   : > { %v1136_v42 = vmul.f32 %v3331_v40, %v3836_v54  ;;  %2881 = vmatmul.mubr.msk.bf16.vlgmr.msra.gmra.mrb[0].mxu1 %vm907_vm0, %v1165_v19  ;;  %v1159_v47 = vadd.f32 %v1156_v27, %v1147_v41 }
 0x386   : > { %3336 = vrsqrt.f32 %v1123_v21  ;;  %v1124_v44 = vadd.f32 1e-05, %v1116_v43  ;;  %1242 = vmatprep.mubr.bf16.mxu1 %v3462_v53 }
 0x387   : > { %v1148_v45 = vmul.f32 %v1144_v17, %v1136_v42 }
 0x388   : > { %v3333_v48 = vpop.eup %3332  ;;  %3338 = vrsqrt.f32 %v1124_v44 }
 0x389   : > { %v1137_v46 = vmul.f32 %v3333_v48, %v3842_v62  ;;  %v1160_v49 = vadd.f32 %v1156_v27, %v1148_v45 }
 0x38a   : > { %v3335_v50 = vpop.eup %3334 }
 0x38b   : > { %v1138_v51 = vmul.f32 %v3335_v50, %v3846_v3  ;;  %v1166_v57 = vpack.c.bf16 %v1160_v49, %v1159_v47  ;;  %v1149_v54 = vmul.f32 %v1144_v17, %v1137_v46 }
 0x38d   : > { %2882 = vmatmul.mubr.msk.bf16.gmra.mrb[4].mxu1 %vm907_vm0, %v1166_v57  ;;  %v1150_v58 = vmul.f32 %v1144_v17, %v1138_v51  ;;  %v1161_v0 = vadd.f32 %v1156_v27, %v1149_v54 }
 0x38e   : > { %1252 = vmatprep.mubr.bf16.mxu1 %v3462_v53 }
 0x38f   : > { %v1162_v59 = vadd.f32 %v1156_v27, %v1150_v58 }
 0x390   : > { %v3337_v52 = vpop.eup %3336 }
 0x391   : > { %v1139_v60 = vmul.f32 %v3337_v52, %v3855_v13  ;;  %v1167_v4 = vpack.c.bf16 %v1162_v59, %v1161_v0  ;;  %v767_v13 = vld [vmem:[%s4489_s8] sm:$0x3] }
 0x392   : > { %v3339_v1 = vpop.eup %3338  ;;  %v1181_v12 = vrot.slane %v767_v13, %v3762_v36 }
 0x393   : > { %v1140_v62 = vmul.f32 %v3339_v1, %v3858_v14  ;;  %v1151_v56 = vmul.f32 %v1144_v17, %v1139_v60  ;;  %v1185_v14 = vrot.slane %v767_v13, %v3917_v6 }
 0x395   : > { %2883 = vmatmul.mubr.msk.bf16.gmra.mrb[8].mxu1 %vm907_vm0, %v1167_v4  ;;  %v1152_v3 = vmul.f32 %v1144_v17, %v1140_v62  ;;  %v1163_v7 = vadd.f32 %v1156_v27, %v1151_v56 }
 0x396   : > { %1262 = vmatprep.mubr.bf16.mxu1 %v3462_v53 }
 0x397   : > { %v1164_v5 = vadd.f32 %v1156_v27, %v1152_v3 }
 0x399   : > { %v1168_v10 = vpack.c.bf16 %v1164_v5, %v1163_v7 }
 0x39d   : > { %2884 = vmatmul.mubr.msk.bf16.gmra.mrb[12].mxu1 %vm907_vm0, %v1168_v10 }
 0x458   : > { %v1234_v61 = vpop.f32.mrb[0].mxu1 }
 0x459   : > { %v1236_v16 = vpop.f32.mrb[1].mxu1  ;;  %v1235_v20 = vadd.f32 %v1234_v61, %v1181_v12 }
 0x45a   : > { %v1238_v18 = vpop.f32.mrb[2].mxu1  ;;  %v1237_v53 = vadd.f32 %v1236_v16, %v1185_v14 }
 0x45b   : > { %v1239_v17 = vadd.f32 %v1238_v18, %v1181_v12  ;;  %v1240_v2 = vpop.f32.mrb[3].mxu1 }
 0x45c   : > { %v1241_v23 = vadd.f32 %v1240_v2, %v1185_v14 }
 0x45d   : > { %v1273_v24 = vpack.c.bf16 %v1239_v17, %v1235_v20 }
 0x45e   : > { %v1478_v26 = vpack.c.bf16 %v1241_v23, %v1237_v53 }
 0x45f   : > { %1281 = vrot.lane.b32.xlu0 %v1273_v24, %s3463_s3  ;;  %3073 = vmatprep.mubr.msk.bf16.mxu1 %vm907_vm0, %v1273_v24 }
 0x460   : > { %v1244_v8 = vpop.f32.mrb[4].mxu1  ;;  %3081 = vmatprep.subr.bf16.mxu0 %v1478_v26 }
 0x461   : > { %v1246_v27 = vpop.f32.mrb[5].mxu1  ;;  %3082 = vmatpush3.bf16.msra.mxu0 %v1478_v26  ;;  %v1245_v6 = vadd.f32 %v1244_v8, %v1181_v12 }
 0x462   : > { %v1248_v28 = vpop.f32.mrb[6].mxu1  ;;  %v1247_v11 = vadd.f32 %v1246_v27, %v1185_v14 }
 0x463   : > { %v1249_v29 = vadd.f32 %v1248_v28, %v1181_v12  ;;  %v1250_v39 = vpop.f32.mrb[7].mxu1 }
 0x464   : > { %v1251_v38 = vadd.f32 %v1250_v39, %v1185_v14 }
 0x465   : > { %v1274_v31 = vpack.c.bf16 %v1249_v29, %v1245_v6 }
 0x466   : > { %v1479_v33 = vpack.c.bf16 %v1251_v38, %v1247_v11 }
 0x467   : > { %1283 = vrot.lane.b32.xlu1 %v1274_v31, %s3463_s3 }
 0x468   : > { %v1254_v35 = vpop.f32.mrb[8].mxu1  ;;  %3083 = vmatprep.subr.bf16.mxu0 %v1479_v33 }
 0x469   : > { %v1256_v37 = vpop.f32.mrb[9].mxu1  ;;  %3084 = vmatpush3.bf16.msra.mxu0 %v1479_v33  ;;  %v1255_v40 = vadd.f32 %v1254_v35, %v1181_v12 }
 0x46a   : > { %v1258_v19 = vpop.f32.mrb[10].mxu1  ;;  %v1257_v42 = vadd.f32 %v1256_v37, %v1185_v14 }
 0x46b   : > { %v1259_v21 = vadd.f32 %v1258_v19, %v1181_v12  ;;  %v1260_v43 = vpop.f32.mrb[11].mxu1 }
 0x46c   : > { %v1261_v41 = vadd.f32 %v1260_v43, %v1185_v14 }
 0x46d   : > { %v1275_v44 = vpack.c.bf16 %v1259_v21, %v1255_v40 }
 0x46e   : > { %v1480_v45 = vpack.c.bf16 %v1261_v41, %v1257_v42 }
 0x46f   : > { %1285 = vrot.lane.b32.xlu1 %v1275_v44, %s3463_s3 }
 0x470   : > { %v1264_v48 = vpop.f32.mrb[12].mxu1  ;;  %3085 = vmatprep.subr.bf16.mxu0 %v1480_v45 }
 0x471   : > { %v1266_v46 = vpop.f32.mrb[13].mxu1  ;;  %3086 = vmatpush3.bf16.msra.mxu0 %v1480_v45  ;;  %v1265_v49 = vadd.f32 %v1264_v48, %v1181_v12 }
 0x472   : > { %v1268_v47 = vpop.f32.mrb[14].mxu1  ;;  %v1267_v57 = vadd.f32 %v1266_v46, %v1185_v14 }
 0x473   : > { %v1269_v50 = vadd.f32 %v1268_v47, %v1181_v12  ;;  %v1270_v51 = vpop.f32.mrb[15].mxu1 }
 0x474   : > { %v1271_v54 = vadd.f32 %v1270_v51, %v1185_v14 }
 0x475   : > { %v1276_v58 = vpack.c.bf16 %v1269_v50, %v1265_v49 }
 0x476   : > { %v1481_v59 = vpack.c.bf16 %v1271_v54, %v1267_v57 }
 0x477   : > { %1287 = vrot.lane.b32.xlu1 %v1276_v58, %s3463_s3 }
 0x478   : > { %3087 = vmatprep.subr.bf16.mxu0 %v1481_v59 }
 0x479   : > { %3088 = vmatpush3.bf16.msra.mxu0 %v1481_v59 }
 0x4d1   : > { %v1282_v52 = vpop.permute.xlu0 %1281 }
 0x4d2   : > { %v1302_v60 = vsel %vm907_vm0, %v1282_v52, 0  ;;  %3290 = vmatprep.subr.msk.bf16.mxu1 %vm907_vm0, %v1282_v52 }
 0x4d3   : > { %3066 = vmatpush3.bf16.xpose.msra.mxu1 %v1302_v60 }
 0x4d9   : > { %v1284_v0 = vpop.permute.xlu1 %1283 }
 0x4da   : > { %v1305_v1 = vsel %vm907_vm0, %v1284_v0, 0  ;;  %3291 = vmatprep.subr.msk.bf16.mxu1 %vm907_vm0, %v1284_v0 }
 0x4db   : > { %3068 = vmatpush3.bf16.xpose.msra.mxu1 %v1305_v1 }
 0x4e1   : > { %v1286_v62 = vpop.permute.xlu1 %1285 }
 0x4e2   : > { %v1308_v4 = vsel %vm907_vm0, %v1286_v62, 0  ;;  %3292 = vmatprep.subr.msk.bf16.mxu1 %vm907_vm0, %v1286_v62 }
 0x4e3   : > { %3070 = vmatpush3.bf16.xpose.msra.mxu1 %v1308_v4 }
 0x4e9   : > { %v1288_v56 = vpop.permute.xlu1 %1287 }
 0x4ea   : > { %v1311_v3 = vsel %vm907_vm0, %v1288_v56, 0  ;;  %3293 = vmatprep.subr.msk.bf16.mxu1 %vm907_vm0, %v1288_v56 }
 0x4eb   : > { %3072 = vmatpush3.bf16.xpose.msra.mxu1 %v1311_v3 }
 0x4f2   : > { %3074 = vmatmul.mubr.msk.bf16.vlgmr.msra.gmra.mrb[16].mxu1 %vm907_vm0, %v1274_v31 }
 0x4f3   : > { %3077 = vmatprep.mubr.msk.bf16.mxu1 %vm907_vm0, %v1275_v44 }
 0x4fa   : > { %3078 = vmatmul.mubr.msk.bf16.gmra.mrb[20].mxu1 %vm907_vm0, %v1276_v58 }
 0x5c5   : > { %v3075_v5 = vpop.f32.mrb[16].mxu1 }
 0x5c6   : > { %v1347_v7 = vpop.f32.mrb[17].mxu1  ;;  %v1380_v61 = vmul.f32 0.125, %v3075_v5 }
 0x5c7   : > { %v1378_v10 = vmul.f32 0.125, %v1347_v7  ;;  %v3076_v13 = vpop.f32.mrb[18].mxu1 }
 0x5c8   : > { %v1350_v12 = vpop.f32.mrb[19].mxu1  ;;  %v1381_v20 = vmul.f32 0.125, %v3076_v13  ;;  %v1392_v2 = vsel %vm907_vm0, %v1380_v61, -inf }
 0x5c9   : > { %v1379_v14 = vmul.f32 0.125, %v1350_v12  ;;  %v1386_v16 = vsel %vm907_vm0, %v1378_v10, -inf }
 0x5ca   : > { %1387 = vmax.xlane.f32.xlu0 %v1386_v16  ;;  %v1395_v27 = vsel %vm907_vm0, %v1381_v20, -inf }
 0x5cb   : > { %v1389_v18 = vsel %vm907_vm0, %v1379_v14, -inf }
 0x5cc   : > { %1390 = vmax.xlane.f32.xlu1 %v1389_v18 }
 0x5cd   : > { %v3079_v17 = vpop.f32.mrb[20].mxu1 }
 0x5ce   : > { %1393 = vmax.xlane.f32.xlu0 %v1392_v2  ;;  %v1363_v53 = vpop.f32.mrb[21].mxu1  ;;  %v1384_v29 = vmul.f32 0.125, %v3079_v17  ;;  %v768_v17 = vld [vmem:[%s4490_s9] sm:$0xff]  ;;  %v769_v2 = vld [vmem:[%s4490_s9 + $0x8] sm:$0xff] }
 0x5cf   : > { %v3080_v23 = vpop.f32.mrb[22].mxu1  ;;  %v1382_v26 = vmul.f32 0.125, %v1363_v53  ;;  %v770_v53 = vld [vmem:[%s4490_s9 + $0x10] sm:$0xff] }
 0x5d0   : > { %v1366_v24 = vpop.f32.mrb[23].mxu1  ;;  %v1385_v28 = vmul.f32 0.125, %v3080_v23  ;;  %v1404_v38 = vsel %vm907_vm0, %v1384_v29, -inf  ;;  %v1563_v23 = vpack.c.bf16 %v769_v2, %v768_v17 }
 0x5d1   : > { %v1383_v8 = vmul.f32 0.125, %v1366_v24  ;;  %v1398_v39 = vsel %vm907_vm0, %v1382_v26, -inf  ;;  %v771_v24 = vld [vmem:[%s4490_s9 + $0x18] sm:$0xff] }
 0x5d2   : > { %1396 = vmax.xlane.f32.xlu0 %v1395_v27  ;;  %v1407_v11 = vsel %vm907_vm0, %v1385_v28, -inf  ;;  %v773_v27 = vld [vmem:[%s4490_s9 + $0x28] sm:$0xff]  ;;  %3097 = vmatprep.subr.bf16.mxu1 %v1563_v23 }
 0x5d3   : > { %v1401_v6 = vsel %vm907_vm0, %v1383_v8, -inf  ;;  %3098 = vmatpush3.bf16.msra.mxu1 %v1563_v23 }
 0x5d4   : > { %1402 = vmax.xlane.f32.xlu1 %v1401_v6 }
 0x5d6   : > { %1399 = vmax.xlane.f32.xlu0 %v1398_v39 }
 0x5d8   : > { %1408 = vmax.xlane.f32.xlu1 %v1407_v11 }
 0x5da   : > { %1405 = vmax.xlane.f32.xlu0 %v1404_v38 }
 0x657   : > { %v1388_v31 = vpop.xlane.xlu0 %1387 }
 0x658   : > { %v1410_v33 = vsub.f32 %v1378_v10, %v1388_v31 }
 0x659   : > { %v1391_v35 = vpop.xlane.xlu1 %1390 }
 0x65a   : > { %v1418_v37 = vmul.f32 1.442695, %v1410_v33  ;;  %v1411_v19 = vsub.f32 %v1379_v14, %v1391_v35 }
 0x65b   : > { %v1394_v40 = vpop.xlane.xlu0 %1393 }
 0x65c   : > { %3340 = vpow2.f32 %v1418_v37  ;;  %v1420_v21 = vmul.f32 1.442695, %v1411_v19  ;;  %v1412_v43 = vsub.f32 %v1380_v61, %v1394_v40 }
 0x65e   : > { %3342 = vpow2.f32 %v1420_v21  ;;  %v1422_v42 = vmul.f32 1.442695, %v1412_v43 }
 0x65f   : > { %v1397_v41 = vpop.xlane.xlu0 %1396 }
 0x660   : > { %3344 = vpow2.f32 %v1422_v42  ;;  %v1413_v44 = vsub.f32 %v1381_v20, %v1397_v41 }
 0x661   : > { %v1403_v45 = vpop.xlane.xlu1 %1402 }
 0x662   : > { %v1424_v48 = vmul.f32 1.442695, %v1413_v44  ;;  %v1415_v46 = vsub.f32 %v1383_v8, %v1403_v45  ;;  %v772_v8 = vld [vmem:[%s4490_s9 + $0x20] sm:$0xff] }
 0x663   : > { %v1400_v47 = vpop.xlane.xlu0 %1399 }
 0x664   : > { %3346 = vpow2.f32 %v1424_v48  ;;  %v1428_v49 = vmul.f32 1.442695, %v1415_v46  ;;  %v1414_v50 = vsub.f32 %v1382_v26, %v1400_v47  ;;  %v1564_v26 = vpack.c.bf16 %v771_v24, %v770_v53 }
 0x665   : > { %v1409_v51 = vpop.xlane.xlu1 %1408 }
 0x666   : > { %v3967_v57 = vpop.eup %3340  ;;  %3348 = vpow2.f32 %v1428_v49  ;;  %v1426_v54 = vmul.f32 1.442695, %v1414_v50  ;;  %v1417_v58 = vsub.f32 %v1385_v28, %v1409_v51  ;;  %3099 = vmatprep.subr.bf16.mxu1 %v1564_v26  ;;  %v1565_v28 = vpack.c.bf16 %v773_v27, %v772_v8 }
 0x667   : > { %v1406_v59 = vpop.xlane.xlu0 %1405  ;;  %v1434_v52 = vsel %vm907_vm0, %v3967_v57, 0.0  ;;  %3100 = vmatpush3.bf16.msra.mxu1 %v1564_v26 }
 0x668   : > { %v3343_v60 = vpop.eup %3342  ;;  %3350 = vpow2.f32 %v1426_v54  ;;  %v1432_v0 = vmul.f32 1.442695, %v1417_v58  ;;  %v1416_v1 = vsub.f32 %v1384_v29, %v1406_v59  ;;  %1435 = vadd.xlane.f32.xlu0 %v1434_v52  ;;  %3101 = vmatprep.subr.bf16.mxu1 %v1565_v28 }
 0x669   : > { %v1437_v62 = vsel %vm907_vm0, %v3343_v60, 0.0 }
 0x66a   : > { %v3345_v4 = vpop.eup %3344  ;;  %3352 = vpow2.f32 %v1432_v0  ;;  %v1430_v56 = vmul.f32 1.442695, %v1416_v1  ;;  %1438 = vadd.xlane.f32.xlu1 %v1437_v62  ;;  %v775_v0 = vld [vmem:[%s4490_s9 + $0x38] sm:$0xff] }
 0x66b   : > { %v1440_v3 = vsel %vm907_vm0, %v3345_v4, 0.0  ;;  %3102 = vmatpush3.bf16.msra.mxu1 %v1565_v28 }
 0x66c   : > { %3354 = vpow2.f32 %v1430_v56  ;;  %1441 = vadd.xlane.f32.xlu0 %v1440_v3 }
 0x66e   : > { %v3347_v5 = vpop.eup %3346 }
 0x66f   : > { %v1443_v7 = vsel %vm907_vm0, %v3347_v5, 0.0 }
 0x670   : > { %v3349_v10 = vpop.eup %3348  ;;  %1444 = vadd.xlane.f32.xlu1 %v1443_v7 }
 0x671   : > { %v1449_v61 = vsel %vm907_vm0, %v3349_v10, 0.0 }
 0x672   : > { %v3351_v13 = vpop.eup %3350 }
 0x673   : > { %v1446_v12 = vsel %vm907_vm0, %v3351_v13, 0.0 }
 0x674   : > { %v3353_v14 = vpop.eup %3352  ;;  %1447 = vadd.xlane.f32.xlu0 %v1446_v12  ;;  %1450 = vadd.xlane.f32.xlu1 %v1449_v61 }
 0x675   : > { %v1455_v20 = vsel %vm907_vm0, %v3353_v14, 0.0 }
 0x676   : > { %v3355_v16 = vpop.eup %3354 }
 0x677   : > { %v1452_v18 = vsel %vm907_vm0, %v3355_v16, 0.0 }
 0x678   : > { %1453 = vadd.xlane.f32.xlu0 %v1452_v18  ;;  %1456 = vadd.xlane.f32.xlu1 %v1455_v20  ;;  %v2897_v20 = vld [vmem:[%s4491_s10] ss:$0 sm:$0xff] }
 0x6f5   : > { %v1436_v6 = vpop.xlane.xlu0 %1435 }
 0x6f6   : > { %3356 = vrcp.f32 %v1436_v6 }
 0x6f7   : > { %v1439_v29 = vpop.xlane.xlu1 %1438 }
 0x6f8   : > { %3358 = vrcp.f32 %v1439_v29 }
 0x6f9   : > { %v1442_v39 = vpop.xlane.xlu0 %1441 }
 0x6fa   : > { %3360 = vrcp.f32 %v1442_v39 }
 0x6fd   : > { %v1445_v11 = vpop.xlane.xlu1 %1444 }
 0x6fe   : > { %3362 = vrcp.f32 %v1445_v11 }
 0x700   : > { %v3357_v38 = vpop.eup %3356 }
 0x701   : > { %v1448_v31 = vpop.xlane.xlu0 %1447  ;;  %v1451_v33 = vpop.xlane.xlu1 %1450  ;;  %v1459_v37 = vmul.f32 %v3357_v38, %v3967_v57 }
 0x702   : > { %v3359_v35 = vpop.eup %3358  ;;  %3364 = vrcp.f32 %v1448_v31 }
 0x703   : > { %3366 = vrcp.f32 %v1451_v33  ;;  %v1461_v19 = vmul.f32 %v3359_v35, %v3343_v60  ;;  %v774_v60 = vld [vmem:[%s4490_s9 + $0x30] sm:$0xff] }
 0x704   : > { %v3361_v42 = vpop.eup %3360  ;;  %v1566_v1 = vpack.c.bf16 %v775_v0, %v774_v60 }
 0x705   : > { %v1454_v40 = vpop.xlane.xlu0 %1453  ;;  %v1457_v21 = vpop.xlane.xlu1 %1456  ;;  %v1474_v43 = vpack.c.bf16 %v1461_v19, %v1459_v37  ;;  %v1463_v44 = vmul.f32 %v3361_v42, %v3345_v4 }
 0x706   : > { %3368 = vrcp.f32 %v1454_v40  ;;  %3103 = vmatprep.subr.bf16.mxu1 %v1566_v1 }
 0x707   : > { %3370 = vrcp.f32 %v1457_v21  ;;  %3089 = vmatprep.mubr.msk.bf16.mxu0 %vm907_vm0, %v1474_v43  ;;  %3104 = vmatpush3.bf16.msra.mxu1 %v1566_v1 }
 0x708   : > { %v3363_v41 = vpop.eup %3362 }
 0x709   : > { %v1465_v45 = vmul.f32 %v3363_v41, %v3347_v5 }
 0x70b   : > { %v1475_v48 = vpack.c.bf16 %v1465_v45, %v1463_v44 }
 0x70c   : > { %v3365_v46 = vpop.eup %3364 }
 0x70d   : > { %v3367_v47 = vpop.eup %3366  ;;  %3090 = vmatmul.mubr.msk.bf16.vlgmr.msra.gmra.mrb[16].mxu0 %vm907_vm0, %v1475_v48  ;;  %v1467_v49 = vmul.f32 %v3365_v46, %v3351_v13 }
 0x70e   : > { %v1469_v50 = vmul.f32 %v3367_v47, %v3349_v10 }
 0x710   : > { %v3369_v51 = vpop.eup %3368  ;;  %v1476_v57 = vpack.c.bf16 %v1469_v50, %v1467_v49 }
 0x711   : > { %v3371_v54 = vpop.eup %3370  ;;  %v1471_v58 = vmul.f32 %v3369_v51, %v3355_v16 }
 0x712   : > { %3093 = vmatprep.mubr.msk.bf16.mxu0 %vm907_vm0, %v1476_v57  ;;  %v1473_v59 = vmul.f32 %v3371_v54, %v3353_v14 }
 0x714   : > { %v1477_v52 = vpack.c.bf16 %v1473_v59, %v1471_v58 }
 0x716   : > { %3094 = vmatmul.mubr.msk.bf16.gmra.mrb[20].mxu0 %vm907_vm0, %v1477_v52 }
 0x7e0   : > { %v3091_v62 = vpop.f32.mrb[16].mxu0 }
 0x7e1   : > { %v1528_v4 = vpop.f32.mrb[17].mxu0 }
 0x7e2   : > { %v3092_v56 = vpop.f32.mrb[18].mxu0 }
 0x7e3   : > { %v1560_v3 = vpack.c.bf16 %v3092_v56, %v3091_v62  ;;  %v1531_v5 = vpop.f32.mrb[19].mxu0 }
 0x7e4   : > { %v1559_v7 = vpack.c.bf16 %v1531_v5, %v1528_v4 }
 0x7e6   : > { %3105 = vmatprep.mubr.msk.bf16.mxu1 %vm907_vm0, %v1559_v7 }
 0x7e7   : > { %3106 = vmatmul.mubr.msk.bf16.vlgmr.msra.gmra.mrb[24].mxu1 %vm907_vm0, %v1560_v3 }
 0x7e9   : > { %v3095_v10 = vpop.f32.mrb[20].mxu0 }
 0x7ea   : > { %v1544_v13 = vpop.f32.mrb[21].mxu0 }
 0x7eb   : > { %v3096_v12 = vpop.f32.mrb[22].mxu0 }
 0x7ec   : > { %v1562_v61 = vpack.c.bf16 %v3096_v12, %v3095_v10  ;;  %v1547_v14 = vpop.f32.mrb[23].mxu0 }
 0x7ed   : > { %v1561_v16 = vpack.c.bf16 %v1547_v14, %v1544_v13 }
 0x7ef   : > { %3109 = vmatprep.mubr.msk.bf16.mxu1 %vm907_vm0, %v1561_v16 }
 0x7f0   : > { %3110 = vmatmul.mubr.msk.bf16.gmra.mrb[28].mxu1 %vm907_vm0, %v1562_v61 }
 0x8ba   : > { %v3107_v18 = vpop.f32.mrb[24].mxu1 }
 0x8bb   : > { %v1613_v17 = vpop.f32.mrb[25].mxu1  ;;  %v1646_v2 = vadd.f32 %v3107_v18, %v3789_v9 }
 0x8bc   : > { %v1644_v53 = vadd.f32 %v1613_v17, %v3779_v55  ;;  %v3108_v23 = vpop.f32.mrb[26].mxu1 }
 0x8bd   : > { %v1616_v24 = vpop.f32.mrb[27].mxu1  ;;  %v1647_v8 = vadd.f32 %v3108_v23, %v3794_v15  ;;  %v4020_v28 = vadd.f32 %v2897_v20, %v1646_v2 }
 0x8be   : > { %v4016_v26 = vadd.f32 %v2897_v20, %v1644_v53  ;;  %v1645_v27 = vadd.f32 %v1616_v24, %v3784_v63 }
 0x8bf   : > { %v4026_v39 = vadd.f32 %v2897_v20, %v1647_v8  ;;  %v1672_v15 = vsel %vm907_vm0, %v4020_v28, 0.0 }
 0x8c0   : > { %v4022_v6 = vadd.f32 %v2897_v20, %v1645_v27  ;;  %v1666_v29 = vsel %vm907_vm0, %v4016_v26, 0.0 }
 0x8c1   : > { %1667 = vadd.xlane.f32.xlu0 %v1666_v29  ;;  %v1675_v35 = vsel %vm907_vm0, %v4026_v39, 0.0 }
 0x8c2   : > { %v1669_v55 = vsel %vm907_vm0, %v4022_v6, 0.0 }
 0x8c3   : > { %v3111_v9 = vpop.f32.mrb[28].mxu1  ;;  %1670 = vadd.xlane.f32.xlu1 %v1669_v55 }
 0x8c4   : > { %v1629_v11 = vpop.f32.mrb[29].mxu1  ;;  %v1650_v63 = vadd.f32 %v3111_v9, %v3810_v30  ;;  %v777_v9 = vld [vmem:[%s4492_s11] sm:$0xff] }
 0x8c5   : > { %v1648_v38 = vadd.f32 %v1629_v11, %v3800_v22  ;;  %v3112_v31 = vpop.f32.mrb[30].mxu1  ;;  %1673 = vadd.xlane.f32.xlu0 %v1672_v15  ;;  %v778_v11 = vld [vmem:[%s4492_s11 + $0x8] sm:$0xff] }
 0x8c6   : > { %v1632_v33 = vpop.f32.mrb[31].mxu1  ;;  %v1651_v19 = vadd.f32 %v3112_v31, %v3814_v34  ;;  %v4040_v21 = vadd.f32 %v2897_v20, %v1650_v63  ;;  %v1798_v15 = vpack.c.bf16 %v778_v11, %v777_v9  ;;  %v779_v63 = vld [vmem:[%s4492_s11 + $0x10] sm:$0xff] }
 0x8c7   : > { %v4036_v37 = vadd.f32 %v2897_v20, %v1648_v38  ;;  %v1649_v40 = vadd.f32 %v1632_v33, %v3804_v25  ;;  %1676 = vadd.xlane.f32.xlu1 %v1675_v35  ;;  %v780_v38 = vld [vmem:[%s4492_s11 + $0x18] sm:$0xff]  ;;  %v781_v33 = vld [vmem:[%s4492_s11 + $0x20] sm:$0xff]  ;;  %v782_v35 = vld [vmem:[%s4492_s11 + $0x28] sm:$0xff] }
 0x8c8   : > { %v4046_v30 = vadd.f32 %v2897_v20, %v1651_v19  ;;  %v1684_v34 = vsel %vm907_vm0, %v4040_v21, 0.0  ;;  %3113 = vmatprep.subr.bf16.mxu0 %v1798_v15  ;;  %v1799_v31 = vpack.c.bf16 %v780_v38, %v779_v63  ;;  %v1800_v19 = vpack.c.bf16 %v782_v35, %v781_v33 }
 0x8c9   : > { %v4042_v43 = vadd.f32 %v2897_v20, %v1649_v40  ;;  %v1678_v22 = vsel %vm907_vm0, %v4036_v37, 0.0  ;;  %3114 = vmatpush3.bf16.msra.mxu0 %v1798_v15  ;;  %v783_v40 = vld [vmem:[%s4492_s11 + $0x30] sm:$0xff] }
 0x8ca   : > { %1679 = vadd.xlane.f32.xlu0 %v1678_v22  ;;  %v1687_v25 = vsel %vm907_vm0, %v4046_v30, 0.0  ;;  %3115 = vmatprep.subr.bf16.mxu0 %v1799_v31  ;;  %v784_v22 = vld [vmem:[%s4492_s11 + $0x38] sm:$0xff] }
 0x8cb   : > { %v1681_v42 = vsel %vm907_vm0, %v4042_v43, 0.0 }
 0x8cc   : > { %1682 = vadd.xlane.f32.xlu1 %v1681_v42  ;;  %v1801_v42 = vpack.c.bf16 %v784_v22, %v783_v40 }
 0x8cd   : > { %3116 = vmatpush3.bf16.msra.mxu0 %v1799_v31 }
 0x8ce   : > { %1685 = vadd.xlane.f32.xlu0 %v1684_v34  ;;  %3117 = vmatprep.subr.bf16.mxu0 %v1800_v19 }
 0x8d0   : > { %1688 = vadd.xlane.f32.xlu1 %v1687_v25 }
 0x8d1   : > { %3118 = vmatpush3.bf16.msra.mxu0 %v1800_v19 }
 0x8d2   : > { %3119 = vmatprep.subr.bf16.mxu0 %v1801_v42 }
 0x8d5   : > { %3120 = vmatpush3.bf16.msra.mxu0 %v1801_v42 }
 0x94e   : > { %v1668_v41 = vpop.xlane.xlu0 %1667 }
 0x94f   : > { %v1690_v44 = vmul.f32 0.015625, %v1668_v41 }
 0x950   : > { %v1671_v45 = vpop.xlane.xlu1 %1670 }
 0x951   : > { %v4055_v48 = vsub.f32 %v4016_v26, %v1690_v44  ;;  %v1691_v46 = vmul.f32 0.015625, %v1671_v45 }
 0x952   : > { %v1674_v47 = vpop.xlane.xlu0 %1673 }
 0x953   : > { %v4058_v49 = vsub.f32 %v4022_v6, %v1691_v46  ;;  %v1692_v50 = vmul.f32 0.015625, %v1674_v47  ;;  %v1706_v51 = vmul.f32 %v4055_v48, %v4055_v48 }
 0x954   : > { %v1677_v57 = vpop.xlane.xlu1 %1676 }
 0x955   : > { %v4063_v54 = vsub.f32 %v4020_v28, %v1692_v50  ;;  %v1693_v58 = vmul.f32 0.015625, %v1677_v57  ;;  %v1714_v59 = vsel %vm907_vm0, %v1706_v51, 0.0  ;;  %v1707_v52 = vmul.f32 %v4058_v49, %v4058_v49 }
 0x956   : > { %1715 = vadd.xlane.f32.xlu0 %v1714_v59 }
 0x957   : > { %v4069_v60 = vsub.f32 %v4026_v39, %v1693_v58  ;;  %v1680_v0 = vpop.xlane.xlu0 %1679  ;;  %v1717_v1 = vsel %vm907_vm0, %v1707_v52, 0.0  ;;  %v1708_v62 = vmul.f32 %v4063_v54, %v4063_v54 }
 0x958   : > { %v1694_v4 = vmul.f32 0.015625, %v1680_v0  ;;  %1718 = vadd.xlane.f32.xlu1 %v1717_v1  ;;  %v1772_v0 = vsub.s32 2, %v3759_v32 }
 0x959   : > { %v1683_v56 = vpop.xlane.xlu1 %1682  ;;  %v1720_v3 = vsel %vm907_vm0, %v1708_v62, 0.0  ;;  %v1709_v5 = vmul.f32 %v4069_v60, %v4069_v60 }
 0x95a   : > { %v4078_v7 = vsub.f32 %v4036_v37, %v1694_v4  ;;  %v1695_v10 = vmul.f32 0.015625, %v1683_v56  ;;  %1721 = vadd.xlane.f32.xlu0 %v1720_v3 }
 0x95b   : > { %v1686_v13 = vpop.xlane.xlu0 %1685  ;;  %v1723_v12 = vsel %vm907_vm0, %v1709_v5, 0.0  ;;  %v4130_v5 = vld [vmem:[%s4514_s25] sm:$0xf] }
 0x95c   : > { %v4082_v61 = vsub.f32 %v4042_v43, %v1695_v10  ;;  %v1696_v14 = vmul.f32 0.015625, %v1686_v13  ;;  %1724 = vadd.xlane.f32.xlu1 %v1723_v12  ;;  %v1710_v16 = vmul.f32 %v4078_v7, %v4078_v7  ;;  %v1773_v10 = vrot.slane %v4130_v5, %v1772_v0 }
 0x95d   : > { %v1689_v18 = vpop.xlane.xlu1 %1688 }
 0x95e   : > { %v4087_v20 = vsub.f32 %v4040_v21, %v1696_v14  ;;  %v1697_v17 = vmul.f32 0.015625, %v1689_v18  ;;  %v1726_v2 = vsel %vm907_vm0, %v1710_v16, 0.0  ;;  %v1711_v53 = vmul.f32 %v4082_v61, %v4082_v61 }
 0x95f   : > { %1727 = vadd.xlane.f32.xlu0 %v1726_v2 }
 0x960   : > { %v4093_v23 = vsub.f32 %v4046_v30, %v1697_v17  ;;  %v1729_v24 = vsel %vm907_vm0, %v1711_v53, 0.0  ;;  %v1712_v8 = vmul.f32 %v4087_v20, %v4087_v20 }
 0x961   : > { %1730 = vadd.xlane.f32.xlu1 %v1729_v24  ;;  %v4137_v24 = vld [vmem:[%s4487_s6] sm:$0xf] }
 0x962   : > { %v1732_v27 = vsel %vm907_vm0, %v1712_v8, 0.0  ;;  %v1713_v29 = vmul.f32 %v4093_v23, %v4093_v23  ;;  %v1785_v8 = vrot.slane %v4137_v24, %v1772_v0 }
 0x963   : > { %1733 = vadd.xlane.f32.xlu0 %v1732_v27 }
 0x964   : > { %v1735_v55 = vsel %vm907_vm0, %v1713_v29, 0.0 }
 0x965   : > { %1736 = vadd.xlane.f32.xlu1 %v1735_v55 }
 0x9e3   : > { %v1716_v34 = vpop.xlane.xlu0 %1715 }
 0x9e4   : > { %v1738_v25 = vmul.f32 0.015625, %v1716_v34 }
 0x9e5   : > { %v1719_v41 = vpop.xlane.xlu1 %1718 }
 0x9e6   : > { %v1746_v44 = vadd.f32 1e-05, %v1738_v25  ;;  %v1739_v45 = vmul.f32 0.015625, %v1719_v41 }
 0x9e7   : > { %v1722_v46 = vpop.xlane.xlu0 %1721 }
 0x9e8   : > { %3372 = vrsqrt.f32 %v1746_v44  ;;  %v1747_v47 = vadd.f32 1e-05, %v1739_v45  ;;  %v1740_v50 = vmul.f32 0.015625, %v1722_v46 }
 0x9e9   : > { %v1725_v51 = vpop.xlane.xlu1 %1724 }
 0x9ea   : > { %3374 = vrsqrt.f32 %v1747_v47  ;;  %v1748_v57 = vadd.f32 1e-05, %v1740_v50  ;;  %v1741_v58 = vmul.f32 0.015625, %v1725_v51 }
 0x9ec   : > { %3376 = vrsqrt.f32 %v1748_v57  ;;  %v1749_v59 = vadd.f32 1e-05, %v1741_v58  ;;  %v1728_v52 = vpop.xlane.xlu0 %1727 }
 0x9ed   : > { %v1742_v1 = vmul.f32 0.015625, %v1728_v52 }
 0x9ee   : > { %3378 = vrsqrt.f32 %v1749_v59  ;;  %v1731_v62 = vpop.xlane.xlu1 %1730 }
 0x9ef   : > { %v1750_v4 = vadd.f32 1e-05, %v1742_v1  ;;  %v1743_v56 = vmul.f32 0.015625, %v1731_v62  ;;  %v788_v1 = vld [vmem:[%s4494_s13 + $0x10] sm:$0xff]  ;;  %v789_v62 = vld [vmem:[%s4494_s13 + $0x18] sm:$0xff] }
 0x9f0   : > { %v1734_v3 = vpop.xlane.xlu0 %1733 }
 0x9f1   : > { %3380 = vrsqrt.f32 %v1750_v4  ;;  %v1751_v13 = vadd.f32 1e-05, %v1743_v56  ;;  %v1744_v12 = vmul.f32 0.015625, %v1734_v3  ;;  %v1962_v4 = vpack.c.bf16 %v789_v62, %v788_v1  ;;  %v790_v56 = vld [vmem:[%s4494_s13 + $0x20] sm:$0xff]  ;;  %v791_v3 = vld [vmem:[%s4494_s13 + $0x28] sm:$0xff] }
 0x9f2   : > { %v3373_v14 = vpop.eup %3372  ;;  %v1737_v16 = vpop.xlane.xlu1 %1736 }
 0x9f3   : > { %v1762_v18 = vmul.f32 %v3373_v14, %v4055_v48  ;;  %3382 = vrsqrt.f32 %v1751_v13  ;;  %v1752_v17 = vadd.f32 1e-05, %v1744_v12  ;;  %v1745_v2 = vmul.f32 0.015625, %v1737_v16  ;;  %v792_v13 = vld [vmem:[%s4494_s13 + $0x30] sm:$0xff]  ;;  %v793_v12 = vld [vmem:[%s4494_s13 + $0x38] sm:$0xff]  ;;  %v794_v16 = vld [vmem:[%s4494_s13 + $0x40] sm:$0xff] }
 0x9f4   : > { %v3375_v53 = vpop.eup %3374  ;;  %v1964_v14 = vpack.c.bf16 %v793_v12, %v792_v13 }
 0x9f5   : > { %v1763_v27 = vmul.f32 %v3375_v53, %v4058_v49  ;;  %3384 = vrsqrt.f32 %v1752_v17  ;;  %v1753_v29 = vadd.f32 1e-05, %v1745_v2  ;;  %v1774_v55 = vmul.f32 %v1773_v10, %v1762_v18  ;;  %v795_v18 = vld [vmem:[%s4494_s13 + $0x48] sm:$0xff]  ;;  %v796_v2 = vld [vmem:[%s4494_s13 + $0x50] sm:$0xff]  ;;  %v797_v53 = vld [vmem:[%s4494_s13 + $0x58] sm:$0xff] }
 0x9f6   : > { %v3377_v9 = vpop.eup %3376  ;;  %v1965_v17 = vpack.c.bf16 %v795_v18, %v794_v16 }
 0x9f7   : > { %v1764_v11 = vmul.f32 %v3377_v9, %v4063_v54  ;;  %3386 = vrsqrt.f32 %v1753_v29  ;;  %v1775_v48 = vmul.f32 %v1773_v10, %v1763_v27  ;;  %v1786_v31 = vadd.f32 %v1785_v8, %v1774_v55  ;;  %v798_v27 = vld [vmem:[%s4494_s13 + $0x60] sm:$0xff]  ;;  %v799_v29 = vld [vmem:[%s4494_s13 + $0x68] sm:$0xff]  ;;  %v800_v9 = vld [vmem:[%s4494_s13 + $0x70] sm:$0xff] }
 0x9f8   : > { %v3379_v15 = vpop.eup %3378  ;;  %v1967_v55 = vpack.c.bf16 %v799_v29, %v798_v27 }
 0x9f9   : > { %v1776_v63 = vmul.f32 %v1773_v10, %v1764_v11  ;;  %v1765_v38 = vmul.f32 %v3379_v15, %v4069_v60  ;;  %v1787_v33 = vadd.f32 %v1785_v8, %v1775_v48  ;;  %v801_v11 = vld [vmem:[%s4494_s13 + $0x78] sm:$0xff]  ;;  %v2898_v15 = vld [vmem:[%s4493_s12] ss:$0 sm:$0xff] }
 0x9fa   : > { %v1968_v48 = vpack.c.bf16 %v801_v11, %v800_v9 }
 0x9fb   : > { %v3381_v35 = vpop.eup %3380  ;;  %v1777_v19 = vmul.f32 %v1773_v10, %v1765_v38  ;;  %v1794_v40 = vpack.c.bf16 %v1787_v33, %v1786_v31  ;;  %v1788_v42 = vadd.f32 %v1785_v8, %v1776_v63 }
 0x9fc   : > { %v1766_v22 = vmul.f32 %v3381_v35, %v4078_v7 }
 0x9fd   : > { %v3383_v49 = vpop.eup %3382  ;;  %v1789_v34 = vadd.f32 %v1785_v8, %v1777_v19  ;;  %3121 = vmatprep.mubr.msk.bf16.mxu0 %vm907_vm0, %v1794_v40 }
 0x9fe   : > { %v1767_v54 = vmul.f32 %v3383_v49, %v4082_v61  ;;  %v1778_v25 = vmul.f32 %v1773_v10, %v1766_v22 }
 0x9ff   : > { %v3385_v41 = vpop.eup %3384  ;;  %v1795_v44 = vpack.c.bf16 %v1789_v34, %v1788_v42 }
 0xa00   : > { %v1768_v45 = vmul.f32 %v3385_v41, %v4087_v20  ;;  %v1779_v60 = vmul.f32 %v1773_v10, %v1767_v54  ;;  %v1790_v50 = vadd.f32 %v1785_v8, %v1778_v25  ;;  %v786_v20 = vld [vmem:[%s4494_s13] sm:$0xff] }
 0xa01   : > { %v3387_v46 = vpop.eup %3386  ;;  %3122 = vmatmul.mubr.msk.bf16.vlgmr.msra.gmra.mrb[24].mxu0 %vm907_vm0, %v1795_v44 }
 0xa02   : > { %v1769_v47 = vmul.f32 %v3387_v46, %v4093_v23  ;;  %v1791_v7 = vadd.f32 %v1785_v8, %v1779_v60  ;;  %v1780_v51 = vmul.f32 %v1773_v10, %v1768_v45  ;;  %v787_v23 = vld [vmem:[%s4494_s13 + $0x8] sm:$0xff] }
 0xa03   : > { %v1961_v0 = vpack.c.bf16 %v787_v23, %v786_v20 }
 0xa04   : > { %v1796_v57 = vpack.c.bf16 %v1791_v7, %v1790_v50  ;;  %v1781_v58 = vmul.f32 %v1773_v10, %v1769_v47  ;;  %v1792_v59 = vadd.f32 %v1785_v8, %v1780_v51  ;;  %v1963_v10 = vpack.c.bf16 %v791_v3, %v790_v56 }
 0xa05   : > { %3129 = vmatprep.subr.bf16.mxu1 %v1961_v0 }
 0xa06   : > { %3125 = vmatprep.mubr.msk.bf16.mxu0 %vm907_vm0, %v1796_v57  ;;  %v1793_v61 = vadd.f32 %v1785_v8, %v1781_v58  ;;  %3130 = vmatpush3.bf16.msra.mxu1 %v1961_v0  ;;  %v1966_v8 = vpack.c.bf16 %v797_v53, %v796_v2 }
 0xa07   : > { %3131 = vmatprep.subr.bf16.mxu1 %v1962_v4 }
 0xa08   : > { %v1797_v52 = vpack.c.bf16 %v1793_v61, %v1792_v59 }
 0xa0a   : > { %3126 = vmatmul.mubr.msk.bf16.gmra.mrb[28].mxu0 %vm907_vm0, %v1797_v52  ;;  %3132 = vmatpush3.bf16.msra.mxu1 %v1962_v4 }
 0xa0b   : > { %3133 = vmatprep.subr.bf16.mxu1 %v1963_v10 }
 0xa0e   : > { %3134 = vmatpush3.bf16.msra.mxu1 %v1963_v10 }
 0xa0f   : > { %3135 = vmatprep.subr.bf16.mxu1 %v1964_v14 }
 0xa12   : > { %3136 = vmatpush3.bf16.msra.mxu1 %v1964_v14 }
 0xa13   : > { %3137 = vmatprep.subr.bf16.mxu1 %v1965_v17 }
 0xa16   : > { %3138 = vmatpush3.bf16.msra.mxu1 %v1965_v17 }
 0xa17   : > { %3139 = vmatprep.subr.bf16.mxu1 %v1966_v8 }
 0xa1a   : > { %3140 = vmatpush3.bf16.msra.mxu1 %v1966_v8 }
 0xa1b   : > { %3141 = vmatprep.subr.bf16.mxu1 %v1967_v55 }
 0xa1e   : > { %3142 = vmatpush3.bf16.msra.mxu1 %v1967_v55 }
 0xa1f   : > { %3143 = vmatprep.subr.bf16.mxu1 %v1968_v48 }
 0xa22   : > { %3144 = vmatpush3.bf16.msra.mxu1 %v1968_v48 }
 0xad4   : > { %v3123_v63 = vpop.f32.mrb[24].mxu0 }
 0xad5   : > { %v4202_v38 = vadd.f32 %v3123_v63, %v2898_v15  ;;  %v1854_v31 = vpop.f32.mrb[25].mxu0 }
 0xad6   : > { %v4204_v33 = vadd.f32 %v2898_v15, %v1854_v31  ;;  %v3124_v35 = vpop.f32.mrb[26].mxu0 }
 0xad7   : > { %v1887_v19 = vmul.f32 %v4202_v38, %v4202_v38  ;;  %v4208_v40 = vadd.f32 %v3124_v35, %v2898_v15  ;;  %v1857_v22 = vpop.f32.mrb[27].mxu0 }
 0xad8   : > { %v1885_v49 = vmul.f32 %v4204_v33, %v4204_v33  ;;  %v4212_v42 = vadd.f32 %v2898_v15, %v1857_v22 }
 0xad9   : > { %v1895_v34 = vmul.f32 %v1887_v19, %v4202_v38  ;;  %v1888_v54 = vmul.f32 %v4208_v40, %v4208_v40 }
 0xada   : > { %v1893_v25 = vmul.f32 %v1885_v49, %v4204_v33  ;;  %v1886_v41 = vmul.f32 %v4212_v42, %v4212_v42 }
 0xadb   : > { %v1903_v44 = vmul.f32 0.044715, %v1895_v34  ;;  %v1896_v45 = vmul.f32 %v1888_v54, %v4208_v40 }
 0xadc   : > { %v1901_v60 = vmul.f32 0.044715, %v1893_v25  ;;  %v1894_v46 = vmul.f32 %v1886_v41, %v4212_v42 }
 0xadd   : > { %v1911_v47 = vadd.f32 %v1903_v44, %v4202_v38  ;;  %v1904_v50 = vmul.f32 0.044715, %v1896_v45  ;;  %v3127_v7 = vpop.f32.mrb[28].mxu0 }
 0xade   : > { %v1909_v51 = vadd.f32 %v1901_v60, %v4204_v33  ;;  %v1902_v57 = vmul.f32 0.044715, %v1894_v46  ;;  %v4224_v58 = vadd.f32 %v3127_v7, %v2898_v15  ;;  %v1870_v59 = vpop.f32.mrb[29].mxu0 }
 0xadf   : > { %v1919_v61 = vmul.f32 0.7978846, %v1911_v47  ;;  %v1912_v52 = vadd.f32 %v1904_v50, %v4208_v40  ;;  %v4227_v20 = vadd.f32 %v2898_v15, %v1870_v59  ;;  %v3128_v23 = vpop.f32.mrb[30].mxu0 }
 0xae0   : > { %v1917_v0 = vmul.f32 0.7978846, %v1909_v51  ;;  %v1910_v1 = vadd.f32 %v1902_v57, %v4212_v42  ;;  %v1891_v62 = vmul.f32 %v4224_v58, %v4224_v58  ;;  %v4232_v4 = vadd.f32 %v3128_v23, %v2898_v15  ;;  %v1873_v56 = vpop.f32.mrb[31].mxu0 }
 0xae1   : > { %3388 = vtanh.f32 %v1919_v61  ;;  %v1920_v3 = vmul.f32 0.7978846, %v1912_v52  ;;  %v1889_v10 = vmul.f32 %v4227_v20, %v4227_v20  ;;  %v1874_v13 = vadd.f32 %v2898_v15, %v1873_v56 }
 0xae2   : > { %3390 = vtanh.f32 %v1917_v0  ;;  %v1918_v12 = vmul.f32 0.7978846, %v1910_v1  ;;  %v1899_v14 = vmul.f32 %v1891_v62, %v4224_v58  ;;  %v1892_v16 = vmul.f32 %v4232_v4, %v4232_v4 }
 0xae3   : > { %3392 = vtanh.f32 %v1920_v3  ;;  %v1897_v18 = vmul.f32 %v1889_v10, %v4227_v20  ;;  %v1890_v17 = vmul.f32 %v1874_v13, %v1874_v13 }
 0xae4   : > { %3394 = vtanh.f32 %v1918_v12  ;;  %v1907_v2 = vmul.f32 0.044715, %v1899_v14  ;;  %v1900_v53 = vmul.f32 %v1892_v16, %v4232_v4 }
 0xae5   : > { %v1905_v8 = vmul.f32 0.044715, %v1897_v18  ;;  %v1898_v27 = vmul.f32 %v1890_v17, %v1874_v13 }
 0xae6   : > { %v1915_v29 = vadd.f32 %v1907_v2, %v4224_v58  ;;  %v1908_v55 = vmul.f32 0.044715, %v1900_v53 }
 0xae7   : > { %v1913_v9 = vadd.f32 %v1905_v8, %v4227_v20  ;;  %v1906_v11 = vmul.f32 0.044715, %v1898_v27 }
 0xae8   : > { %v1923_v48 = vmul.f32 0.7978846, %v1915_v29  ;;  %v1916_v15 = vadd.f32 %v1908_v55, %v4232_v4  ;;  %v2903_v29 = vld [vmem:[%s4495_s14] ss:$0 sm:$0xff] }
 0xae9   : > { %v1921_v63 = vmul.f32 0.7978846, %v1913_v9  ;;  %v1914_v31 = vadd.f32 %v1906_v11, %v1874_v13 }
 0xaea   : > { %3396 = vtanh.f32 %v1923_v48  ;;  %v1924_v35 = vmul.f32 0.7978846, %v1916_v15 }
 0xaeb   : > { %v3389_v19 = vpop.eup %3388  ;;  %3398 = vtanh.f32 %v1921_v63  ;;  %v1922_v22 = vmul.f32 0.7978846, %v1914_v31 }
 0xaec   : > { %v3391_v49 = vpop.eup %3390  ;;  %v1935_v34 = vadd.f32 1.0, %v3389_v19  ;;  %3400 = vtanh.f32 %v1924_v35 }
 0xaed   : > { %v3393_v54 = vpop.eup %3392  ;;  %3402 = vtanh.f32 %v1922_v22  ;;  %v1933_v25 = vadd.f32 1.0, %v3391_v49 }
 0xaee   : > { %v3395_v41 = vpop.eup %3394  ;;  %v1943_v44 = vmul.f32 0.5, %v1935_v34  ;;  %v1936_v45 = vadd.f32 1.0, %v3393_v54 }
 0xaef   : > { %v1934_v60 = vadd.f32 1.0, %v3395_v41  ;;  %v1941_v46 = vmul.f32 0.5, %v1933_v25 }
 0xaf0   : > { %v1944_v47 = vmul.f32 0.5, %v1936_v45  ;;  %v1951_v7 = vmul.f32 %v1943_v44, %v4202_v38 }
 0xaf1   : > { %v1942_v50 = vmul.f32 0.5, %v1934_v60  ;;  %v1949_v57 = vmul.f32 %v1941_v46, %v4204_v33 }
 0xaf2   : > { %v1952_v51 = vmul.f32 %v1944_v47, %v4208_v40 }
 0xaf3   : > { %v1950_v59 = vmul.f32 %v1942_v50, %v4212_v42 }
 0xaf4   : > { %v3397_v61 = vpop.eup %3396  ;;  %v1958_v52 = vpack.c.bf16 %v1952_v51, %v1951_v7 }
 0xaf5   : > { %v3399_v23 = vpop.eup %3398  ;;  %v1957_v0 = vpack.c.bf16 %v1950_v59, %v1949_v57  ;;  %v1939_v1 = vadd.f32 1.0, %v3397_v61 }
 0xaf6   : > { %v3401_v62 = vpop.eup %3400  ;;  %v1937_v56 = vadd.f32 1.0, %v3399_v23 }
 0xaf7   : > { %v3403_v3 = vpop.eup %3402  ;;  %3145 = vmatprep.mubr.bf16.mxu1 %v1957_v0  ;;  %v1940_v10 = vadd.f32 1.0, %v3401_v62  ;;  %v1947_v12 = vmul.f32 0.5, %v1939_v1 }
 0xaf8   : > { %3146 = vmatmul.mubr.bf16.vlgmr.msra.gmra.mrb[32].mxu1 %v1958_v52  ;;  %v1938_v14 = vadd.f32 1.0, %v3403_v3  ;;  %v1945_v38 = vmul.f32 0.5, %v1937_v56 }
 0xaf9   : > { %v1948_v16 = vmul.f32 0.5, %v1940_v10  ;;  %v1955_v33 = vmul.f32 %v1947_v12, %v4224_v58 }
 0xafa   : > { %v1946_v40 = vmul.f32 0.5, %v1938_v14  ;;  %v1953_v18 = vmul.f32 %v1945_v38, %v4227_v20 }
 0xafb   : > { %v1956_v42 = vmul.f32 %v1948_v16, %v4232_v4 }
 0xafc   : > { %v1954_v17 = vmul.f32 %v1946_v40, %v1874_v13 }
 0xafd   : > { %v1960_v2 = vpack.c.bf16 %v1956_v42, %v1955_v33 }
 0xafe   : > { %v1959_v53 = vpack.c.bf16 %v1954_v17, %v1953_v18 }
 0xb00   : > { %3149 = vmatprep.mubr.bf16.mxu1 %v1959_v53 }
 0xb01   : > { %3150 = vmatmul.mubr.bf16.gmra.mrb[36].mxu1 %v1960_v2 }
 0xbcb   : > { %v3147_v8 = vpop.f32.mrb[32].mxu1 }
 0xbcc   : > { %v2003_v27 = vpop.f32.mrb[33].mxu1  ;;  %v2036_v55 = vadd.f32 %v3147_v8, %v4020_v28 }
 0xbcd   : > { %v2034_v9 = vadd.f32 %v2003_v27, %v4016_v26  ;;  %v3148_v58 = vpop.f32.mrb[34].mxu1 }
 0xbce   : > { %v2006_v11 = vpop.f32.mrb[35].mxu1  ;;  %v2037_v4 = vadd.f32 %v3148_v58, %v4026_v39  ;;  %v2050_v63 = vadd.f32 %v2903_v29, %v2036_v55 }
 0xbcf   : > { %v2035_v20 = vadd.f32 %v2006_v11, %v4022_v6  ;;  %v2048_v13 = vadd.f32 %v2903_v29, %v2034_v9 }
 0xbd0   : > { %v2051_v35 = vadd.f32 %v2903_v29, %v2037_v4  ;;  %v2062_v26 = vsel %vm907_vm0, %v2050_v63, 0.0 }
 0xbd1   : > { %v2056_v48 = vsel %vm907_vm0, %v2048_v13, 0.0  ;;  %v2049_v15 = vadd.f32 %v2903_v29, %v2035_v20 }
 0xbd2   : > { %2057 = vadd.xlane.f32.xlu0 %v2056_v48  ;;  %v2065_v34 = vsel %vm907_vm0, %v2051_v35, 0.0 }
 0xbd3   : > { %v2059_v31 = vsel %vm907_vm0, %v2049_v15, 0.0 }
 0xbd4   : > { %v3151_v19 = vpop.f32.mrb[36].mxu1  ;;  %2060 = vadd.xlane.f32.xlu1 %v2059_v31  ;;  %v803_v31 = vld [vmem:[%s4496_s15] sm:$0xff] }
 0xbd5   : > { %v2019_v28 = vpop.f32.mrb[37].mxu1  ;;  %v2040_v22 = vadd.f32 %v3151_v19, %v4040_v21 }
 0xbd6   : > { %v2038_v39 = vadd.f32 %v2019_v28, %v4036_v37  ;;  %v3152_v49 = vpop.f32.mrb[38].mxu1  ;;  %2063 = vadd.xlane.f32.xlu0 %v2062_v26  ;;  %v805_v28 = vld [vmem:[%s4496_s15 + $0x10] sm:$0xff]  ;;  %v806_v26 = vld [vmem:[%s4496_s15 + $0x18] sm:$0xff] }
 0xbd7   : > { %v2022_v6 = vpop.f32.mrb[39].mxu1  ;;  %v2041_v54 = vadd.f32 %v3152_v49, %v4046_v30  ;;  %v2054_v60 = vadd.f32 %v2903_v29, %v2040_v22  ;;  %v2189_v22 = vpack.c.bf16 %v806_v26, %v805_v28  ;;  %v808_v49 = vld [vmem:[%s4496_s15 + $0x28] sm:$0xff] }
 0xbd8   : > { %v2039_v25 = vadd.f32 %v2022_v6, %v4042_v43  ;;  %2066 = vadd.xlane.f32.xlu1 %v2065_v34  ;;  %v2052_v41 = vadd.f32 %v2903_v29, %v2038_v39  ;;  %v807_v39 = vld [vmem:[%s4496_s15 + $0x20] sm:$0xff]  ;;  %v809_v34 = vld [vmem:[%s4496_s15 + $0x30] sm:$0xff] }
 0xbd9   : > { %v2055_v46 = vadd.f32 %v2903_v29, %v2041_v54  ;;  %v2074_v37 = vsel %vm907_vm0, %v2054_v60, 0.0  ;;  %v2190_v6 = vpack.c.bf16 %v808_v49, %v807_v39  ;;  %v810_v54 = vld [vmem:[%s4496_s15 + $0x38] sm:$0xff] }
 0xbda   : > { %v2068_v44 = vsel %vm907_vm0, %v2052_v41, 0.0  ;;  %v2053_v45 = vadd.f32 %v2903_v29, %v2039_v25  ;;  %v2191_v25 = vpack.c.bf16 %v810_v54, %v809_v34 }
 0xbdb   : > { %2069 = vadd.xlane.f32.xlu0 %v2068_v44  ;;  %v2077_v47 = vsel %vm907_vm0, %v2055_v46, 0.0 }
 0xbdc   : > { %v2071_v21 = vsel %vm907_vm0, %v2053_v45, 0.0 }
 0xbdd   : > { %2072 = vadd.xlane.f32.xlu1 %v2071_v21 }
 0xbdf   : > { %2075 = vadd.xlane.f32.xlu0 %v2074_v37 }
 0xbe1   : > { %2078 = vadd.xlane.f32.xlu1 %v2077_v47 }
 0xc5f   : > { %v2058_v30 = vpop.xlane.xlu0 %2057 }
 0xc60   : > { %v2080_v50 = vmul.f32 0.015625, %v2058_v30 }
 0xc61   : > { %v2061_v43 = vpop.xlane.xlu1 %2060 }
 0xc62   : > { %v4270_v7 = vsub.f32 %v2048_v13, %v2080_v50  ;;  %v2081_v51 = vmul.f32 0.015625, %v2061_v43 }
 0xc63   : > { %v2064_v57 = vpop.xlane.xlu0 %2063 }
 0xc64   : > { %v4272_v59 = vsub.f32 %v2049_v15, %v2081_v51  ;;  %v2082_v61 = vmul.f32 0.015625, %v2064_v57  ;;  %v2096_v52 = vmul.f32 %v4270_v7, %v4270_v7 }
 0xc65   : > { %v2067_v23 = vpop.xlane.xlu1 %2066 }
 0xc66   : > { %v4276_v0 = vsub.f32 %v2050_v63, %v2082_v61  ;;  %v2083_v1 = vmul.f32 0.015625, %v2067_v23  ;;  %v2104_v62 = vsel %vm907_vm0, %v2096_v52, 0.0  ;;  %v2097_v56 = vmul.f32 %v4272_v59, %v4272_v59 }
 0xc67   : > { %2105 = vadd.xlane.f32.xlu0 %v2104_v62  ;;  %v2162_v61 = vsub.s32 3, %v3759_v32 }
 0xc68   : > { %v4281_v3 = vsub.f32 %v2051_v35, %v2083_v1  ;;  %v2070_v10 = vpop.xlane.xlu0 %2069  ;;  %v2107_v12 = vsel %vm907_vm0, %v2097_v56, 0.0  ;;  %v2098_v14 = vmul.f32 %v4276_v0, %v4276_v0  ;;  %v804_v35 = vld [vmem:[%s4496_s15 + $0x8] sm:$0xff] }
 0xc69   : > { %v2084_v38 = vmul.f32 0.015625, %v2070_v10  ;;  %2108 = vadd.xlane.f32.xlu1 %v2107_v12  ;;  %v2188_v19 = vpack.c.bf16 %v804_v35, %v803_v31  ;;  %v2163_v10 = vrot.slane %v4130_v5, %v2162_v61  ;;  %v2175_v32 = vrot.slane %v4137_v24, %v2162_v61 }
 0xc6a   : > { %v2073_v16 = vpop.xlane.xlu1 %2072  ;;  %v2110_v40 = vsel %vm907_vm0, %v2098_v14, 0.0  ;;  %v2099_v33 = vmul.f32 %v4281_v3, %v4281_v3 }
 0xc6b   : > { %v4289_v42 = vsub.f32 %v2052_v41, %v2084_v38  ;;  %v2085_v18 = vmul.f32 0.015625, %v2073_v16  ;;  %2111 = vadd.xlane.f32.xlu0 %v2110_v40  ;;  %3153 = vmatprep.subr.bf16.mxu0 %v2188_v19 }
 0xc6c   : > { %v2076_v17 = vpop.xlane.xlu0 %2075  ;;  %v2113_v2 = vsel %vm907_vm0, %v2099_v33, 0.0  ;;  %3154 = vmatpush3.bf16.msra.mxu0 %v2188_v19 }
 0xc6d   : > { %v4292_v53 = vsub.f32 %v2053_v45, %v2085_v18  ;;  %v2086_v8 = vmul.f32 0.015625, %v2076_v17  ;;  %2114 = vadd.xlane.f32.xlu1 %v2113_v2  ;;  %v2100_v27 = vmul.f32 %v4289_v42, %v4289_v42  ;;  %3155 = vmatprep.subr.bf16.mxu0 %v2189_v22 }
 0xc6e   : > { %v2079_v29 = vpop.xlane.xlu1 %2078 }
 0xc6f   : > { %v4296_v55 = vsub.f32 %v2054_v60, %v2086_v8  ;;  %v2087_v9 = vmul.f32 0.015625, %v2079_v29  ;;  %v2116_v58 = vsel %vm907_vm0, %v2100_v27, 0.0  ;;  %v2101_v11 = vmul.f32 %v4292_v53, %v4292_v53 }
 0xc70   : > { %2117 = vadd.xlane.f32.xlu0 %v2116_v58  ;;  %3156 = vmatpush3.bf16.msra.mxu0 %v2189_v22 }
 0xc71   : > { %v4301_v4 = vsub.f32 %v2055_v46, %v2087_v9  ;;  %v2119_v20 = vsel %vm907_vm0, %v2101_v11, 0.0  ;;  %v2102_v13 = vmul.f32 %v4296_v55, %v4296_v55  ;;  %3157 = vmatprep.subr.bf16.mxu0 %v2190_v6 }
 0xc72   : > { %2120 = vadd.xlane.f32.xlu1 %v2119_v20 }
 0xc73   : > { %v2122_v48 = vsel %vm907_vm0, %v2102_v13, 0.0  ;;  %v2103_v15 = vmul.f32 %v4301_v4, %v4301_v4 }
 0xc74   : > { %2123 = vadd.xlane.f32.xlu0 %v2122_v48  ;;  %3158 = vmatpush3.bf16.msra.mxu0 %v2190_v6 }
 0xc75   : > { %v2125_v63 = vsel %vm907_vm0, %v2103_v15, 0.0  ;;  %3159 = vmatprep.subr.bf16.mxu0 %v2191_v25 }
 0xc76   : > { %2126 = vadd.xlane.f32.xlu1 %v2125_v63 }
 0xc78   : > { %3160 = vmatpush3.bf16.msra.mxu0 %v2191_v25 }
 0xcf4   : > { %v2106_v41 = vpop.xlane.xlu0 %2105 }
 0xcf5   : > { %v2128_v44 = vmul.f32 0.015625, %v2106_v41 }
 0xcf6   : > { %v2109_v45 = vpop.xlane.xlu1 %2108 }
 0xcf7   : > { %v2136_v60 = vadd.f32 1e-05, %v2128_v44  ;;  %v2129_v21 = vmul.f32 0.015625, %v2109_v45  ;;  %v3464_v45 = vmov 0.0|0.0  }
 0xcf8   : > { %v2112_v46 = vpop.xlane.xlu0 %2111  ;;  %3238 = vmatprep.subr.bf16.mxu0 %v3464_v45 }
 0xcf9   : > { %3404 = vrsqrt.f32 %v2136_v60  ;;  %v2137_v37 = vadd.f32 1e-05, %v2129_v21  ;;  %v2130_v47 = vmul.f32 0.015625, %v2112_v46  ;;  %v2431_v60 = vld [vmem:[%s4501_s20 + $0x8] sm:$0xff]  ;;  %v2432_v21 = vld [vmem:[%s4501_s20 + $0x10] sm:$0xff] }
 0xcfa   : > { %v2115_v30 = vpop.xlane.xlu1 %2114 }
 0xcfb   : > { %3406 = vrsqrt.f32 %v2137_v37  ;;  %v2138_v50 = vadd.f32 1e-05, %v2130_v47  ;;  %v2131_v43 = vmul.f32 0.015625, %v2115_v30  ;;  %v2433_v37 = vld [vmem:[%s4501_s20 + $0x18] sm:$0xff]  ;;  %v2434_v30 = vld [vmem:[%s4501_s20 + $0x20] sm:$0xff] }
 0xcfc   : > { %v3254_v47 = vpack.c.bf16 %v2433_v37, %v2432_v21 }
 0xcfd   : > { %3408 = vrsqrt.f32 %v2138_v50  ;;  %v2139_v51 = vadd.f32 1e-05, %v2131_v43  ;;  %v2118_v57 = vpop.xlane.xlu0 %2117  ;;  %v2435_v50 = vld [vmem:[%s4501_s20 + $0x28] sm:$0xff] }
 0xcfe   : > { %v2132_v52 = vmul.f32 0.015625, %v2118_v57  ;;  %v3258_v43 = vpack.c.bf16 %v2435_v50, %v2434_v30 }
 0xcff   : > { %3410 = vrsqrt.f32 %v2139_v51  ;;  %v2121_v23 = vpop.xlane.xlu1 %2120  ;;  %v2904_v51 = vld [vmem:[%s4497_s16] ss:$0 sm:$0xff] }
 0xd00   : > { %v2140_v1 = vadd.f32 1e-05, %v2132_v52  ;;  %v2133_v62 = vmul.f32 0.015625, %v2121_v23 }
 0xd01   : > { %v2124_v56 = vpop.xlane.xlu0 %2123 }
 0xd02   : > { %3412 = vrsqrt.f32 %v2140_v1  ;;  %v2141_v12 = vadd.f32 1e-05, %v2133_v62  ;;  %v2134_v14 = vmul.f32 0.015625, %v2124_v56 }
 0xd03   : > { %v3405_v38 = vpop.eup %3404  ;;  %v2127_v16 = vpop.xlane.xlu1 %2126 }
 0xd04   : > { %v2152_v40 = vmul.f32 %v3405_v38, %v4270_v7  ;;  %3414 = vrsqrt.f32 %v2141_v12  ;;  %v2142_v33 = vadd.f32 1e-05, %v2134_v14  ;;  %v2135_v18 = vmul.f32 0.015625, %v2127_v16 }
 0xd05   : > { %v3407_v17 = vpop.eup %3406 }
 0xd06   : > { %v2153_v2 = vmul.f32 %v3407_v17, %v4272_v59  ;;  %3416 = vrsqrt.f32 %v2142_v33  ;;  %v2143_v8 = vadd.f32 1e-05, %v2135_v18  ;;  %v2164_v27 = vmul.f32 %v2163_v10, %v2152_v40 }
 0xd07   : > { %v3409_v29 = vpop.eup %3408 }
 0xd08   : > { %v2154_v5 = vmul.f32 %v3409_v29, %v4276_v0  ;;  %3418 = vrsqrt.f32 %v2143_v8  ;;  %v2165_v9 = vmul.f32 %v2163_v10, %v2153_v2  ;;  %v2176_v20 = vadd.f32 %v2175_v32, %v2164_v27 }
 0xd09   : > { %v3411_v58 = vpop.eup %3410 }
 0xd0a   : > { %v2166_v11 = vmul.f32 %v2163_v10, %v2154_v5  ;;  %v2155_v7 = vmul.f32 %v3411_v58, %v4281_v3  ;;  %v2177_v13 = vadd.f32 %v2175_v32, %v2165_v9 }
 0xd0c   : > { %v3413_v48 = vpop.eup %3412  ;;  %v2167_v15 = vmul.f32 %v2163_v10, %v2155_v7  ;;  %v2184_v63 = vpack.c.bf16 %v2177_v13, %v2176_v20  ;;  %v2178_v31 = vadd.f32 %v2175_v32, %v2166_v11 }
 0xd0d   : > { %v2156_v24 = vmul.f32 %v3413_v48, %v4289_v42 }
 0xd0e   : > { %v3415_v59 = vpop.eup %3414  ;;  %v2179_v35 = vadd.f32 %v2175_v32, %v2167_v15  ;;  %3161 = vmatprep.mubr.msk.bf16.mxu0 %vm907_vm0, %v2184_v63 }
 0xd0f   : > { %v2157_v0 = vmul.f32 %v3415_v59, %v4292_v53  ;;  %v2168_v19 = vmul.f32 %v2163_v10, %v2156_v24 }
 0xd10   : > { %v3417_v28 = vpop.eup %3416  ;;  %v2185_v26 = vpack.c.bf16 %v2179_v35, %v2178_v31 }
 0xd11   : > { %v2158_v22 = vmul.f32 %v3417_v28, %v4296_v55  ;;  %v2169_v3 = vmul.f32 %v2163_v10, %v2157_v0  ;;  %v2180_v6 = vadd.f32 %v2175_v32, %v2168_v19  ;;  %v3466_v55 = vmov 0.0  }
 0xd12   : > { %v3419_v39 = vpop.eup %3418  ;;  %3162 = vmatmul.mubr.msk.bf16.vlgmr.msra.gmra.mrb[32].mxu0 %vm907_vm0, %v2185_v26 }
 0xd13   : > { %v2159_v49 = vmul.f32 %v3419_v39, %v4301_v4  ;;  %v2181_v42 = vadd.f32 %v2175_v32, %v2169_v3  ;;  %v2170_v34 = vmul.f32 %v2163_v10, %v2158_v22  ;;  %v2430_v4 = vld [vmem:[%s4501_s20] sm:$0xff] }
 0xd14   : > { %v3250_v46 = vpack.c.bf16 %v2431_v60, %v2430_v4 }
 0xd15   : > { %v2186_v54 = vpack.c.bf16 %v2181_v42, %v2180_v6  ;;  %v2171_v25 = vmul.f32 %v2163_v10, %v2159_v49  ;;  %v2182_v41 = vadd.f32 %v2175_v32, %v2170_v34 }
 0xd16   : > { %3251 = vmatprep.subr.bf16.mxu1 %v3250_v46 }
 0xd17   : > { %3165 = vmatprep.mubr.msk.bf16.mxu0 %vm907_vm0, %v2186_v54  ;;  %v2183_v53 = vadd.f32 %v2175_v32, %v2171_v25  ;;  %3253 = vmatpush3.bf16.msra.mxu1 %v3250_v46 }
 0xd18   : > { %3255 = vmatprep.subr.bf16.mxu1 %v3254_v47 }
 0xd19   : > { %v2187_v44 = vpack.c.bf16 %v2183_v53, %v2182_v41 }
 0xd1b   : > { %3166 = vmatmul.mubr.msk.bf16.gmra.mrb[36].mxu0 %vm907_vm0, %v2187_v44  ;;  %3257 = vmatpush3.bf16.msra.mxu1 %v3254_v47 }
 0xd1c   : > { %3185 = vmatprep.mubr.msk.f32.mxu0 %vm3465_vm1, %v3466_v55  ;;  %3259 = vmatprep.subr.bf16.mxu1 %v3258_v43 }
 0xd1f   : > { %3261 = vmatpush3.bf16.msra.mxu1 %v3258_v43 }
 0xde5   : > { %v3163_v57 = vpop.f32.mrb[32].mxu0 }
 0xde6   : > { %v4371_v61 = vadd.f32 %v3163_v57, %v2904_v51  ;;  %v2244_v52 = vpop.f32.mrb[33].mxu0 }
 0xde7   : > { %v4373_v23 = vadd.f32 %v2904_v51, %v2244_v52  ;;  %v3164_v1 = vpop.f32.mrb[34].mxu0 }
 0xde8   : > { %v2277_v62 = vmul.f32 %v4371_v61, %v4371_v61  ;;  %v4377_v56 = vadd.f32 %v3164_v1, %v2904_v51  ;;  %v2247_v10 = vpop.f32.mrb[35].mxu0 }
 0xde9   : > { %v2275_v12 = vmul.f32 %v4373_v23, %v4373_v23  ;;  %v4381_v14 = vadd.f32 %v2904_v51, %v2247_v10 }
 0xdea   : > { %v2285_v38 = vmul.f32 %v2277_v62, %v4371_v61  ;;  %v2278_v16 = vmul.f32 %v4377_v56, %v4377_v56 }
 0xdeb   : > { %v2283_v40 = vmul.f32 %v2275_v12, %v4373_v23  ;;  %v2276_v33 = vmul.f32 %v4381_v14, %v4381_v14 }
 0xdec   : > { %v2293_v18 = vmul.f32 0.044715, %v2285_v38  ;;  %v2286_v17 = vmul.f32 %v2278_v16, %v4377_v56 }
 0xded   : > { %v2291_v32 = vmul.f32 0.044715, %v2283_v40  ;;  %v2284_v2 = vmul.f32 %v2276_v33, %v4381_v14 }
 0xdee   : > { %v2301_v8 = vadd.f32 %v2293_v18, %v4371_v61  ;;  %v2294_v27 = vmul.f32 0.044715, %v2286_v17  ;;  %v3167_v29 = vpop.f32.mrb[36].mxu0 }
 0xdef   : > { %v2299_v5 = vadd.f32 %v2291_v32, %v4373_v23  ;;  %v2292_v9 = vmul.f32 0.044715, %v2284_v2  ;;  %v4393_v58 = vadd.f32 %v3167_v29, %v2904_v51  ;;  %v2260_v11 = vpop.f32.mrb[37].mxu0 }
 0xdf0   : > { %v2309_v7 = vmul.f32 0.7978846, %v2301_v8  ;;  %v2302_v20 = vadd.f32 %v2294_v27, %v4377_v56  ;;  %v4396_v13 = vadd.f32 %v2904_v51, %v2260_v11  ;;  %v3168_v48 = vpop.f32.mrb[38].mxu0 }
 0xdf1   : > { %v2307_v15 = vmul.f32 0.7978846, %v2299_v5  ;;  %v2300_v63 = vadd.f32 %v2292_v9, %v4381_v14  ;;  %v2281_v24 = vmul.f32 %v4393_v58, %v4393_v58  ;;  %v4401_v59 = vadd.f32 %v3168_v48, %v2904_v51  ;;  %v2263_v31 = vpop.f32.mrb[39].mxu0 }
 0xdf2   : > { %3420 = vtanh.f32 %v2309_v7  ;;  %v2310_v35 = vmul.f32 0.7978846, %v2302_v20  ;;  %v2279_v0 = vmul.f32 %v4396_v13, %v4396_v13  ;;  %v2264_v19 = vadd.f32 %v2904_v51, %v2263_v31  ;;  %v2347_v31 = vld [vmem:[%s4498_s17] sm:$0x1] }
 0xdf3   : > { %3422 = vtanh.f32 %v2307_v15  ;;  %v2308_v28 = vmul.f32 0.7978846, %v2300_v63  ;;  %v2289_v26 = vmul.f32 %v2281_v24, %v4393_v58  ;;  %v2282_v22 = vmul.f32 %v4401_v59, %v4401_v59 }
 0xdf4   : > { %3424 = vtanh.f32 %v2310_v35  ;;  %v2287_v3 = vmul.f32 %v2279_v0, %v4396_v13  ;;  %v2280_v39 = vmul.f32 %v2264_v19, %v2264_v19  ;;  %v2909_v35 = vld [vmem:[#allocation2] ss:$0 sm:$0xff]  ;;  %v2419_v0 = vld [vmem:[%s4500_s19 + $0x8] sm:$0xff] }
 0xdf5   : > { %3426 = vtanh.f32 %v2308_v28  ;;  %v2297_v49 = vmul.f32 0.044715, %v2289_v26  ;;  %v2290_v6 = vmul.f32 %v2282_v22, %v4401_v59  ;;  %2445 = vperm.xlu0 %3307, %v2909_v35   ;;  %v2420_v22 = vld [vmem:[%s4500_s19 + $0x10] sm:$0xff] }
 0xdf6   : > { %v2295_v42 = vmul.f32 0.044715, %v2287_v3  ;;  %v2288_v34 = vmul.f32 %v2280_v39, %v2264_v19 }
 0xdf7   : > { %v2305_v54 = vadd.f32 %v2297_v49, %v4393_v58  ;;  %v2298_v25 = vmul.f32 0.044715, %v2290_v6  ;;  %v2421_v6 = vld [vmem:[%s4500_s19 + $0x18] sm:$0xff] }
 0xdf8   : > { %v2303_v41 = vadd.f32 %v2295_v42, %v4396_v13  ;;  %v2296_v53 = vmul.f32 0.044715, %v2288_v34  ;;  %v2570_v34 = vld [vmem:[%s693_s18 + $0x8] sm:$0xff] }
 0xdf9   : > { %v2313_v44 = vmul.f32 0.7978846, %v2305_v54  ;;  %v2306_v55 = vadd.f32 %v2298_v25, %v4401_v59  ;;  %v2571_v25 = vld [vmem:[%s693_s18 + $0x10] sm:$0xff] }
 0xdfa   : > { %v2311_v4 = vmul.f32 0.7978846, %v2303_v41  ;;  %v2304_v60 = vadd.f32 %v2296_v53, %v2264_v19  ;;  %v2572_v41 = vld [vmem:[%s693_s18 + $0x18] sm:$0xff] }
 0xdfb   : > { %3428 = vtanh.f32 %v2313_v44  ;;  %v2314_v21 = vmul.f32 0.7978846, %v2306_v55  ;;  %v3272_v53 = vpack.c.bf16 %v2572_v41, %v2571_v25 }
 0xdfc   : > { %v3421_v46 = vpop.eup %3420  ;;  %3430 = vtanh.f32 %v2311_v4  ;;  %v2312_v37 = vmul.f32 0.7978846, %v2304_v60 }
 0xdfd   : > { %v3423_v47 = vpop.eup %3422  ;;  %v2325_v30 = vadd.f32 1.0, %v3421_v46  ;;  %3432 = vtanh.f32 %v2314_v21 }
 0xdfe   : > { %v3425_v50 = vpop.eup %3424  ;;  %v2323_v43 = vadd.f32 1.0, %v3423_v47  ;;  %3434 = vtanh.f32 %v2312_v37 }
 0xdff   : > { %v3427_v51 = vpop.eup %3426  ;;  %v2333_v57 = vmul.f32 0.5, %v2325_v30  ;;  %v2326_v52 = vadd.f32 1.0, %v3425_v50 }
 0xe00   : > { %v2331_v1 = vmul.f32 0.5, %v2323_v43  ;;  %v2324_v62 = vadd.f32 1.0, %v3427_v51 }
 0xe01   : > { %v2334_v10 = vmul.f32 0.5, %v2326_v52  ;;  %v2341_v38 = vmul.f32 %v2333_v57, %v4371_v61 }
 0xe02   : > { %v2332_v12 = vmul.f32 0.5, %v2324_v62  ;;  %v2339_v40 = vmul.f32 %v2331_v1, %v4373_v23 }
 0xe03   : > { %v2342_v16 = vmul.f32 %v2334_v10, %v4377_v56 }
 0xe04   : > { %v2340_v33 = vmul.f32 %v2332_v12, %v4381_v14 }
 0xe05   : > { %v3429_v18 = vpop.eup %3428  ;;  %v3242_v17 = vpack.c.bf16 %v2342_v16, %v2341_v38 }
 0xe06   : > { %v3431_v32 = vpop.eup %3430  ;;  %v2329_v2 = vadd.f32 1.0, %v3429_v18  ;;  %v3239_v8 = vpack.c.bf16 %v2340_v33, %v2339_v40 }
 0xe07   : > { %v3433_v27 = vpop.eup %3432  ;;  %v2327_v29 = vadd.f32 1.0, %v3431_v32 }
 0xe08   : > { %v3435_v5 = vpop.eup %3434  ;;  %v2337_v9 = vmul.f32 0.5, %v2329_v2  ;;  %v2330_v11 = vadd.f32 1.0, %v3433_v27  ;;  %3240 = vmatpush3.bf16.xpose.msra.mxu0 %v3239_v8  ;;  %v2683_v2 = vld [vmem:[%s688_s30] sm:$0xff]  ;;  %v2685_v8 = vld [vmem:[%s688_s30 + $0x10] sm:$0xff] }
 0xe09   : > { %v2335_v7 = vmul.f32 0.5, %v2327_v29  ;;  %v2328_v20 = vadd.f32 1.0, %v3435_v5  ;;  %3241 = vmatprep.subr.bf16.mxu0 %v3464_v45 }
 0xe0a   : > { %v2338_v61 = vmul.f32 0.5, %v2330_v11  ;;  %v2345_v23 = vmul.f32 %v2337_v9, %v4393_v58  ;;  %v2436_v58 = vld [vmem:[%s4501_s20 + $0x30] sm:$0xff] }
 0xe0b   : > { %v2336_v56 = vmul.f32 0.5, %v2328_v20  ;;  %v2343_v48 = vmul.f32 %v2335_v7, %v4396_v13  ;;  %v2437_v13 = vld [vmem:[%s4501_s20 + $0x38] sm:$0xff]  ;;  %v2684_v20 = vld [vmem:[%s688_s30 + $0x8] sm:$0xff] }
 0xe0c   : > { %v2346_v14 = vmul.f32 %v2338_v61, %v4401_v59  ;;  %v3262_v59 = vpack.c.bf16 %v2437_v13, %v2436_v58  ;;  %v2686_v61 = vld [vmem:[%s688_s30 + $0x18] sm:$0xff] }
 0xe0d   : > { %v2344_v15 = vmul.f32 %v2336_v56, %v2264_v19  ;;  %v2418_v19 = vld [vmem:[%s4500_s19] sm:$0xff] }
 0xe0e   : > { %v3248_v63 = vpack.c.bf16 %v2346_v14, %v2345_v23  ;;  %3263 = vmatprep.subr.bf16.mxu1 %v3262_v59 }
 0xe0f   : > { %v3245_v24 = vpack.c.bf16 %v2344_v15, %v2343_v48  ;;  %3265 = vmatpush3.bf16.msra.mxu1 %v3262_v59 }
 0xe10   : > { %3243 = vmatpush3.bf16.xpose.msra.mxu0 %v3242_v17 }
 0xe11   : > { %3244 = vmatprep.subr.bf16.mxu0 %v3464_v45 }
 0xe18   : > { %3246 = vmatpush3.bf16.xpose.msra.mxu0 %v3245_v24 }
 0xe19   : > { %3247 = vmatprep.subr.bf16.mxu0 %v3464_v45 }
 0xe20   : > { %3249 = vmatpush3.bf16.xpose.msra.mxu0 %v3248_v63 }
 0xe27   : > { %3186 = vmatmul.mubr.f32.vlgmr.msra.gmra.mrb[40].mxu0 %v2347_v31 }
 0xe28   : > { %3232 = vmatprep.mubr.msk.f32.mxu0 %vm2573_vm2, %v2683_v2 }
 0xe74   : > { %v2446_v44 = vpop.permute.xlu0 %2445 }
 0xefa   : > { %v2414_v45 = vpop.f32.mrb[40].mxu0 }
 0xefb   : > { %v2425_v28 = vrot.slane %v2414_v45, %v3762_v36  ;;  %v3187_v26 = vpop.f32.mrb[41].mxu0  ;;  %v2569_v36 = vld [vmem:[%s693_s18] sm:$0xff] }
 0xefc   : > { %v3266_v54 = vpack.c.bf16 %v2570_v34, %v2569_v36 }
 0xefd   : > { %v2427_v3 = vmul.f32 %v2425_v28, %v2419_v0  ;;  %v2426_v39 = vmul.f32 %v2425_v28, %v2418_v19  ;;  %v2428_v49 = vmul.f32 %v2425_v28, %v2420_v22  ;;  %v2429_v42 = vmul.f32 %v2425_v28, %v2421_v6 }
 0xefe   : > { %3268 = vmatprep.subr.msk.bf16.mxu1 %vm3267_vm3, %v3266_v54 }
 0xeff   : > { %3204 = vmatprep.mubr.msk.f32.mxu1 %vm907_vm0, %v2426_v39 }
 0xf00   : > { %3205 = vmatmul.mubr.msk.f32.vlgmr.msra.gmra.mrb[40].mxu1 %vm907_vm0, %v2427_v3 }
 0xf01   : > { %3207 = vmatprep.mubr.msk.f32.mxu1 %vm907_vm0, %v2428_v49  ;;  %3271 = vmatpush3.bf16.xpose.msk.msra.mxu1 %vm3267_vm3, %v3266_v54 }
 0xf02   : > { %3274 = vmatprep.subr.msk.bf16.mxu1 %vm3267_vm3, %v3272_v53 }
 0xf04   : > { %3208 = vmatmul.mubr.msk.f32.gmra.mrb[42].mxu1 %vm907_vm0, %v2429_v42 }
 0xf09   : > { %3277 = vmatpush3.bf16.xpose.msk.msra.mxu1 %vm3267_vm3, %v3272_v53 }
 0xfd3   : > { %v3206_v55 = vpop.f32.mrb[40].mxu1 }
 0xfd4   : > { %v2532_v4 = vadd.f32 %v3206_v55, %v2446_v44  ;;  %v2526_v60 = vpop.f32.mrb[41].mxu1 }
 0xfd5   : > { %v2527_v21 = vadd.f32 %v2526_v60, %v2446_v44 }
 0xfd6   : > { %v2915_v46 = vmul.f32 -1.442695, %v2532_v4 }
 0xfd7   : > { %v2914_v37 = vmul.f32 -1.442695, %v2527_v21  ;;  %v3209_v47 = vpop.f32.mrb[42].mxu1 }
 0xfd8   : > { %3436 = vpow2.f32 %v2915_v46  ;;  %v2542_v30 = vadd.f32 %v3209_v47, %v2446_v44  ;;  %v2536_v50 = vpop.f32.mrb[43].mxu1 }
 0xfd9   : > { %3438 = vpow2.f32 %v2914_v37  ;;  %v2537_v43 = vadd.f32 %v2536_v50, %v2446_v44 }
 0xfda   : > { %v2917_v51 = vmul.f32 -1.442695, %v2542_v30 }
 0xfdb   : > { %v2916_v57 = vmul.f32 -1.442695, %v2537_v43 }
 0xfdc   : > { %3440 = vpow2.f32 %v2917_v51 }
 0xfdd   : > { %3442 = vpow2.f32 %v2916_v57 }
 0xfe2   : > { %v3437_v52 = vpop.eup %3436 }
 0xfe3   : > { %v3439_v1 = vpop.eup %3438  ;;  %v2558_v62 = vadd.f32 1.0, %v3437_v52 }
 0xfe4   : > { %v2557_v10 = vadd.f32 1.0, %v3439_v1 }
 0xfe6   : > { %v3441_v12 = vpop.eup %3440  ;;  %3444 = vrcp.f32 %v2557_v10 }
 0xfe7   : > { %v3443_v38 = vpop.eup %3442  ;;  %3446 = vrcp.f32 %v2558_v62  ;;  %v2560_v16 = vadd.f32 1.0, %v3441_v12 }
 0xfe8   : > { %v2559_v40 = vadd.f32 1.0, %v3443_v38 }
 0xfea   : > { %3448 = vrcp.f32 %v2559_v40 }
 0xfeb   : > { %3450 = vrcp.f32 %v2560_v16 }
 0xff0   : > { %v3445_v33 = vpop.eup %3444 }
 0xff1   : > { %v3447_v18 = vpop.eup %3446  ;;  %3218 = vmatprep.mubr.msk.f32.mxu1 %vm2573_vm2, %v3445_v33 }
 0xff2   : > { %3219 = vmatmul.mubr.msk.f32.vlgmr.msra.gmra.mrb[44].mxu1 %vm2573_vm2, %v3447_v18 }
 0xff4   : > { %v3449_v17 = vpop.eup %3448 }
 0xff5   : > { %v3451_v32 = vpop.eup %3450  ;;  %3221 = vmatprep.mubr.msk.f32.mxu1 %vm2573_vm2, %v3449_v17 }
 0xff6   : > { %3222 = vmatmul.mubr.msk.f32.gmra.mrb[46].mxu1 %vm2573_vm2, %v3451_v32 }
 0xff7   : > { %3235 = vmatprep.mubr.msk.f32.mxu1 %vm2573_vm2, %v2685_v8 }
0x10c5   : > { %v3220_v27 = vpop.f32.mrb[44].mxu1 }
0x10c6   : > { %v2664_v29 = vpop.f32.mrb[45].mxu1 }
0x10c7   : > { %v3278_v5 = vpack.c.bf16 %v3220_v27, %v2664_v29 }
0x10c9   : > { %v3223_v9 = vpop.f32.mrb[46].mxu1  ;;  %3279 = vmatprep.subr.bf16.mxu0 %v3278_v5  ;;  %3286 = vmatprep.subr.bf16.mxu1 %v3278_v5 }
0x10ca   : > { %v2674_v11 = vpop.f32.mrb[47].mxu1  ;;  %3281 = vmatpush3.bf16.msra.mxu0 %v3278_v5  ;;  %3288 = vmatpush3.bf16.msra.mxu1 %v3278_v5 }
0x10cb   : > { %v3282_v7 = vpack.c.bf16 %v3223_v9, %v2674_v11 }
0x10cd   : > { %3283 = vmatprep.subr.bf16.mxu0 %v3282_v7  ;;  %3287 = vmatprep.subr.bf16.mxu1 %v3282_v7 }
0x10ce   : > { %3285 = vmatpush3.bf16.msra.mxu0 %v3282_v7  ;;  %3289 = vmatpush3.bf16.msra.mxu1 %v3282_v7 }
0x10d1   : > { %3233 = vmatmul.mubr.msk.f32.vlgmr.msra.gmra.mrb[42].mxu0 %vm2573_vm2, %v2684_v20  ;;  %3236 = vmatmul.mubr.msk.f32.vlgmr.msra.gmra.mrb[48].mxu1 %vm2573_vm2, %v2686_v61 }
0x11a4   : > { %v3234_v56 = vpop.f32.mrb[42].mxu0  ;;  %v3237_v23 = vpop.f32.mrb[48].mxu1 }
0x11a5   : > { %2785 = vst.msk [vmem:[%s698_s24 + $0x8] sm:$0xff] %vm2573_vm2, %v3234_v56  ;;  %2787 = vst.msk [vmem:[%s698_s24 + $0x18] sm:$0xff] %vm2573_vm2, %v3237_v23  ;;  %v2765_v14 = vpop.f32.mrb[43].mxu0  ;;  %v2775_v48 = vpop.f32.mrb[49].mxu1 }
0x11a6   : > { %2784 = vst.msk [vmem:[%s698_s24] sm:$0xff] %vm2573_vm2, %v2765_v14  ;;  %2786 = vst.msk [vmem:[%s698_s24 + $0x10] sm:$0xff] %vm2573_vm2, %v2775_v48 }
0x11a7 PF: > { %s33_s26 = sadd.s32 1, %s3460_s26  }
0x11a8   : > { %p30_p4 = scmp.ge.s32.totalorder %s33_s26, 4  }
0x11aa   :  { %32 = sbr.rel (!%p30_p4) target bundleno = 7 (0x7), region = 140 }

// kernel: tissue_cell_segformer_forward.3
= control target key start
LH: loop header
LB: loop body
LE: loop exit
PB: predicated region body
PF: predicated region fallthrough
CT: control target
= control target key end

     0   :  { %s3329_s27 = smov 0   ;;  %s4368_s0 = inlined_call_operand.vmem [shape: f32[2,64,256], index: 0, kind: input, shape index: {}]   ;;  %s4369_s1 = inlined_call_operand.vmem [shape: f32[256,64], index: 1, kind: input, shape index: {}]   ;;  %s4370_s2 = inlined_call_operand.vmem [shape: f32[1,64], index: 2, kind: input, shape index: {}]   ;;  %s4371_s3 = inlined_call_operand.vmem [shape: f32[4,64], index: 3, kind: input, shape index: {}]   ;;  %s4372_s4 = inlined_call_operand.vmem [shape: f32[4,64], index: 4, kind: input, shape index: {}]   ;;  %s4373_s5 = inlined_call_operand.vmem [shape: f32[64,192], index: 5, kind: input, shape index: {}]   ;;  %s4374_s6 = inlined_call_operand.vmem [shape: f32[1,192], index: 6, kind: input, shape index: {}]   ;;  %s4375_s7 = inlined_call_operand.vmem [shape: f32[64,64], index: 7, kind: input, shape index: {}]   ;;  %s4376_s8 = inlined_call_operand.vmem [shape: f32[1,64], index: 8, kind: input, shape index: {}]   ;;  %s4377_s9 = inlined_call_operand.vmem [shape: f32[64,128], index: 9, kind: input, shape index: {}]   ;;  %s4378_s10 = inlined_call_operand.vmem [shape: f32[1,128], index: 10, kind: input, shape index: {}]   ;;  %s4379_s11 = inlined_call_operand.vmem [shape: f32[128,64], index: 11, kind: input, shape index: {}]   ;;  %s4380_s12 = inlined_call_operand.vmem [shape: f32[1,64], index: 12, kind: input, shape index: {}]   ;;  %s4381_s13 = inlined_call_operand.vmem [shape: f32[64,128], index: 13, kind: input, shape index: {}]   ;;  %s4382_s14 = inlined_call_operand.vmem [shape: f32[1,128], index: 14, kind: input, shape index: {}]   ;;  %s4383_s15 = inlined_call_operand.vmem [shape: f32[3,128], index: 15, kind: input, shape index: {}]   ;;  %s4384_s16 = inlined_call_operand.vmem [shape: f32[3,1], index: 16, kind: input, shape index: {}]   ;;  %s4385_s17 = inlined_call_operand.vmem [shape: f32[64,1024], index: 17, kind: input, shape index: {}]   ;;  %s4386_s18 = inlined_call_operand.vmem [shape: f32[2,3,1024], index: 18, kind: output, shape index: {}]  }
   0x1   :  { %4389 = sst [smem:[#allocation3_spill]] %s4368_s0 }
   0x2   :  { %4390 = sst [smem:[#allocation4_spill]] %s4369_s1 }
   0x3   :  { %4391 = sst [smem:[#allocation5_spill]] %s4370_s2 }
   0x4 LB: > { %4392 = sst [smem:[#allocation2_spill]] %s3227_s27  ;;  %s2727_s28 = sadd.s32 4294967295, %s3227_s27   ;;  %s3227_s27 = sphi %s3329_s27, %s28_s27  }
   0x5   : > { %p2731_p0 = scmp.ge.s32.totalorder %s3227_s27, 1  ;;  %p512_p1 = scmp.lt.s32.totalorder %s3227_s27, 3 }
   0x7   : > { %p513_p2 = pnand %p2731_p0, %p512_p1 }
   0x8   : > { %s4393_s0 = sld [smem:[#allocation4_spill]] (!%p513_p2)  ;;  %p566_p3 = scmp.lt.s32.totalorder (!%p513_p2), %s2727_s28, 1  ;;  %vm784_vm0 = vcmask (!%p513_p2), 523264   ;;  %vm3232_vm1 = vmmov (!%p513_p2), 0  }
   0x9   : > { %516 = sbr.rel (%p513_p2) target bundleno = 4082 (0xff2), region = 92  ;;  %s4394_s2 = sld [smem:[#allocation3_spill]] (!%p513_p2) }
   0xa   : > { %s4395_s26 = sld [smem:[#allocation5_spill]] (!%p513_p2) }
   0xe   : > { %v609_v0 = vld [vmem:[%s4393_s0 + $0x80] sm:$0xff] (!%p513_p2)  ;;  %v610_v1 = vld [vmem:[%s4393_s0 + $0x88] sm:$0xff] (!%p513_p2)  ;;  %v611_v5 = vld [vmem:[%s4393_s0 + $0x90] sm:$0xff] (!%p513_p2) }
   0xf   : > { %v593_v2 = vld [vmem:[%s4393_s0] sm:$0xff] (!%p513_p2)  ;;  %v705_v3 = vpack.c.bf16 (!%p513_p2), %v610_v1, %v609_v0  ;;  %v594_v4 = vld [vmem:[%s4393_s0 + $0x8] sm:$0xff] (!%p513_p2)  ;;  %v612_v6 = vld [vmem:[%s4393_s0 + $0x98] sm:$0xff] (!%p513_p2) }
  0x10   : > { %v697_v7 = vpack.c.bf16 %v594_v4, %v593_v2  ;;  %v706_v8 = vpack.c.bf16 %v612_v6, %v611_v5  ;;  %v595_v9 = vld [vmem:[%s4393_s0 + $0x10] sm:$0xff]  ;;  %v596_v10 = vld [vmem:[%s4393_s0 + $0x18] sm:$0xff]  ;;  %v613_v11 = vld [vmem:[%s4393_s0 + $0xa0] sm:$0xff]  ;;  %s4398_s28 = smov (!%p566_p3, %s2727_s28), 1 }
  0x11   : > { %2773 = vmatprep.subr.bf16.mxu0 %v705_v3  ;;  %v614_v12 = vld [vmem:[%s4393_s0 + $0xa8] sm:$0xff]  ;;  %v698_v13 = vpack.c.bf16 %v596_v10, %v595_v9  ;;  %s2771_s23 = sshll.u32 %s4398_s28, 7  ;;  %v597_v15 = vld [vmem:[%s4393_s0 + $0x20] sm:$0xff]  ;;  %v615_v17 = vld [vmem:[%s4393_s0 + $0xb0] sm:$0xff]  ;;  %s2772_s19 = sshll.u32 %s4398_s28, 5 }
  0x12   : > { %2774 = vmatpush3.bf16.msra.mxu0 %v697_v7  ;;  %v707_v14 = vpack.c.bf16 %v614_v12, %v613_v11  ;;  %v598_v16 = vld [vmem:[%s4393_s0 + $0x28] sm:$0xff]  ;;  %v616_v18 = vld [vmem:[%s4393_s0 + $0xb8] sm:$0xff]  ;;  %s3385_s27 = scalar_lea.vmem %s4394_s2, %s2771_s23  ;;  %v599_v21 = vld [vmem:[%s4393_s0 + $0x30] sm:$0xff]  ;;  %s575_s20 = scalar_lea.vmem %s4386_s18, %s2772_s19 }
  0x13   : > { %2775 = vmatprep.subr.bf16.mxu0 %v706_v8  ;;  %v699_v19 = vpack.c.bf16 %v598_v16, %v597_v15  ;;  %v708_v20 = vpack.c.bf16 %v616_v18, %v615_v17  ;;  %v600_v22 = vld [vmem:[%s4393_s0 + $0x38] sm:$0xff]  ;;  %v617_v23 = vld [vmem:[%s4393_s0 + $0xc0] sm:$0xff]  ;;  %v618_v24 = vld [vmem:[%s4393_s0 + $0xc8] sm:$0xff] }
  0x14   : > { %v578_v25 = vld [vmem:[%s3385_s27 + $0x8] sm:$0xff]  ;;  %v580_v26 = vld [vmem:[%s3385_s27 + $0x18] sm:$0xff]  ;;  %v700_v27 = vpack.c.bf16 %v600_v22, %v599_v21  ;;  %v709_v29 = vpack.c.bf16 %v618_v24, %v617_v23  ;;  %v601_v30 = vld [vmem:[%s4393_s0 + $0x40] sm:$0xff] }
  0x15   : > { %v690_v28 = vpack.c.bf16 %v580_v26, %v578_v25  ;;  %v602_v31 = vld [vmem:[%s4393_s0 + $0x48] sm:$0xff]  ;;  %v619_v32 = vld [vmem:[%s4393_s0 + $0xd0] sm:$0xff]  ;;  %v620_v33 = vld [vmem:[%s4393_s0 + $0xd8] sm:$0xff] }
  0x16   : > { %2776 = vmatpush3.bf16.msra.mxu0 %v698_v13  ;;  %v701_v34 = vpack.c.bf16 %v602_v31, %v601_v30  ;;  %v710_v35 = vpack.c.bf16 %v620_v33, %v619_v32  ;;  %v603_v36 = vld [vmem:[%s4393_s0 + $0x50] sm:$0xff]  ;;  %v604_v37 = vld [vmem:[%s4393_s0 + $0x58] sm:$0xff]  ;;  %v621_v38 = vld [vmem:[%s4393_s0 + $0xe0] sm:$0xff] }
  0x17   : > { %2777 = vmatprep.subr.bf16.mxu0 %v707_v14  ;;  %751 = vmatprep.mubr.bf16.mxu0 %v690_v28  ;;  %v622_v39 = vld [vmem:[%s4393_s0 + $0xe8] sm:$0xff]  ;;  %v702_v40 = vpack.c.bf16 %v604_v37, %v603_v36  ;;  %v605_v42 = vld [vmem:[%s4393_s0 + $0x60] sm:$0xff]  ;;  %v623_v44 = vld [vmem:[%s4393_s0 + $0xf0] sm:$0xff] }
  0x18   : > { %v711_v41 = vpack.c.bf16 %v622_v39, %v621_v38  ;;  %v606_v43 = vld [vmem:[%s4393_s0 + $0x68] sm:$0xff]  ;;  %v624_v45 = vld [vmem:[%s4393_s0 + $0xf8] sm:$0xff]  ;;  %v607_v48 = vld [vmem:[%s4393_s0 + $0x70] sm:$0xff] }
  0x19   : > { %v703_v46 = vpack.c.bf16 %v606_v43, %v605_v42  ;;  %v712_v47 = vpack.c.bf16 %v624_v45, %v623_v44  ;;  %v608_v49 = vld [vmem:[%s4393_s0 + $0x78] sm:$0xff]  ;;  %v577_v51 = vld [vmem:[%s3385_s27] sm:$0xff]  ;;  %v579_v52 = vld [vmem:[%s3385_s27 + $0x10] sm:$0xff] }
  0x1a   : > { %2778 = vmatpush3.bf16.msra.mxu0 %v699_v19  ;;  %v704_v50 = vpack.c.bf16 %v608_v49, %v607_v48  ;;  %v582_v53 = vld [vmem:[%s3385_s27 + $0x28] sm:$0xff]  ;;  %v584_v54 = vld [vmem:[%s3385_s27 + $0x38] sm:$0xff]  ;;  %v689_v55 = vpack.c.bf16 %v579_v52, %v577_v51  ;;  %v581_v57 = vld [vmem:[%s3385_s27 + $0x20] sm:$0xff] }
  0x1b   : > { %2779 = vmatprep.subr.bf16.mxu0 %v708_v20  ;;  %v692_v56 = vpack.c.bf16 %v584_v54, %v582_v53  ;;  %v583_v58 = vld [vmem:[%s3385_s27 + $0x30] sm:$0xff]  ;;  %v586_v59 = vld [vmem:[%s3385_s27 + $0x48] sm:$0xff]  ;;  %v588_v60 = vld [vmem:[%s3385_s27 + $0x58] sm:$0xff] }
  0x1c   : > { %v691_v61 = vpack.c.bf16 %v583_v58, %v581_v57  ;;  %v694_v62 = vpack.c.bf16 %v588_v60, %v586_v59  ;;  %v585_v63 = vld [vmem:[%s3385_s27 + $0x40] sm:$0xff]  ;;  %v587_v0 = vld [vmem:[%s3385_s27 + $0x50] sm:$0xff]  ;;  %v590_v1 = vld [vmem:[%s3385_s27 + $0x68] sm:$0xff] }
  0x1d   : > { %v592_v2 = vld [vmem:[%s3385_s27 + $0x78] sm:$0xff]  ;;  %v693_v3 = vpack.c.bf16 %v587_v0, %v585_v63  ;;  %v589_v5 = vld [vmem:[%s3385_s27 + $0x60] sm:$0xff]  ;;  %v591_v6 = vld [vmem:[%s3385_s27 + $0x70] sm:$0xff] }
  0x1e   : > { %2780 = vmatpush3.bf16.msra.mxu0 %v700_v27  ;;  %v696_v4 = vpack.c.bf16 %v592_v2, %v590_v1  ;;  %v695_v7 = vpack.c.bf16 %v591_v6, %v589_v5  ;;  %v2736_v10 = vld [vmem:[%s4395_s26] ss:$0 sm:$0xff]  ;;  %s3230_s26 = smov 64  }
  0x1f   : > { %2781 = vmatprep.subr.bf16.mxu0 %v709_v29 }
  0x22   : > { %2782 = vmatpush3.bf16.msra.mxu0 %v701_v34 }
  0x23   : > { %2783 = vmatprep.subr.bf16.mxu0 %v710_v35 }
  0x26   : > { %2784 = vmatpush3.bf16.msra.mxu0 %v702_v40 }
  0x27   : > { %2785 = vmatprep.subr.bf16.mxu0 %v711_v41 }
  0x2a   : > { %2786 = vmatpush3.bf16.msra.mxu0 %v703_v46 }
  0x2b   : > { %2787 = vmatprep.subr.bf16.mxu0 %v712_v47 }
  0x2e   : > { %2788 = vmatpush3.bf16.msra.mxu0 %v704_v50 }
  0x31   : > { %752 = vmatmul.mubr.bf16.vlgmr.msra.gmra.mrb[0].mxu0 %v689_v55 }
  0x32   : > { %759 = vmatprep.mubr.bf16.mxu0 %v692_v56 }
  0x39   : > { %760 = vmatmul.mubr.bf16.gmra.mrb[4].mxu0 %v691_v61 }
  0x3a   : > { %767 = vmatprep.mubr.bf16.mxu0 %v694_v62 }
  0x41   : > { %768 = vmatmul.mubr.bf16.gmra.mrb[8].mxu0 %v693_v3 }
  0x42   : > { %775 = vmatprep.mubr.bf16.mxu0 %v696_v4 }
  0x49   : > { %776 = vmatmul.mubr.bf16.gmra.mrb[12].mxu0 %v695_v7 }
 0x104   : > { %v2789_v8 = vpop.f32.mrb[0].mxu0 }
 0x105   : > { %v2790_v9 = vpop.f32.mrb[1].mxu0 }
 0x106   : > { %v2791_v11 = vadd.f32 %v2790_v9, %v2789_v8  ;;  %v2792_v12 = vpop.f32.mrb[2].mxu0 }
 0x107   : > { %v2793_v13 = vpop.f32.mrb[3].mxu0 }
 0x108   : > { %v2794_v14 = vadd.f32 %v2793_v13, %v2792_v12  ;;  %v754_v15 = vadd.f32 %v2791_v11, %v2736_v10 }
 0x10a   : > { %v785_v16 = vsel %vm784_vm0, %v754_v15, 0.0  ;;  %v757_v17 = vadd.f32 %v2794_v14, %v2736_v10 }
 0x10b   : > { %786 = vadd.xlane.f32.xlu0 %v785_v16 }
 0x10c   : > { %v2795_v18 = vpop.f32.mrb[4].mxu0  ;;  %v788_v22 = vsel %vm784_vm0, %v757_v17, 0.0 }
 0x10d   : > { %v2796_v19 = vpop.f32.mrb[5].mxu0 }
 0x10e   : > { %v2797_v20 = vadd.f32 %v2796_v19, %v2795_v18  ;;  %v2798_v21 = vpop.f32.mrb[6].mxu0 }
 0x10f   : > { %v2799_v23 = vpop.f32.mrb[7].mxu0  ;;  %789 = vadd.xlane.f32.xlu0 %v788_v22 }
 0x110   : > { %v2800_v24 = vadd.f32 %v2799_v23, %v2798_v21  ;;  %v762_v25 = vadd.f32 %v2797_v20, %v2736_v10 }
 0x112   : > { %v791_v26 = vsel %vm784_vm0, %v762_v25, 0.0  ;;  %v765_v27 = vadd.f32 %v2800_v24, %v2736_v10 }
 0x113   : > { %792 = vadd.xlane.f32.xlu1 %v791_v26 }
 0x114   : > { %v2801_v28 = vpop.f32.mrb[8].mxu0  ;;  %v794_v32 = vsel %vm784_vm0, %v765_v27, 0.0 }
 0x115   : > { %v2802_v29 = vpop.f32.mrb[9].mxu0 }
 0x116   : > { %v2803_v30 = vadd.f32 %v2802_v29, %v2801_v28  ;;  %v2804_v31 = vpop.f32.mrb[10].mxu0 }
 0x117   : > { %v2805_v33 = vpop.f32.mrb[11].mxu0  ;;  %795 = vadd.xlane.f32.xlu1 %v794_v32 }
 0x118   : > { %v2806_v34 = vadd.f32 %v2805_v33, %v2804_v31  ;;  %v770_v35 = vadd.f32 %v2803_v30, %v2736_v10 }
 0x11a   : > { %v797_v36 = vsel %vm784_vm0, %v770_v35, 0.0  ;;  %v773_v37 = vadd.f32 %v2806_v34, %v2736_v10 }
 0x11b   : > { %798 = vadd.xlane.f32.xlu0 %v797_v36 }
 0x11c   : > { %v2807_v38 = vpop.f32.mrb[12].mxu0  ;;  %v800_v39 = vsel %vm784_vm0, %v773_v37, 0.0 }
 0x11d   : > { %v2808_v40 = vpop.f32.mrb[13].mxu0  ;;  %801 = vadd.xlane.f32.xlu1 %v800_v39 }
 0x11e   : > { %v2809_v41 = vadd.f32 %v2808_v40, %v2807_v38  ;;  %v2810_v42 = vpop.f32.mrb[14].mxu0  ;;  %v3521_v40 = vld [vmem:[%s4372_s4] sm:$0xf] }
 0x11f   : > { %v2811_v43 = vpop.f32.mrb[15].mxu0 }
 0x120   : > { %v2812_v44 = vadd.f32 %v2811_v43, %v2810_v42  ;;  %v778_v45 = vadd.f32 %v2809_v41, %v2736_v10 }
 0x122   : > { %v803_v46 = vsel %vm784_vm0, %v778_v45, 0.0  ;;  %v781_v47 = vadd.f32 %v2812_v44, %v2736_v10 }
 0x123   : > { %804 = vadd.xlane.f32.xlu0 %v803_v46 }
 0x124   : > { %v806_v48 = vsel %vm784_vm0, %v781_v47, 0.0 }
 0x125   : > { %807 = vadd.xlane.f32.xlu1 %v806_v48 }
 0x198   : > { %v787_v49 = vpop.xlane.xlu0 %786 }
 0x199   : > { %v810_v50 = vmul.f32 0.015625, %v787_v49 }
 0x19b   : > { %v3468_v51 = vsub.f32 %v754_v15, %v810_v50 }
 0x19c   : > { %v790_v52 = vpop.xlane.xlu0 %789 }
 0x19d   : > { %v811_v53 = vmul.f32 0.015625, %v790_v52  ;;  %v826_v54 = vmul.f32 %v3468_v51, %v3468_v51 }
 0x19f   : > { %v3472_v55 = vsub.f32 %v757_v17, %v811_v53  ;;  %v834_v56 = vsel %vm784_vm0, %v826_v54, 0.0 }
 0x1a0   : > { %v793_v57 = vpop.xlane.xlu1 %792  ;;  %835 = vadd.xlane.f32.xlu0 %v834_v56 }
 0x1a1   : > { %v812_v58 = vmul.f32 0.015625, %v793_v57  ;;  %v827_v59 = vmul.f32 %v3472_v55, %v3472_v55 }
 0x1a3   : > { %v3477_v60 = vsub.f32 %v762_v25, %v812_v58  ;;  %v837_v61 = vsel %vm784_vm0, %v827_v59, 0.0 }
 0x1a4   : > { %v796_v62 = vpop.xlane.xlu1 %795  ;;  %838 = vadd.xlane.f32.xlu1 %v837_v61 }
 0x1a5   : > { %v813_v63 = vmul.f32 0.015625, %v796_v62  ;;  %v828_v0 = vmul.f32 %v3477_v60, %v3477_v60 }
 0x1a7   : > { %v3482_v1 = vsub.f32 %v765_v27, %v813_v63  ;;  %v840_v2 = vsel %vm784_vm0, %v828_v0, 0.0  ;;  %v890_v27 = vlaneseq }
 0x1a8   : > { %841 = vadd.xlane.f32.xlu0 %v840_v2  ;;  %v799_v3 = vpop.xlane.xlu0 %798 }
 0x1a9   : > { %v814_v4 = vmul.f32 0.015625, %v799_v3  ;;  %v829_v5 = vmul.f32 %v3482_v1, %v3482_v1  ;;  %v3508_v31 = vshrl.u32 %v890_v27, 7 }
 0x1aa   : > { %v802_v6 = vpop.xlane.xlu1 %801 }
 0x1ab   : > { %v3487_v7 = vsub.f32 %v770_v35, %v814_v4  ;;  %v815_v8 = vmul.f32 0.015625, %v802_v6  ;;  %v843_v9 = vsel %vm784_vm0, %v829_v5, 0.0  ;;  %v3511_v35 = vsub.s32 0, %v3508_v31 }
 0x1ac   : > { %844 = vadd.xlane.f32.xlu1 %v843_v9 }
 0x1ad   : > { %v3490_v10 = vsub.f32 %v773_v37, %v815_v8  ;;  %v830_v11 = vmul.f32 %v3487_v7, %v3487_v7  ;;  %v3516_v37 = vld [vmem:[%s4371_s3] sm:$0xf]  ;;  %v905_v46 = vrot.slane %v3521_v40, %v3511_v35 }
 0x1ae   : > { %v893_v41 = vrot.slane %v3516_v37, %v3511_v35 }
 0x1af   : > { %v846_v12 = vsel %vm784_vm0, %v830_v11, 0.0  ;;  %v831_v13 = vmul.f32 %v3490_v10, %v3490_v10 }
 0x1b0   : > { %847 = vadd.xlane.f32.xlu0 %v846_v12  ;;  %v805_v14 = vpop.xlane.xlu0 %804 }
 0x1b1   : > { %v816_v15 = vmul.f32 0.015625, %v805_v14  ;;  %v849_v16 = vsel %vm784_vm0, %v831_v13, 0.0 }
 0x1b2   : > { %v808_v17 = vpop.xlane.xlu1 %807  ;;  %850 = vadd.xlane.f32.xlu1 %v849_v16 }
 0x1b3   : > { %v3498_v18 = vsub.f32 %v778_v45, %v816_v15  ;;  %v817_v19 = vmul.f32 0.015625, %v808_v17 }
 0x1b5   : > { %v3500_v20 = vsub.f32 %v781_v47, %v817_v19  ;;  %v832_v21 = vmul.f32 %v3498_v18, %v3498_v18 }
 0x1b7   : > { %v852_v22 = vsel %vm784_vm0, %v832_v21, 0.0  ;;  %v833_v23 = vmul.f32 %v3500_v20, %v3500_v20 }
 0x1b8   : > { %853 = vadd.xlane.f32.xlu0 %v852_v22 }
 0x1b9   : > { %v855_v24 = vsel %vm784_vm0, %v833_v23, 0.0 }
 0x1ba   : > { %856 = vadd.xlane.f32.xlu1 %v855_v24 }
 0x22d   : > { %v836_v25 = vpop.xlane.xlu0 %835 }
 0x22e   : > { %v858_v26 = vmul.f32 0.015625, %v836_v25 }
 0x230   : > { %v866_v28 = vadd.f32 1e-05, %v858_v26 }
 0x231   : > { %v839_v29 = vpop.xlane.xlu1 %838 }
 0x232   : > { %3091 = vrsqrt.f32 %v866_v28  ;;  %v859_v30 = vmul.f32 0.015625, %v839_v29 }
 0x234   : > { %v867_v32 = vadd.f32 1e-05, %v859_v30 }
 0x235   : > { %v842_v33 = vpop.xlane.xlu0 %841 }
 0x236   : > { %3093 = vrsqrt.f32 %v867_v32  ;;  %v860_v34 = vmul.f32 0.015625, %v842_v33 }
 0x238   : > { %v868_v36 = vadd.f32 1e-05, %v860_v34 }
 0x239   : > { %v845_v38 = vpop.xlane.xlu1 %844 }
 0x23a   : > { %3095 = vrsqrt.f32 %v868_v36  ;;  %v861_v39 = vmul.f32 0.015625, %v845_v38 }
 0x23c   : > { %v3092_v42 = vpop.eup %3091  ;;  %v869_v43 = vadd.f32 1e-05, %v861_v39 }
 0x23d   : > { %v848_v44 = vpop.xlane.xlu0 %847  ;;  %v882_v45 = vmul.f32 %v3092_v42, %v3468_v51 }
 0x23e   : > { %3097 = vrsqrt.f32 %v869_v43  ;;  %v862_v47 = vmul.f32 0.015625, %v848_v44 }
 0x23f   : > { %v851_v48 = vpop.xlane.xlu1 %850  ;;  %v894_v49 = vmul.f32 %v893_v41, %v882_v45 }
 0x240   : > { %v3094_v50 = vpop.eup %3093  ;;  %v870_v52 = vadd.f32 1e-05, %v862_v47  ;;  %v863_v53 = vmul.f32 0.015625, %v851_v48 }
 0x241   : > { %v3528_v54 = vadd.f32 %v905_v46, %v894_v49  ;;  %v883_v56 = vmul.f32 %v3094_v50, %v3472_v55 }
 0x242   : > { %3099 = vrsqrt.f32 %v870_v52  ;;  %v871_v57 = vadd.f32 1e-05, %v863_v53 }
 0x243   : > { %v914_v58 = vsel %vm784_vm0, %v3528_v54, 0.0  ;;  %v895_v51 = vmul.f32 %v893_v41, %v883_v56 }
 0x244   : > { %v3096_v59 = vpop.eup %3095  ;;  %3101 = vrsqrt.f32 %v871_v57  ;;  %915 = vadd.xlane.f32.xlu0 %v914_v58 }
 0x245   : > { %v854_v61 = vpop.xlane.xlu0 %853  ;;  %v3533_v62 = vadd.f32 %v905_v46, %v895_v51  ;;  %v884_v63 = vmul.f32 %v3096_v59, %v3477_v60 }
 0x246   : > { %v864_v0 = vmul.f32 0.015625, %v854_v61 }
 0x247   : > { %v857_v2 = vpop.xlane.xlu1 %856  ;;  %v917_v3 = vsel %vm784_vm0, %v3533_v62, 0.0  ;;  %v896_v55 = vmul.f32 %v893_v41, %v884_v63 }
 0x248   : > { %v3098_v4 = vpop.eup %3097  ;;  %v872_v5 = vadd.f32 1e-05, %v864_v0  ;;  %v865_v6 = vmul.f32 0.015625, %v857_v2  ;;  %918 = vadd.xlane.f32.xlu1 %v917_v3 }
 0x249   : > { %v3538_v8 = vadd.f32 %v905_v46, %v896_v55  ;;  %v885_v9 = vmul.f32 %v3098_v4, %v3482_v1 }
 0x24a   : > { %3103 = vrsqrt.f32 %v872_v5  ;;  %v873_v11 = vadd.f32 1e-05, %v865_v6 }
 0x24b   : > { %v920_v12 = vsel %vm784_vm0, %v3538_v8, 0.0  ;;  %v897_v60 = vmul.f32 %v893_v41, %v885_v9 }
 0x24c   : > { %v3100_v13 = vpop.eup %3099  ;;  %3105 = vrsqrt.f32 %v873_v11  ;;  %921 = vadd.xlane.f32.xlu0 %v920_v12 }
 0x24d   : > { %v3543_v14 = vadd.f32 %v905_v46, %v897_v60  ;;  %v886_v15 = vmul.f32 %v3100_v13, %v3487_v7 }
 0x24e   : > { %v3102_v16 = vpop.eup %3101 }
 0x24f   : > { %v923_v17 = vsel %vm784_vm0, %v3543_v14, 0.0  ;;  %v898_v19 = vmul.f32 %v893_v41, %v886_v15  ;;  %v887_v1 = vmul.f32 %v3102_v16, %v3490_v10  ;;  %v629_v16 = vld [vmem:[%s4373_s5 + $0x8] sm:$0xff] }
 0x250   : > { %924 = vadd.xlane.f32.xlu1 %v923_v17  ;;  %v631_v17 = vld [vmem:[%s4373_s5 + $0x18] sm:$0xff] }
 0x251   : > { %v3549_v21 = vadd.f32 %v905_v46, %v898_v19  ;;  %v899_v22 = vmul.f32 %v893_v41, %v887_v1 }
 0x253   : > { %v926_v23 = vsel %vm784_vm0, %v3549_v21, 0.0  ;;  %v3553_v24 = vadd.f32 %v905_v46, %v899_v22  ;;  %v1047_v22 = vpack.c.bf16 %v631_v17, %v629_v16 }
 0x254   : > { %v3104_v25 = vpop.eup %3103  ;;  %927 = vadd.xlane.f32.xlu0 %v926_v23  ;;  %v628_v23 = vld [vmem:[%s4373_s5] sm:$0xff] }
 0x255   : > { %v929_v7 = vsel %vm784_vm0, %v3553_v24, 0.0  ;;  %v888_v26 = vmul.f32 %v3104_v25, %v3498_v18  ;;  %v630_v25 = vld [vmem:[%s4373_s5 + $0x10] sm:$0xff]  ;;  %1077 = vmatprep.subr.bf16.mxu1 %v1047_v22 }
 0x256   : > { %v3106_v27 = vpop.eup %3105  ;;  %930 = vadd.xlane.f32.xlu1 %v929_v7  ;;  %v1046_v7 = vpack.c.bf16 %v630_v25, %v628_v23 }
 0x257   : > { %v900_v28 = vmul.f32 %v893_v41, %v888_v26  ;;  %v889_v10 = vmul.f32 %v3106_v27, %v3500_v20  ;;  %v633_v27 = vld [vmem:[%s4373_s5 + $0x28] sm:$0xff] }
 0x258   : > { %1078 = vmatpush1.bf16.msra.mxu1 %v1046_v7 }
 0x259   : > { %v3559_v29 = vadd.f32 %v905_v46, %v900_v28  ;;  %v901_v30 = vmul.f32 %v893_v41, %v889_v10  ;;  %v635_v28 = vld [vmem:[%s4373_s5 + $0x38] sm:$0xff] }
 0x25a   : > { %v1049_v10 = vpack.c.bf16 %v635_v28, %v633_v27 }
 0x25b   : > { %v932_v32 = vsel %vm784_vm0, %v3559_v29, 0.0  ;;  %v3563_v33 = vadd.f32 %v905_v46, %v901_v30  ;;  %v632_v30 = vld [vmem:[%s4373_s5 + $0x20] sm:$0xff] }
 0x25c   : > { %933 = vadd.xlane.f32.xlu0 %v932_v32  ;;  %v634_v32 = vld [vmem:[%s4373_s5 + $0x30] sm:$0xff]  ;;  %1079 = vmatprep.subr.bf16.mxu1 %v1049_v10 }
 0x25d   : > { %v935_v34 = vsel %vm784_vm0, %v3563_v33, 0.0 }
 0x25e   : > { %936 = vadd.xlane.f32.xlu1 %v935_v34  ;;  %v1048_v34 = vpack.c.bf16 %v634_v32, %v632_v30 }
 0x260   : > { %1080 = vmatpush1.bf16.msra.mxu1 %v1048_v34 }
 0x2d1   : > { %v916_v36 = vpop.xlane.xlu0 %915 }
 0x2d2   : > { %v938_v18 = vmul.f32 0.015625, %v916_v36  ;;  %v637_v36 = vld [vmem:[%s4373_s5 + $0x48] sm:$0xff] }
 0x2d4   : > { %v3568_v38 = vsub.f32 %v3528_v54, %v938_v18  ;;  %v639_v18 = vld [vmem:[%s4373_s5 + $0x58] sm:$0xff] }
 0x2d5   : > { %v919_v39 = vpop.xlane.xlu1 %918 }
 0x2d6   : > { %v939_v20 = vmul.f32 0.015625, %v919_v39  ;;  %v954_v41 = vmul.f32 %v3568_v38, %v3568_v38  ;;  %v1051_v39 = vpack.c.bf16 %v639_v18, %v637_v36 }
 0x2d8   : > { %v3573_v42 = vsub.f32 %v3533_v62, %v939_v20  ;;  %v962_v43 = vsel %vm784_vm0, %v954_v41, 0.0  ;;  %v636_v20 = vld [vmem:[%s4373_s5 + $0x40] sm:$0xff]  ;;  %v638_v41 = vld [vmem:[%s4373_s5 + $0x50] sm:$0xff]  ;;  %1081 = vmatprep.subr.bf16.mxu1 %v1051_v39 }
 0x2d9   : > { %963 = vadd.xlane.f32.xlu0 %v962_v43  ;;  %v922_v44 = vpop.xlane.xlu0 %921  ;;  %v1050_v43 = vpack.c.bf16 %v638_v41, %v636_v20 }
 0x2da   : > { %v940_v45 = vmul.f32 0.015625, %v922_v44  ;;  %v955_v46 = vmul.f32 %v3573_v42, %v3573_v42  ;;  %v641_v44 = vld [vmem:[%s4373_s5 + $0x68] sm:$0xff] }
 0x2db   : > { %1082 = vmatpush1.bf16.msra.mxu1 %v1050_v43 }
 0x2dc   : > { %v3579_v47 = vsub.f32 %v3538_v8, %v940_v45  ;;  %v965_v48 = vsel %vm784_vm0, %v955_v46, 0.0  ;;  %v643_v45 = vld [vmem:[%s4373_s5 + $0x78] sm:$0xff] }
 0x2dd   : > { %966 = vadd.xlane.f32.xlu1 %v965_v48  ;;  %v925_v49 = vpop.xlane.xlu1 %924  ;;  %v1053_v46 = vpack.c.bf16 %v643_v45, %v641_v44  ;;  %v640_v48 = vld [vmem:[%s4373_s5 + $0x60] sm:$0xff] }
 0x2de   : > { %v941_v50 = vmul.f32 0.015625, %v925_v49  ;;  %v956_v52 = vmul.f32 %v3579_v47, %v3579_v47  ;;  %v642_v49 = vld [vmem:[%s4373_s5 + $0x70] sm:$0xff] }
 0x2df   : > { %1083 = vmatprep.subr.bf16.mxu1 %v1053_v46 }
 0x2e0   : > { %v3585_v53 = vsub.f32 %v3543_v14, %v941_v50  ;;  %v968_v56 = vsel %vm784_vm0, %v956_v52, 0.0  ;;  %v1052_v50 = vpack.c.bf16 %v642_v49, %v640_v48  ;;  %v3229_v52 = vmov 0  }
 0x2e1   : > { %969 = vadd.xlane.f32.xlu0 %v968_v56  ;;  %v928_v57 = vpop.xlane.xlu0 %927  ;;  %1109 = vmatprep.mubr.bf16.mxu1 %v3229_v52 }
 0x2e2   : > { %v942_v58 = vmul.f32 0.015625, %v928_v57  ;;  %v957_v51 = vmul.f32 %v3585_v53, %v3585_v53  ;;  %1084 = vmatpush1.bf16.msra.mxu1 %v1052_v50  ;;  %3090 = vset.pattern.permute.xlu0 %v3229_v52 }
 0x2e3   : > { %v931_v59 = vpop.xlane.xlu1 %930 }
 0x2e4   : > { %v3591_v61 = vsub.f32 %v3549_v21, %v942_v58  ;;  %v943_v63 = vmul.f32 0.015625, %v931_v59  ;;  %v971_v0 = vsel %vm784_vm0, %v957_v51, 0.0 }
 0x2e5   : > { %972 = vadd.xlane.f32.xlu1 %v971_v0 }
 0x2e6   : > { %v3595_v2 = vsub.f32 %v3553_v24, %v943_v63  ;;  %v958_v3 = vmul.f32 %v3591_v61, %v3591_v61 }
 0x2e8   : > { %v974_v55 = vsel %vm784_vm0, %v958_v3, 0.0  ;;  %v959_v4 = vmul.f32 %v3595_v2, %v3595_v2 }
 0x2e9   : > { %975 = vadd.xlane.f32.xlu0 %v974_v55  ;;  %v934_v5 = vpop.xlane.xlu0 %933 }
 0x2ea   : > { %v944_v6 = vmul.f32 0.015625, %v934_v5  ;;  %v977_v9 = vsel %vm784_vm0, %v959_v4, 0.0  ;;  %v3666_v5 = vsub.s32 1, %v3508_v31 }
 0x2eb   : > { %978 = vadd.xlane.f32.xlu1 %v977_v9  ;;  %v937_v11 = vpop.xlane.xlu1 %936 }
 0x2ec   : > { %v3604_v12 = vsub.f32 %v3559_v29, %v944_v6  ;;  %v945_v60 = vmul.f32 0.015625, %v937_v11  ;;  %v1021_v16 = vrot.slane %v3516_v37, %v3666_v5 }
 0x2ee   : > { %v3607_v13 = vsub.f32 %v3563_v33, %v945_v60  ;;  %v960_v15 = vmul.f32 %v3604_v12, %v3604_v12 }
 0x2f0   : > { %v980_v19 = vsel %vm784_vm0, %v960_v15, 0.0  ;;  %v961_v1 = vmul.f32 %v3607_v13, %v3607_v13 }
 0x2f1   : > { %981 = vadd.xlane.f32.xlu0 %v980_v19 }
 0x2f2   : > { %v983_v26 = vsel %vm784_vm0, %v961_v1, 0.0 }
 0x2f3   : > { %984 = vadd.xlane.f32.xlu1 %v983_v26  ;;  %v1033_v26 = vrot.slane %v3521_v40, %v3666_v5 }
 0x366   : > { %v964_v56 = vpop.xlane.xlu0 %963 }
 0x367   : > { %v986_v57 = vmul.f32 0.015625, %v964_v56 }
 0x369   : > { %v994_v58 = vadd.f32 1e-05, %v986_v57 }
 0x36a   : > { %v967_v51 = vpop.xlane.xlu1 %966 }
 0x36b   : > { %3107 = vrsqrt.f32 %v994_v58  ;;  %v987_v59 = vmul.f32 0.015625, %v967_v51 }
 0x36d   : > { %v995_v63 = vadd.f32 1e-05, %v987_v59 }
 0x36e   : > { %v970_v0 = vpop.xlane.xlu0 %969 }
 0x36f   : > { %3109 = vrsqrt.f32 %v995_v63  ;;  %v988_v3 = vmul.f32 0.015625, %v970_v0 }
 0x371   : > { %v996_v55 = vadd.f32 1e-05, %v988_v3 }
 0x372   : > { %v973_v4 = vpop.xlane.xlu1 %972 }
 0x373   : > { %3111 = vrsqrt.f32 %v996_v55  ;;  %v989_v6 = vmul.f32 0.015625, %v973_v4 }
 0x375   : > { %v3108_v9 = vpop.eup %3107  ;;  %v997_v11 = vadd.f32 1e-05, %v989_v6 }
 0x376   : > { %v1010_v60 = vmul.f32 %v3108_v9, %v3568_v38  ;;  %v976_v15 = vpop.xlane.xlu0 %975 }
 0x377   : > { %3113 = vrsqrt.f32 %v997_v11  ;;  %v990_v17 = vmul.f32 0.015625, %v976_v15 }
 0x378   : > { %v979_v19 = vpop.xlane.xlu1 %978  ;;  %v1022_v7 = vmul.f32 %v1021_v16, %v1010_v60 }
 0x379   : > { %v3110_v1 = vpop.eup %3109  ;;  %v998_v22 = vadd.f32 1e-05, %v990_v17  ;;  %v991_v23 = vmul.f32 0.015625, %v979_v19 }
 0x37a   : > { %v1011_v25 = vmul.f32 %v3110_v1, %v3573_v42  ;;  %v1034_v30 = vadd.f32 %v1033_v26, %v1022_v7 }
 0x37b   : > { %3115 = vrsqrt.f32 %v998_v22  ;;  %v999_v27 = vadd.f32 1e-05, %v991_v23 }
 0x37c   : > { %v1023_v28 = vmul.f32 %v1021_v16, %v1011_v25 }
 0x37d   : > { %v3112_v38 = vpop.eup %3111  ;;  %3117 = vrsqrt.f32 %v999_v27 }
 0x37e   : > { %v1012_v10 = vmul.f32 %v3112_v38, %v3579_v47  ;;  %v982_v37 = vpop.xlane.xlu0 %981  ;;  %v1035_v32 = vadd.f32 %v1033_v26, %v1023_v28 }
 0x37f   : > { %v992_v34 = vmul.f32 0.015625, %v982_v37 }
 0x380   : > { %v985_v36 = vpop.xlane.xlu1 %984  ;;  %v1042_v18 = vpack.c.bf16 %v1035_v32, %v1034_v30  ;;  %v1024_v40 = vmul.f32 %v1021_v16, %v1012_v10 }
 0x381   : > { %v3114_v39 = vpop.eup %3113  ;;  %v1000_v20 = vadd.f32 1e-05, %v992_v34  ;;  %v993_v42 = vmul.f32 0.015625, %v985_v36 }
 0x382   : > { %v1013_v41 = vmul.f32 %v3114_v39, %v3585_v53  ;;  %2737 = vmatmul.mubr.msk.bf16.vlgmr.msra.gmra.mrb[0].mxu1 %vm784_vm0, %v1042_v18  ;;  %v1036_v46 = vadd.f32 %v1033_v26, %v1024_v40 }
 0x383   : > { %3119 = vrsqrt.f32 %v1000_v20  ;;  %v1001_v43 = vadd.f32 1e-05, %v993_v42  ;;  %1119 = vmatprep.mubr.bf16.mxu1 %v3229_v52 }
 0x384   : > { %v1025_v44 = vmul.f32 %v1021_v16, %v1013_v41 }
 0x385   : > { %v3116_v47 = vpop.eup %3115  ;;  %3121 = vrsqrt.f32 %v1001_v43 }
 0x386   : > { %v1014_v45 = vmul.f32 %v3116_v47, %v3591_v61  ;;  %v1037_v48 = vadd.f32 %v1033_v26, %v1025_v44 }
 0x387   : > { %v3118_v49 = vpop.eup %3117 }
 0x388   : > { %v1015_v50 = vmul.f32 %v3118_v49, %v3595_v2  ;;  %v1043_v56 = vpack.c.bf16 %v1037_v48, %v1036_v46  ;;  %v1026_v53 = vmul.f32 %v1021_v16, %v1014_v45 }
 0x38a   : > { %2738 = vmatmul.mubr.msk.bf16.gmra.mrb[4].mxu1 %vm784_vm0, %v1043_v56  ;;  %v1027_v57 = vmul.f32 %v1021_v16, %v1015_v50  ;;  %v1038_v63 = vadd.f32 %v1033_v26, %v1026_v53 }
 0x38b   : > { %1129 = vmatprep.mubr.bf16.mxu1 %v3229_v52 }
 0x38c   : > { %v1039_v58 = vadd.f32 %v1033_v26, %v1027_v57 }
 0x38d   : > { %v3120_v51 = vpop.eup %3119 }
 0x38e   : > { %v1016_v59 = vmul.f32 %v3120_v51, %v3604_v12  ;;  %v1044_v3 = vpack.c.bf16 %v1039_v58, %v1038_v63  ;;  %v644_v12 = vld [vmem:[%s4374_s6] sm:$0x3] }
 0x38f   : > { %v3122_v0 = vpop.eup %3121  ;;  %v1058_v11 = vrot.slane %v644_v12, %v3511_v35 }
 0x390   : > { %v1017_v61 = vmul.f32 %v3122_v0, %v3607_v13  ;;  %v1028_v55 = vmul.f32 %v1021_v16, %v1016_v59  ;;  %v1062_v13 = vrot.slane %v644_v12, %v3666_v5 }
 0x392   : > { %2739 = vmatmul.mubr.msk.bf16.gmra.mrb[8].mxu1 %vm784_vm0, %v1044_v3  ;;  %v1029_v2 = vmul.f32 %v1021_v16, %v1017_v61  ;;  %v1040_v6 = vadd.f32 %v1033_v26, %v1028_v55 }
 0x393   : > { %1139 = vmatprep.mubr.bf16.mxu1 %v3229_v52 }
 0x394   : > { %v1041_v4 = vadd.f32 %v1033_v26, %v1029_v2 }
 0x396   : > { %v1045_v9 = vpack.c.bf16 %v1041_v4, %v1040_v6 }
 0x39a   : > { %2740 = vmatmul.mubr.msk.bf16.gmra.mrb[12].mxu1 %vm784_vm0, %v1045_v9 }
 0x455   : > { %v1111_v60 = vpop.f32.mrb[0].mxu1 }
 0x456   : > { %v1113_v15 = vpop.f32.mrb[1].mxu1  ;;  %v1112_v19 = vadd.f32 %v1111_v60, %v1058_v11 }
 0x457   : > { %v1115_v17 = vpop.f32.mrb[2].mxu1  ;;  %v1114_v52 = vadd.f32 %v1113_v15, %v1062_v13 }
 0x458   : > { %v1116_v16 = vadd.f32 %v1115_v17, %v1058_v11  ;;  %v1117_v1 = vpop.f32.mrb[3].mxu1 }
 0x459   : > { %v1118_v22 = vadd.f32 %v1117_v1, %v1062_v13 }
 0x45a   : > { %v1150_v23 = vpack.c.bf16 %v1116_v16, %v1112_v19 }
 0x45b   : > { %v1355_v25 = vpack.c.bf16 %v1118_v22, %v1114_v52 }
 0x45c   : > { %1158 = vrot.lane.b32.xlu0 %v1150_v23, %s3230_s26  ;;  %2882 = vmatprep.mubr.msk.bf16.mxu1 %vm784_vm0, %v1150_v23 }
 0x45d   : > { %v1121_v7 = vpop.f32.mrb[4].mxu1  ;;  %2890 = vmatprep.subr.bf16.mxu0 %v1355_v25 }
 0x45e   : > { %v1123_v35 = vpop.f32.mrb[5].mxu1  ;;  %2891 = vmatpush3.bf16.msra.mxu0 %v1355_v25  ;;  %v1122_v5 = vadd.f32 %v1121_v7, %v1058_v11 }
 0x45f   : > { %v1125_v26 = vpop.f32.mrb[6].mxu1  ;;  %v1124_v38 = vadd.f32 %v1123_v35, %v1062_v13 }
 0x460   : > { %v1126_v27 = vadd.f32 %v1125_v26, %v1058_v11  ;;  %v1127_v28 = vpop.f32.mrb[7].mxu1 }
 0x461   : > { %v1128_v10 = vadd.f32 %v1127_v28, %v1062_v13 }
 0x462   : > { %v1151_v37 = vpack.c.bf16 %v1126_v27, %v1122_v5 }
 0x463   : > { %v1356_v30 = vpack.c.bf16 %v1128_v10, %v1124_v38 }
 0x464   : > { %1160 = vrot.lane.b32.xlu1 %v1151_v37, %s3230_s26 }
 0x465   : > { %v1131_v32 = vpop.f32.mrb[8].mxu1  ;;  %2892 = vmatprep.subr.bf16.mxu0 %v1356_v30 }
 0x466   : > { %v1133_v34 = vpop.f32.mrb[9].mxu1  ;;  %2893 = vmatpush3.bf16.msra.mxu0 %v1356_v30  ;;  %v1132_v18 = vadd.f32 %v1131_v32, %v1058_v11 }
 0x467   : > { %v1135_v36 = vpop.f32.mrb[10].mxu1  ;;  %v1134_v42 = vadd.f32 %v1133_v34, %v1062_v13 }
 0x468   : > { %v1136_v39 = vadd.f32 %v1135_v36, %v1058_v11  ;;  %v1137_v20 = vpop.f32.mrb[11].mxu1 }
 0x469   : > { %v1138_v41 = vadd.f32 %v1137_v20, %v1062_v13 }
 0x46a   : > { %v1152_v40 = vpack.c.bf16 %v1136_v39, %v1132_v18 }
 0x46b   : > { %v1357_v43 = vpack.c.bf16 %v1138_v41, %v1134_v42 }
 0x46c   : > { %1162 = vrot.lane.b32.xlu1 %v1152_v40, %s3230_s26 }
 0x46d   : > { %v1141_v44 = vpop.f32.mrb[12].mxu1  ;;  %2894 = vmatprep.subr.bf16.mxu0 %v1357_v43 }
 0x46e   : > { %v1143_v47 = vpop.f32.mrb[13].mxu1  ;;  %2895 = vmatpush3.bf16.msra.mxu0 %v1357_v43  ;;  %v1142_v46 = vadd.f32 %v1141_v44, %v1058_v11 }
 0x46f   : > { %v1145_v45 = vpop.f32.mrb[14].mxu1  ;;  %v1144_v50 = vadd.f32 %v1143_v47, %v1062_v13 }
 0x470   : > { %v1146_v48 = vadd.f32 %v1145_v45, %v1058_v11  ;;  %v1147_v49 = vpop.f32.mrb[15].mxu1 }
 0x471   : > { %v1148_v56 = vadd.f32 %v1147_v49, %v1062_v13 }
 0x472   : > { %v1153_v53 = vpack.c.bf16 %v1146_v48, %v1142_v46 }
 0x473   : > { %v1358_v57 = vpack.c.bf16 %v1148_v56, %v1144_v50 }
 0x474   : > { %1164 = vrot.lane.b32.xlu1 %v1153_v53, %s3230_s26 }
 0x475   : > { %2896 = vmatprep.subr.bf16.mxu0 %v1358_v57 }
 0x476   : > { %2897 = vmatpush3.bf16.msra.mxu0 %v1358_v57 }
 0x4ce   : > { %v1159_v58 = vpop.permute.xlu0 %1158 }
 0x4cf   : > { %v1179_v51 = vsel %vm784_vm0, %v1159_v58, 0  ;;  %3073 = vmatprep.subr.msk.bf16.mxu1 %vm784_vm0, %v1159_v58 }
 0x4d0   : > { %2875 = vmatpush3.bf16.xpose.msra.mxu1 %v1179_v51 }
 0x4d6   : > { %v1161_v59 = vpop.permute.xlu1 %1160 }
 0x4d7   : > { %v1182_v63 = vsel %vm784_vm0, %v1161_v59, 0  ;;  %3074 = vmatprep.subr.msk.bf16.mxu1 %vm784_vm0, %v1161_v59 }
 0x4d8   : > { %2877 = vmatpush3.bf16.xpose.msra.mxu1 %v1182_v63 }
 0x4de   : > { %v1163_v0 = vpop.permute.xlu1 %1162 }
 0x4df   : > { %v1185_v61 = vsel %vm784_vm0, %v1163_v0, 0  ;;  %3075 = vmatprep.subr.msk.bf16.mxu1 %vm784_vm0, %v1163_v0 }
 0x4e0   : > { %2879 = vmatpush3.bf16.xpose.msra.mxu1 %v1185_v61 }
 0x4e6   : > { %v1165_v3 = vpop.permute.xlu1 %1164 }
 0x4e7   : > { %v1188_v55 = vsel %vm784_vm0, %v1165_v3, 0  ;;  %3076 = vmatprep.subr.msk.bf16.mxu1 %vm784_vm0, %v1165_v3 }
 0x4e8   : > { %2881 = vmatpush3.bf16.xpose.msra.mxu1 %v1188_v55 }
 0x4ef   : > { %2883 = vmatmul.mubr.msk.bf16.vlgmr.msra.gmra.mrb[16].mxu1 %vm784_vm0, %v1151_v37 }
 0x4f0   : > { %2886 = vmatprep.mubr.msk.bf16.mxu1 %vm784_vm0, %v1152_v40 }
 0x4f7   : > { %2887 = vmatmul.mubr.msk.bf16.gmra.mrb[20].mxu1 %vm784_vm0, %v1153_v53 }
 0x5c2   : > { %v2884_v2 = vpop.f32.mrb[16].mxu1 }
 0x5c3   : > { %v1224_v4 = vpop.f32.mrb[17].mxu1  ;;  %v1257_v11 = vmul.f32 0.125, %v2884_v2 }
 0x5c4   : > { %v1255_v6 = vmul.f32 0.125, %v1224_v4  ;;  %v2885_v9 = vpop.f32.mrb[18].mxu1 }
 0x5c5   : > { %v1227_v12 = vpop.f32.mrb[19].mxu1  ;;  %v1258_v17 = vmul.f32 0.125, %v2885_v9  ;;  %v1269_v16 = vsel %vm784_vm0, %v1257_v11, -inf }
 0x5c6   : > { %v1256_v60 = vmul.f32 0.125, %v1227_v12  ;;  %v1263_v13 = vsel %vm784_vm0, %v1255_v6, -inf }
 0x5c7   : > { %1264 = vmax.xlane.f32.xlu0 %v1263_v13  ;;  %v1272_v7 = vsel %vm784_vm0, %v1258_v17, -inf }
 0x5c8   : > { %v1266_v15 = vsel %vm784_vm0, %v1256_v60, -inf }
 0x5c9   : > { %1267 = vmax.xlane.f32.xlu1 %v1266_v15 }
 0x5ca   : > { %v2888_v19 = vpop.f32.mrb[20].mxu1 }
 0x5cb   : > { %1270 = vmax.xlane.f32.xlu0 %v1269_v16  ;;  %v1240_v1 = vpop.f32.mrb[21].mxu1  ;;  %v1261_v5 = vmul.f32 0.125, %v2888_v19  ;;  %v646_v19 = vld [vmem:[%s4375_s7 + $0x8] sm:$0xff]  ;;  %v647_v16 = vld [vmem:[%s4375_s7 + $0x10] sm:$0xff] }
 0x5cc   : > { %v2889_v52 = vpop.f32.mrb[22].mxu1  ;;  %v1259_v23 = vmul.f32 0.125, %v1240_v1 }
 0x5cd   : > { %v1243_v22 = vpop.f32.mrb[23].mxu1  ;;  %v1262_v35 = vmul.f32 0.125, %v2889_v52  ;;  %v1281_v38 = vsel %vm784_vm0, %v1261_v5, -inf  ;;  %v648_v52 = vld [vmem:[%s4375_s7 + $0x18] sm:$0xff] }
 0x5ce   : > { %v1260_v25 = vmul.f32 0.125, %v1243_v22  ;;  %v1275_v27 = vsel %vm784_vm0, %v1259_v23, -inf  ;;  %v1441_v22 = vpack.c.bf16 %v648_v52, %v647_v16 }
 0x5cf   : > { %1273 = vmax.xlane.f32.xlu0 %v1272_v7  ;;  %v1284_v28 = vsel %vm784_vm0, %v1262_v35, -inf }
 0x5d0   : > { %v1278_v26 = vsel %vm784_vm0, %v1260_v25, -inf }
 0x5d1   : > { %1279 = vmax.xlane.f32.xlu1 %v1278_v26 }
 0x5d3   : > { %1276 = vmax.xlane.f32.xlu0 %v1275_v27 }
 0x5d5   : > { %1285 = vmax.xlane.f32.xlu1 %v1284_v28 }
 0x5d7   : > { %1282 = vmax.xlane.f32.xlu0 %v1281_v38 }
 0x654   : > { %v1265_v10 = vpop.xlane.xlu0 %1264 }
 0x655   : > { %v1287_v37 = vsub.f32 %v1255_v6, %v1265_v10 }
 0x656   : > { %v1268_v30 = vpop.xlane.xlu1 %1267 }
 0x657   : > { %v1295_v32 = vmul.f32 1.442695, %v1287_v37  ;;  %v1288_v34 = vsub.f32 %v1256_v60, %v1268_v30 }
 0x658   : > { %v1271_v36 = vpop.xlane.xlu0 %1270 }
 0x659   : > { %3123 = vpow2.f32 %v1295_v32  ;;  %v1297_v18 = vmul.f32 1.442695, %v1288_v34  ;;  %v1289_v39 = vsub.f32 %v1257_v11, %v1271_v36 }
 0x65b   : > { %3125 = vpow2.f32 %v1297_v18  ;;  %v1299_v20 = vmul.f32 1.442695, %v1289_v39 }
 0x65c   : > { %v1274_v42 = vpop.xlane.xlu0 %1273 }
 0x65d   : > { %3127 = vpow2.f32 %v1299_v20  ;;  %v1290_v41 = vsub.f32 %v1258_v17, %v1274_v42  ;;  %v645_v17 = vld [vmem:[%s4375_s7] sm:$0xff] }
 0x65e   : > { %v1280_v40 = vpop.xlane.xlu1 %1279  ;;  %v1440_v1 = vpack.c.bf16 %v646_v19, %v645_v17 }
 0x65f   : > { %v1301_v43 = vmul.f32 1.442695, %v1290_v41  ;;  %v1292_v44 = vsub.f32 %v1260_v25, %v1280_v40  ;;  %v650_v25 = vld [vmem:[%s4375_s7 + $0x28] sm:$0xff] }
 0x660   : > { %v1277_v47 = vpop.xlane.xlu0 %1276  ;;  %2906 = vmatprep.subr.bf16.mxu1 %v1440_v1 }
 0x661   : > { %3129 = vpow2.f32 %v1301_v43  ;;  %v1305_v45 = vmul.f32 1.442695, %v1292_v44  ;;  %v1291_v46 = vsub.f32 %v1259_v23, %v1277_v47  ;;  %v649_v23 = vld [vmem:[%s4375_s7 + $0x20] sm:$0xff]  ;;  %2907 = vmatpush3.bf16.msra.mxu1 %v1440_v1 }
 0x662   : > { %v1286_v48 = vpop.xlane.xlu1 %1285  ;;  %2908 = vmatprep.subr.bf16.mxu1 %v1441_v22  ;;  %v1442_v7 = vpack.c.bf16 %v650_v25, %v649_v23 }
 0x663   : > { %v3716_v49 = vpop.eup %3123  ;;  %3131 = vpow2.f32 %v1305_v45  ;;  %v1303_v50 = vmul.f32 1.442695, %v1291_v46  ;;  %v1294_v56 = vsub.f32 %v1262_v35, %v1286_v48 }
 0x664   : > { %v1283_v53 = vpop.xlane.xlu0 %1282  ;;  %v1311_v57 = vsel %vm784_vm0, %v3716_v49, 0.0 }
 0x665   : > { %v3126_v58 = vpop.eup %3125  ;;  %3133 = vpow2.f32 %v1303_v50  ;;  %v1309_v51 = vmul.f32 1.442695, %v1294_v56  ;;  %v1293_v59 = vsub.f32 %v1261_v5, %v1283_v53  ;;  %1312 = vadd.xlane.f32.xlu0 %v1311_v57  ;;  %2909 = vmatpush3.bf16.msra.mxu1 %v1441_v22  ;;  %v651_v57 = vld [vmem:[%s4375_s7 + $0x30] sm:$0xff] }
 0x666   : > { %v1314_v63 = vsel %vm784_vm0, %v3126_v58, 0.0  ;;  %2910 = vmatprep.subr.bf16.mxu1 %v1442_v7 }
 0x667   : > { %v3128_v0 = vpop.eup %3127  ;;  %3135 = vpow2.f32 %v1309_v51  ;;  %v1307_v61 = vmul.f32 1.442695, %v1293_v59  ;;  %1315 = vadd.xlane.f32.xlu1 %v1314_v63 }
 0x668   : > { %v1317_v3 = vsel %vm784_vm0, %v3128_v0, 0.0 }
 0x669   : > { %3137 = vpow2.f32 %v1307_v61  ;;  %1318 = vadd.xlane.f32.xlu0 %v1317_v3  ;;  %2911 = vmatpush3.bf16.msra.mxu1 %v1442_v7 }
 0x66b   : > { %v3130_v55 = vpop.eup %3129 }
 0x66c   : > { %v1320_v2 = vsel %vm784_vm0, %v3130_v55, 0.0 }
 0x66d   : > { %v3132_v4 = vpop.eup %3131  ;;  %1321 = vadd.xlane.f32.xlu1 %v1320_v2 }
 0x66e   : > { %v1326_v12 = vsel %vm784_vm0, %v3132_v4, 0.0 }
 0x66f   : > { %v3134_v6 = vpop.eup %3133 }
 0x670   : > { %v1323_v9 = vsel %vm784_vm0, %v3134_v6, 0.0 }
 0x671   : > { %v3136_v11 = vpop.eup %3135  ;;  %1324 = vadd.xlane.f32.xlu0 %v1323_v9  ;;  %1327 = vadd.xlane.f32.xlu1 %v1326_v12 }
 0x672   : > { %v1332_v15 = vsel %vm784_vm0, %v3136_v11, 0.0 }
 0x673   : > { %v3138_v60 = vpop.eup %3137 }
 0x674   : > { %v1329_v13 = vsel %vm784_vm0, %v3138_v60, 0.0 }
 0x675   : > { %1330 = vadd.xlane.f32.xlu0 %v1329_v13  ;;  %1333 = vadd.xlane.f32.xlu1 %v1332_v15  ;;  %v2753_v13 = vld [vmem:[%s4376_s8] ss:$0 sm:$0xff] }
 0x6f2   : > { %v1313_v35 = vpop.xlane.xlu0 %1312 }
 0x6f3   : > { %3139 = vrcp.f32 %v1313_v35 }
 0x6f4   : > { %v1316_v26 = vpop.xlane.xlu1 %1315 }
 0x6f5   : > { %3141 = vrcp.f32 %v1316_v26 }
 0x6f6   : > { %v1319_v5 = vpop.xlane.xlu0 %1318 }
 0x6f7   : > { %3143 = vrcp.f32 %v1319_v5 }
 0x6fa   : > { %v1322_v27 = vpop.xlane.xlu1 %1321 }
 0x6fb   : > { %3145 = vrcp.f32 %v1322_v27 }
 0x6fd   : > { %v3140_v28 = vpop.eup %3139 }
 0x6fe   : > { %v1325_v38 = vpop.xlane.xlu0 %1324  ;;  %v1328_v10 = vpop.xlane.xlu1 %1327  ;;  %v1336_v30 = vmul.f32 %v3140_v28, %v3716_v49 }
 0x6ff   : > { %v3142_v37 = vpop.eup %3141  ;;  %3147 = vrcp.f32 %v1325_v38 }
 0x700   : > { %3149 = vrcp.f32 %v1328_v10  ;;  %v1338_v32 = vmul.f32 %v3142_v37, %v3126_v58  ;;  %v652_v58 = vld [vmem:[%s4375_s7 + $0x38] sm:$0xff] }
 0x701   : > { %v3144_v39 = vpop.eup %3143  ;;  %v1443_v51 = vpack.c.bf16 %v652_v58, %v651_v57 }
 0x702   : > { %v1331_v34 = vpop.xlane.xlu0 %1330  ;;  %v1334_v36 = vpop.xlane.xlu1 %1333  ;;  %v1351_v18 = vpack.c.bf16 %v1338_v32, %v1336_v30  ;;  %v1340_v42 = vmul.f32 %v3144_v39, %v3128_v0 }
 0x703   : > { %3151 = vrcp.f32 %v1331_v34  ;;  %2912 = vmatprep.subr.bf16.mxu1 %v1443_v51 }
 0x704   : > { %3153 = vrcp.f32 %v1334_v36  ;;  %2898 = vmatprep.mubr.msk.bf16.mxu0 %vm784_vm0, %v1351_v18  ;;  %2913 = vmatpush3.bf16.msra.mxu1 %v1443_v51 }
 0x705   : > { %v3146_v20 = vpop.eup %3145 }
 0x706   : > { %v1342_v41 = vmul.f32 %v3146_v20, %v3130_v55 }
 0x708   : > { %v1352_v40 = vpack.c.bf16 %v1342_v41, %v1340_v42 }
 0x709   : > { %v3148_v43 = vpop.eup %3147 }
 0x70a   : > { %v3150_v44 = vpop.eup %3149  ;;  %2899 = vmatmul.mubr.msk.bf16.vlgmr.msra.gmra.mrb[16].mxu0 %vm784_vm0, %v1352_v40  ;;  %v1344_v47 = vmul.f32 %v3148_v43, %v3134_v6 }
 0x70b   : > { %v1346_v45 = vmul.f32 %v3150_v44, %v3132_v4 }
 0x70d   : > { %v3152_v46 = vpop.eup %3151  ;;  %v1353_v48 = vpack.c.bf16 %v1346_v45, %v1344_v47 }
 0x70e   : > { %v3154_v49 = vpop.eup %3153  ;;  %v1348_v50 = vmul.f32 %v3152_v46, %v3138_v60 }
 0x70f   : > { %2902 = vmatprep.mubr.msk.bf16.mxu0 %vm784_vm0, %v1353_v48  ;;  %v1350_v56 = vmul.f32 %v3154_v49, %v3136_v11 }
 0x711   : > { %v1354_v53 = vpack.c.bf16 %v1350_v56, %v1348_v50 }
 0x713   : > { %2903 = vmatmul.mubr.msk.bf16.gmra.mrb[20].mxu0 %vm784_vm0, %v1354_v53 }
 0x7dd   : > { %v2900_v59 = vpop.f32.mrb[16].mxu0 }
 0x7de   : > { %v1405_v63 = vpop.f32.mrb[17].mxu0 }
 0x7df   : > { %v2901_v0 = vpop.f32.mrb[18].mxu0 }
 0x7e0   : > { %v1437_v61 = vpack.c.bf16 %v2901_v0, %v2900_v59  ;;  %v1408_v3 = vpop.f32.mrb[19].mxu0 }
 0x7e1   : > { %v1436_v55 = vpack.c.bf16 %v1408_v3, %v1405_v63 }
 0x7e3   : > { %2914 = vmatprep.mubr.msk.bf16.mxu1 %vm784_vm0, %v1436_v55 }
 0x7e4   : > { %2915 = vmatmul.mubr.msk.bf16.vlgmr.msra.gmra.mrb[24].mxu1 %vm784_vm0, %v1437_v61 }
 0x7e6   : > { %v2904_v2 = vpop.f32.mrb[20].mxu0 }
 0x7e7   : > { %v1421_v4 = vpop.f32.mrb[21].mxu0 }
 0x7e8   : > { %v2905_v6 = vpop.f32.mrb[22].mxu0 }
 0x7e9   : > { %v1439_v9 = vpack.c.bf16 %v2905_v6, %v2904_v2  ;;  %v1424_v12 = vpop.f32.mrb[23].mxu0 }
 0x7ea   : > { %v1438_v11 = vpack.c.bf16 %v1424_v12, %v1421_v4 }
 0x7ec   : > { %2918 = vmatprep.mubr.msk.bf16.mxu1 %vm784_vm0, %v1438_v11 }
 0x7ed   : > { %2919 = vmatmul.mubr.msk.bf16.gmra.mrb[28].mxu1 %vm784_vm0, %v1439_v9 }
 0x8b7   : > { %v2916_v60 = vpop.f32.mrb[24].mxu1 }
 0x8b8   : > { %v1490_v15 = vpop.f32.mrb[25].mxu1  ;;  %v1523_v17 = vadd.f32 %v2916_v60, %v3538_v8 }
 0x8b9   : > { %v1521_v19 = vadd.f32 %v1490_v15, %v3528_v54  ;;  %v2917_v16 = vpop.f32.mrb[26].mxu1 }
 0x8ba   : > { %v1493_v1 = vpop.f32.mrb[27].mxu1  ;;  %v1524_v22 = vadd.f32 %v2917_v16, %v3543_v14  ;;  %v3769_v25 = vadd.f32 %v2753_v13, %v1523_v17 }
 0x8bb   : > { %v3765_v52 = vadd.f32 %v2753_v13, %v1521_v19  ;;  %v1522_v23 = vadd.f32 %v1493_v1, %v3533_v62 }
 0x8bc   : > { %v3775_v26 = vadd.f32 %v2753_v13, %v1524_v22  ;;  %v1549_v14 = vsel %vm784_vm0, %v3769_v25, 0.0 }
 0x8bd   : > { %v3771_v7 = vadd.f32 %v2753_v13, %v1522_v23  ;;  %v1543_v35 = vsel %vm784_vm0, %v3765_v52, 0.0 }
 0x8be   : > { %1544 = vadd.xlane.f32.xlu0 %v1543_v35  ;;  %v1552_v10 = vsel %vm784_vm0, %v3775_v26, 0.0 }
 0x8bf   : > { %v1546_v54 = vsel %vm784_vm0, %v3771_v7, 0.0 }
 0x8c0   : > { %v2920_v8 = vpop.f32.mrb[28].mxu1  ;;  %1547 = vadd.xlane.f32.xlu1 %v1546_v54  ;;  %v654_v54 = vld [vmem:[%s4377_s9] sm:$0xff] }
 0x8c1   : > { %v1506_v5 = vpop.f32.mrb[29].mxu1  ;;  %v1527_v62 = vadd.f32 %v2920_v8, %v3559_v29  ;;  %v655_v8 = vld [vmem:[%s4377_s9 + $0x8] sm:$0xff] }
 0x8c2   : > { %v1525_v27 = vadd.f32 %v1506_v5, %v3549_v21  ;;  %v2921_v28 = vpop.f32.mrb[30].mxu1  ;;  %1550 = vadd.xlane.f32.xlu0 %v1549_v14  ;;  %v1675_v5 = vpack.c.bf16 %v655_v8, %v654_v54  ;;  %v656_v14 = vld [vmem:[%s4377_s9 + $0x10] sm:$0xff] }
 0x8c3   : > { %v1509_v38 = vpop.f32.mrb[31].mxu1  ;;  %v1528_v30 = vadd.f32 %v2921_v28, %v3563_v33  ;;  %v3789_v34 = vadd.f32 %v2753_v13, %v1527_v62  ;;  %v657_v62 = vld [vmem:[%s4377_s9 + $0x18] sm:$0xff]  ;;  %v658_v28 = vld [vmem:[%s4377_s9 + $0x20] sm:$0xff] }
 0x8c4   : > { %v3785_v37 = vadd.f32 %v2753_v13, %v1525_v27  ;;  %v1526_v32 = vadd.f32 %v1509_v38, %v3553_v24  ;;  %1553 = vadd.xlane.f32.xlu1 %v1552_v10  ;;  %2922 = vmatprep.subr.bf16.mxu0 %v1675_v5  ;;  %v1676_v27 = vpack.c.bf16 %v657_v62, %v656_v14  ;;  %v659_v38 = vld [vmem:[%s4377_s9 + $0x28] sm:$0xff] }
 0x8c5   : > { %v3795_v29 = vadd.f32 %v2753_v13, %v1528_v30  ;;  %v1561_v33 = vsel %vm784_vm0, %v3789_v34, 0.0  ;;  %2923 = vmatpush3.bf16.msra.mxu0 %v1675_v5  ;;  %v1677_v10 = vpack.c.bf16 %v659_v38, %v658_v28  ;;  %v660_v30 = vld [vmem:[%s4377_s9 + $0x30] sm:$0xff] }
 0x8c6   : > { %v3791_v36 = vadd.f32 %v2753_v13, %v1526_v32  ;;  %v1555_v21 = vsel %vm784_vm0, %v3785_v37, 0.0  ;;  %2924 = vmatprep.subr.bf16.mxu0 %v1676_v27  ;;  %v661_v32 = vld [vmem:[%s4377_s9 + $0x38] sm:$0xff] }
 0x8c7   : > { %1556 = vadd.xlane.f32.xlu0 %v1555_v21  ;;  %v1564_v24 = vsel %vm784_vm0, %v3795_v29, 0.0  ;;  %v1678_v21 = vpack.c.bf16 %v661_v32, %v660_v30 }
 0x8c8   : > { %v1558_v18 = vsel %vm784_vm0, %v3791_v36, 0.0 }
 0x8c9   : > { %1559 = vadd.xlane.f32.xlu1 %v1558_v18  ;;  %2925 = vmatpush3.bf16.msra.mxu0 %v1676_v27 }
 0x8ca   : > { %2926 = vmatprep.subr.bf16.mxu0 %v1677_v10 }
 0x8cb   : > { %1562 = vadd.xlane.f32.xlu0 %v1561_v33 }
 0x8cd   : > { %1565 = vadd.xlane.f32.xlu1 %v1564_v24  ;;  %2927 = vmatpush3.bf16.msra.mxu0 %v1677_v10 }
 0x8ce   : > { %2928 = vmatprep.subr.bf16.mxu0 %v1678_v21 }
 0x8d1   : > { %2929 = vmatpush3.bf16.msra.mxu0 %v1678_v21 }
 0x94b   : > { %v1545_v39 = vpop.xlane.xlu0 %1544 }
 0x94c   : > { %v1567_v20 = vmul.f32 0.015625, %v1545_v39 }
 0x94d   : > { %v1548_v42 = vpop.xlane.xlu1 %1547 }
 0x94e   : > { %v3804_v41 = vsub.f32 %v3765_v52, %v1567_v20  ;;  %v1568_v40 = vmul.f32 0.015625, %v1548_v42 }
 0x94f   : > { %v1551_v43 = vpop.xlane.xlu0 %1550 }
 0x950   : > { %v3807_v44 = vsub.f32 %v3771_v7, %v1568_v40  ;;  %v1569_v47 = vmul.f32 0.015625, %v1551_v43  ;;  %v1583_v45 = vmul.f32 %v3804_v41, %v3804_v41 }
 0x951   : > { %v1554_v46 = vpop.xlane.xlu1 %1553 }
 0x952   : > { %v3812_v48 = vsub.f32 %v3769_v25, %v1569_v47  ;;  %v1570_v49 = vmul.f32 0.015625, %v1554_v46  ;;  %v1591_v50 = vsel %vm784_vm0, %v1583_v45, 0.0  ;;  %v1584_v56 = vmul.f32 %v3807_v44, %v3807_v44 }
 0x953   : > { %1592 = vadd.xlane.f32.xlu0 %v1591_v50 }
 0x954   : > { %v3818_v53 = vsub.f32 %v3775_v26, %v1570_v49  ;;  %v1557_v57 = vpop.xlane.xlu0 %1556  ;;  %v1594_v58 = vsel %vm784_vm0, %v1584_v56, 0.0  ;;  %v1585_v51 = vmul.f32 %v3812_v48, %v3812_v48  ;;  %v1649_v56 = vsub.s32 2, %v3508_v31 }
 0x955   : > { %v1571_v59 = vmul.f32 0.015625, %v1557_v57  ;;  %1595 = vadd.xlane.f32.xlu1 %v1594_v58 }
 0x956   : > { %v1560_v63 = vpop.xlane.xlu1 %1559  ;;  %v1597_v0 = vsel %vm784_vm0, %v1585_v51, 0.0  ;;  %v1586_v61 = vmul.f32 %v3818_v53, %v3818_v53 }
 0x957   : > { %v3827_v3 = vsub.f32 %v3785_v37, %v1571_v59  ;;  %v1572_v55 = vmul.f32 0.015625, %v1560_v63  ;;  %1598 = vadd.xlane.f32.xlu0 %v1597_v0  ;;  %v3879_v0 = vld [vmem:[%s4371_s3] sm:$0xf] }
 0x958   : > { %v1563_v2 = vpop.xlane.xlu0 %1562  ;;  %v1600_v4 = vsel %vm784_vm0, %v1586_v61, 0.0  ;;  %v1650_v61 = vrot.slane %v3879_v0, %v1649_v56 }
 0x959   : > { %v3831_v6 = vsub.f32 %v3791_v36, %v1572_v55  ;;  %v1573_v9 = vmul.f32 0.015625, %v1563_v2  ;;  %1601 = vadd.xlane.f32.xlu1 %v1600_v4  ;;  %v1587_v12 = vmul.f32 %v3827_v3, %v3827_v3 }
 0x95a   : > { %v1566_v11 = vpop.xlane.xlu1 %1565 }
 0x95b   : > { %v3836_v60 = vsub.f32 %v3789_v34, %v1573_v9  ;;  %v1574_v13 = vmul.f32 0.015625, %v1566_v11  ;;  %v1603_v15 = vsel %vm784_vm0, %v1587_v12, 0.0  ;;  %v1588_v17 = vmul.f32 %v3831_v6, %v3831_v6 }
 0x95c   : > { %1604 = vadd.xlane.f32.xlu0 %v1603_v15 }
 0x95d   : > { %v3842_v19 = vsub.f32 %v3795_v29, %v1574_v13  ;;  %v1606_v16 = vsel %vm784_vm0, %v1588_v17, 0.0  ;;  %v1589_v1 = vmul.f32 %v3836_v60, %v3836_v60  ;;  %v3886_v17 = vld [vmem:[%s4372_s4] sm:$0xf] }
 0x95e   : > { %1607 = vadd.xlane.f32.xlu1 %v1606_v16  ;;  %v1662_v16 = vrot.slane %v3886_v17, %v1649_v56  ;;  %v665_v56 = vld [vmem:[%s4379_s11 + $0x10] sm:$0xff] }
 0x95f   : > { %v1609_v22 = vsel %vm784_vm0, %v1589_v1, 0.0  ;;  %v1590_v23 = vmul.f32 %v3842_v19, %v3842_v19 }
 0x960   : > { %1610 = vadd.xlane.f32.xlu0 %v1609_v22 }
 0x961   : > { %v1612_v35 = vsel %vm784_vm0, %v1590_v23, 0.0 }
 0x962   : > { %1613 = vadd.xlane.f32.xlu1 %v1612_v35 }
 0x9e0   : > { %v1593_v18 = vpop.xlane.xlu0 %1592 }
 0x9e1   : > { %v1615_v33 = vmul.f32 0.015625, %v1593_v18 }
 0x9e2   : > { %v1596_v24 = vpop.xlane.xlu1 %1595 }
 0x9e3   : > { %v1623_v39 = vadd.f32 1e-05, %v1615_v33  ;;  %v1616_v20 = vmul.f32 0.015625, %v1596_v24 }
 0x9e4   : > { %v1599_v42 = vpop.xlane.xlu0 %1598 }
 0x9e5   : > { %3155 = vrsqrt.f32 %v1623_v39  ;;  %v1624_v40 = vadd.f32 1e-05, %v1616_v20  ;;  %v1617_v43 = vmul.f32 0.015625, %v1599_v42 }
 0x9e6   : > { %v1602_v47 = vpop.xlane.xlu1 %1601 }
 0x9e7   : > { %3157 = vrsqrt.f32 %v1624_v40  ;;  %v1625_v45 = vadd.f32 1e-05, %v1617_v43  ;;  %v1618_v46 = vmul.f32 0.015625, %v1602_v47 }
 0x9e9   : > { %3159 = vrsqrt.f32 %v1625_v45  ;;  %v1626_v49 = vadd.f32 1e-05, %v1618_v46  ;;  %v1605_v50 = vpop.xlane.xlu0 %1604 }
 0x9ea   : > { %v1619_v57 = vmul.f32 0.015625, %v1605_v50 }
 0x9eb   : > { %3161 = vrsqrt.f32 %v1626_v49  ;;  %v1608_v58 = vpop.xlane.xlu1 %1607 }
 0x9ec   : > { %v1627_v51 = vadd.f32 1e-05, %v1619_v57  ;;  %v1620_v59 = vmul.f32 0.015625, %v1608_v58  ;;  %v666_v57 = vld [vmem:[%s4379_s11 + $0x18] sm:$0xff] }
 0x9ed   : > { %v1611_v63 = vpop.xlane.xlu0 %1610  ;;  %v1839_v58 = vpack.c.bf16 %v666_v57, %v665_v56 }
 0x9ee   : > { %3163 = vrsqrt.f32 %v1627_v51  ;;  %v1628_v55 = vadd.f32 1e-05, %v1620_v59  ;;  %v1621_v2 = vmul.f32 0.015625, %v1611_v63  ;;  %v667_v51 = vld [vmem:[%s4379_s11 + $0x20] sm:$0xff]  ;;  %v668_v59 = vld [vmem:[%s4379_s11 + $0x28] sm:$0xff] }
 0x9ef   : > { %v3156_v4 = vpop.eup %3155  ;;  %v1614_v9 = vpop.xlane.xlu1 %1613  ;;  %v1840_v63 = vpack.c.bf16 %v668_v59, %v667_v51 }
 0x9f0   : > { %v1639_v12 = vmul.f32 %v3156_v4, %v3804_v41  ;;  %3165 = vrsqrt.f32 %v1628_v55  ;;  %v1629_v11 = vadd.f32 1e-05, %v1621_v2  ;;  %v1622_v13 = vmul.f32 0.015625, %v1614_v9  ;;  %v670_v55 = vld [vmem:[%s4379_s11 + $0x38] sm:$0xff]  ;;  %v671_v4 = vld [vmem:[%s4379_s11 + $0x40] sm:$0xff]  ;;  %v672_v9 = vld [vmem:[%s4379_s11 + $0x48] sm:$0xff] }
 0x9f1   : > { %v3158_v15 = vpop.eup %3157 }
 0x9f2   : > { %v1640_v1 = vmul.f32 %v3158_v15, %v3807_v44  ;;  %3167 = vrsqrt.f32 %v1629_v11  ;;  %v1630_v22 = vadd.f32 1e-05, %v1622_v13  ;;  %v1651_v23 = vmul.f32 %v1650_v61, %v1639_v12  ;;  %v673_v11 = vld [vmem:[%s4379_s11 + $0x50] sm:$0xff]  ;;  %v674_v13 = vld [vmem:[%s4379_s11 + $0x58] sm:$0xff] }
 0x9f3   : > { %v3160_v35 = vpop.eup %3159  ;;  %v1842_v12 = vpack.c.bf16 %v672_v9, %v671_v4  ;;  %v1843_v15 = vpack.c.bf16 %v674_v13, %v673_v11 }
 0x9f4   : > { %v1641_v54 = vmul.f32 %v3160_v35, %v3812_v48  ;;  %3169 = vrsqrt.f32 %v1630_v22  ;;  %v1652_v41 = vmul.f32 %v1650_v61, %v1640_v1  ;;  %v1663_v62 = vadd.f32 %v1662_v16, %v1651_v23  ;;  %v676_v1 = vld [vmem:[%s4379_s11 + $0x68] sm:$0xff]  ;;  %v677_v23 = vld [vmem:[%s4379_s11 + $0x70] sm:$0xff]  ;;  %v678_v35 = vld [vmem:[%s4379_s11 + $0x78] sm:$0xff] }
 0x9f5   : > { %v3162_v8 = vpop.eup %3161 }
 0x9f6   : > { %v1653_v5 = vmul.f32 %v1650_v61, %v1641_v54  ;;  %v1642_v14 = vmul.f32 %v3162_v8, %v3818_v53  ;;  %v1664_v27 = vadd.f32 %v1662_v16, %v1652_v41  ;;  %v1845_v54 = vpack.c.bf16 %v678_v35, %v677_v23  ;;  %v2754_v41 = vld [vmem:[%s4378_s10] ss:$0 sm:$0xff] }
 0x9f8   : > { %v3164_v28 = vpop.eup %3163  ;;  %v1654_v38 = vmul.f32 %v1650_v61, %v1642_v14  ;;  %v1671_v10 = vpack.c.bf16 %v1664_v27, %v1663_v62  ;;  %v1665_v32 = vadd.f32 %v1662_v16, %v1653_v5 }
 0x9f9   : > { %v1643_v30 = vmul.f32 %v3164_v28, %v3827_v3 }
 0x9fa   : > { %v3166_v44 = vpop.eup %3165  ;;  %v1666_v21 = vadd.f32 %v1662_v16, %v1654_v38  ;;  %2930 = vmatprep.mubr.msk.bf16.mxu0 %vm784_vm0, %v1671_v10 }
 0x9fb   : > { %v1644_v48 = vmul.f32 %v3166_v44, %v3831_v6  ;;  %v1655_v18 = vmul.f32 %v1650_v61, %v1643_v30 }
 0x9fc   : > { %v3168_v33 = vpop.eup %3167  ;;  %v1672_v24 = vpack.c.bf16 %v1666_v21, %v1665_v32 }
 0x9fd   : > { %v1645_v39 = vmul.f32 %v3168_v33, %v3836_v60  ;;  %v1656_v53 = vmul.f32 %v1650_v61, %v1644_v48  ;;  %v1667_v40 = vadd.f32 %v1662_v16, %v1655_v18  ;;  %v663_v60 = vld [vmem:[%s4379_s11] sm:$0xff] }
 0x9fe   : > { %v3170_v20 = vpop.eup %3169  ;;  %2931 = vmatmul.mubr.msk.bf16.vlgmr.msra.gmra.mrb[24].mxu0 %vm784_vm0, %v1672_v24 }
 0x9ff   : > { %v1646_v42 = vmul.f32 %v3170_v20, %v3842_v19  ;;  %v1668_v3 = vadd.f32 %v1662_v16, %v1656_v53  ;;  %v1657_v43 = vmul.f32 %v1650_v61, %v1645_v39  ;;  %v664_v19 = vld [vmem:[%s4379_s11 + $0x8] sm:$0xff] }
 0xa00   : > { %v1838_v50 = vpack.c.bf16 %v664_v19, %v663_v60 }
 0xa01   : > { %v1673_v47 = vpack.c.bf16 %v1668_v3, %v1667_v40  ;;  %v1658_v45 = vmul.f32 %v1650_v61, %v1646_v42  ;;  %v1669_v46 = vadd.f32 %v1662_v16, %v1657_v43  ;;  %v669_v61 = vld [vmem:[%s4379_s11 + $0x30] sm:$0xff] }
 0xa02   : > { %2938 = vmatprep.subr.bf16.mxu1 %v1838_v50  ;;  %v1841_v2 = vpack.c.bf16 %v670_v55, %v669_v61 }
 0xa03   : > { %2934 = vmatprep.mubr.msk.bf16.mxu0 %vm784_vm0, %v1673_v47  ;;  %v1670_v6 = vadd.f32 %v1662_v16, %v1658_v45  ;;  %2939 = vmatpush3.bf16.msra.mxu1 %v1838_v50  ;;  %v675_v16 = vld [vmem:[%s4379_s11 + $0x60] sm:$0xff] }
 0xa04   : > { %2940 = vmatprep.subr.bf16.mxu1 %v1839_v58  ;;  %v1844_v22 = vpack.c.bf16 %v676_v1, %v675_v16 }
 0xa05   : > { %v1674_v49 = vpack.c.bf16 %v1670_v6, %v1669_v46 }
 0xa07   : > { %2935 = vmatmul.mubr.msk.bf16.gmra.mrb[28].mxu0 %vm784_vm0, %v1674_v49  ;;  %2941 = vmatpush3.bf16.msra.mxu1 %v1839_v58 }
 0xa08   : > { %2942 = vmatprep.subr.bf16.mxu1 %v1840_v63 }
 0xa0b   : > { %2943 = vmatpush3.bf16.msra.mxu1 %v1840_v63 }
 0xa0c   : > { %2944 = vmatprep.subr.bf16.mxu1 %v1841_v2 }
 0xa0f   : > { %2945 = vmatpush3.bf16.msra.mxu1 %v1841_v2 }
 0xa10   : > { %2946 = vmatprep.subr.bf16.mxu1 %v1842_v12 }
 0xa13   : > { %2947 = vmatpush3.bf16.msra.mxu1 %v1842_v12 }
 0xa14   : > { %2948 = vmatprep.subr.bf16.mxu1 %v1843_v15 }
 0xa17   : > { %2949 = vmatpush3.bf16.msra.mxu1 %v1843_v15 }
 0xa18   : > { %2950 = vmatprep.subr.bf16.mxu1 %v1844_v22 }
 0xa1b   : > { %2951 = vmatpush3.bf16.msra.mxu1 %v1844_v22 }
 0xa1c   : > { %2952 = vmatprep.subr.bf16.mxu1 %v1845_v54 }
 0xa1f   : > { %2953 = vmatpush3.bf16.msra.mxu1 %v1845_v54 }
 0xad1   : > { %v2932_v8 = vpop.f32.mrb[24].mxu0 }
 0xad2   : > { %v3951_v5 = vadd.f32 %v2932_v8, %v2754_v41  ;;  %v1731_v14 = vpop.f32.mrb[25].mxu0 }
 0xad3   : > { %v3953_v62 = vadd.f32 %v2754_v41, %v1731_v14  ;;  %v2933_v27 = vpop.f32.mrb[26].mxu0 }
 0xad4   : > { %v1764_v28 = vmul.f32 %v3951_v5, %v3951_v5  ;;  %v3957_v38 = vadd.f32 %v2933_v27, %v2754_v41  ;;  %v1734_v10 = vpop.f32.mrb[27].mxu0 }
 0xad5   : > { %v1762_v30 = vmul.f32 %v3953_v62, %v3953_v62  ;;  %v3961_v44 = vadd.f32 %v2754_v41, %v1734_v10 }
 0xad6   : > { %v1772_v32 = vmul.f32 %v1764_v28, %v3951_v5  ;;  %v1765_v21 = vmul.f32 %v3957_v38, %v3957_v38 }
 0xad7   : > { %v1770_v48 = vmul.f32 %v1762_v30, %v3953_v62  ;;  %v1763_v18 = vmul.f32 %v3961_v44, %v3961_v44 }
 0xad8   : > { %v1780_v33 = vmul.f32 0.044715, %v1772_v32  ;;  %v1773_v24 = vmul.f32 %v1765_v21, %v3957_v38 }
 0xad9   : > { %v1778_v39 = vmul.f32 0.044715, %v1770_v48  ;;  %v1771_v53 = vmul.f32 %v1763_v18, %v3961_v44 }
 0xada   : > { %v1788_v20 = vadd.f32 %v1780_v33, %v3951_v5  ;;  %v1781_v42 = vmul.f32 0.044715, %v1773_v24  ;;  %v2936_v40 = vpop.f32.mrb[28].mxu0 }
 0xadb   : > { %v1786_v3 = vadd.f32 %v1778_v39, %v3953_v62  ;;  %v1779_v43 = vmul.f32 0.044715, %v1771_v53  ;;  %v3973_v47 = vadd.f32 %v2936_v40, %v2754_v41  ;;  %v1747_v45 = vpop.f32.mrb[29].mxu0 }
 0xadc   : > { %v1796_v46 = vmul.f32 0.7978846, %v1788_v20  ;;  %v1789_v6 = vadd.f32 %v1781_v42, %v3957_v38  ;;  %v3976_v49 = vadd.f32 %v2754_v41, %v1747_v45  ;;  %v2937_v60 = vpop.f32.mrb[30].mxu0 }
 0xadd   : > { %v1794_v19 = vmul.f32 0.7978846, %v1786_v3  ;;  %v1787_v50 = vadd.f32 %v1779_v43, %v3961_v44  ;;  %v1768_v56 = vmul.f32 %v3973_v47, %v3973_v47  ;;  %v3981_v57 = vadd.f32 %v2937_v60, %v2754_v41  ;;  %v1750_v58 = vpop.f32.mrb[31].mxu0 }
 0xade   : > { %3171 = vtanh.f32 %v1796_v46  ;;  %v1797_v51 = vmul.f32 0.7978846, %v1789_v6  ;;  %v1766_v59 = vmul.f32 %v3976_v49, %v3976_v49  ;;  %v1751_v63 = vadd.f32 %v2754_v41, %v1750_v58 }
 0xadf   : > { %3173 = vtanh.f32 %v1794_v19  ;;  %v1795_v61 = vmul.f32 0.7978846, %v1787_v50  ;;  %v1776_v55 = vmul.f32 %v1768_v56, %v3973_v47  ;;  %v1769_v2 = vmul.f32 %v3981_v57, %v3981_v57 }
 0xae0   : > { %3175 = vtanh.f32 %v1797_v51  ;;  %v1774_v4 = vmul.f32 %v1766_v59, %v3976_v49  ;;  %v1767_v9 = vmul.f32 %v1751_v63, %v1751_v63 }
 0xae1   : > { %3177 = vtanh.f32 %v1795_v61  ;;  %v1784_v12 = vmul.f32 0.044715, %v1776_v55  ;;  %v1777_v11 = vmul.f32 %v1769_v2, %v3981_v57 }
 0xae2   : > { %v1782_v13 = vmul.f32 0.044715, %v1774_v4  ;;  %v1775_v15 = vmul.f32 %v1767_v9, %v1751_v63 }
 0xae3   : > { %v1792_v16 = vadd.f32 %v1784_v12, %v3973_v47  ;;  %v1785_v1 = vmul.f32 0.044715, %v1777_v11 }
 0xae4   : > { %v1790_v22 = vadd.f32 %v1782_v13, %v3976_v49  ;;  %v1783_v23 = vmul.f32 0.044715, %v1775_v15  ;;  %v2759_v15 = vld [vmem:[%s4380_s12] ss:$0 sm:$0xff] }
 0xae5   : > { %v1800_v35 = vmul.f32 0.7978846, %v1792_v16  ;;  %v1793_v54 = vadd.f32 %v1785_v1, %v3981_v57 }
 0xae6   : > { %v1798_v41 = vmul.f32 0.7978846, %v1790_v22  ;;  %v1791_v8 = vadd.f32 %v1783_v23, %v1751_v63 }
 0xae7   : > { %3179 = vtanh.f32 %v1800_v35  ;;  %v1801_v14 = vmul.f32 0.7978846, %v1793_v54 }
 0xae8   : > { %v3172_v27 = vpop.eup %3171  ;;  %3181 = vtanh.f32 %v1798_v41  ;;  %v1799_v28 = vmul.f32 0.7978846, %v1791_v8 }
 0xae9   : > { %v3174_v10 = vpop.eup %3173  ;;  %v1812_v30 = vadd.f32 1.0, %v3172_v27  ;;  %3183 = vtanh.f32 %v1801_v14 }
 0xaea   : > { %v3176_v32 = vpop.eup %3175  ;;  %3185 = vtanh.f32 %v1799_v28  ;;  %v1810_v21 = vadd.f32 1.0, %v3174_v10 }
 0xaeb   : > { %v3178_v48 = vpop.eup %3177  ;;  %v1820_v18 = vmul.f32 0.5, %v1812_v30  ;;  %v1813_v33 = vadd.f32 1.0, %v3176_v32 }
 0xaec   : > { %v1811_v24 = vadd.f32 1.0, %v3178_v48  ;;  %v1818_v39 = vmul.f32 0.5, %v1810_v21 }
 0xaed   : > { %v1821_v53 = vmul.f32 0.5, %v1813_v33  ;;  %v1828_v42 = vmul.f32 %v1820_v18, %v3951_v5 }
 0xaee   : > { %v1819_v20 = vmul.f32 0.5, %v1811_v24  ;;  %v1826_v3 = vmul.f32 %v1818_v39, %v3953_v62 }
 0xaef   : > { %v1829_v40 = vmul.f32 %v1821_v53, %v3957_v38 }
 0xaf0   : > { %v1827_v43 = vmul.f32 %v1819_v20, %v3961_v44 }
 0xaf1   : > { %v3180_v45 = vpop.eup %3179  ;;  %v1835_v46 = vpack.c.bf16 %v1829_v40, %v1828_v42 }
 0xaf2   : > { %v3182_v6 = vpop.eup %3181  ;;  %v1834_v60 = vpack.c.bf16 %v1827_v43, %v1826_v3  ;;  %v1816_v19 = vadd.f32 1.0, %v3180_v45 }
 0xaf3   : > { %v3184_v50 = vpop.eup %3183  ;;  %v1814_v56 = vadd.f32 1.0, %v3182_v6 }
 0xaf4   : > { %v3186_v58 = vpop.eup %3185  ;;  %2954 = vmatprep.mubr.bf16.mxu1 %v1834_v60  ;;  %v1817_v51 = vadd.f32 1.0, %v3184_v50  ;;  %v1824_v59 = vmul.f32 0.5, %v1816_v19 }
 0xaf5   : > { %2955 = vmatmul.mubr.bf16.vlgmr.msra.gmra.mrb[32].mxu1 %v1835_v46  ;;  %v1815_v61 = vadd.f32 1.0, %v3186_v58  ;;  %v1822_v5 = vmul.f32 0.5, %v1814_v56 }
 0xaf6   : > { %v1825_v55 = vmul.f32 0.5, %v1817_v51  ;;  %v1832_v62 = vmul.f32 %v1824_v59, %v3973_v47 }
 0xaf7   : > { %v1823_v38 = vmul.f32 0.5, %v1815_v61  ;;  %v1830_v2 = vmul.f32 %v1822_v5, %v3976_v49 }
 0xaf8   : > { %v1833_v44 = vmul.f32 %v1825_v55, %v3981_v57 }
 0xaf9   : > { %v1831_v4 = vmul.f32 %v1823_v38, %v1751_v63 }
 0xafa   : > { %v1837_v9 = vpack.c.bf16 %v1833_v44, %v1832_v62 }
 0xafb   : > { %v1836_v12 = vpack.c.bf16 %v1831_v4, %v1830_v2 }
 0xafd   : > { %2958 = vmatprep.mubr.bf16.mxu1 %v1836_v12 }
 0xafe   : > { %2959 = vmatmul.mubr.bf16.gmra.mrb[36].mxu1 %v1837_v9 }
 0xbc8   : > { %v2956_v11 = vpop.f32.mrb[32].mxu1 }
 0xbc9   : > { %v1880_v13 = vpop.f32.mrb[33].mxu1  ;;  %v1913_v16 = vadd.f32 %v2956_v11, %v3769_v25 }
 0xbca   : > { %v1911_v1 = vadd.f32 %v1880_v13, %v3765_v52  ;;  %v2957_v47 = vpop.f32.mrb[34].mxu1 }
 0xbcb   : > { %v1883_v22 = vpop.f32.mrb[35].mxu1  ;;  %v1914_v57 = vadd.f32 %v2957_v47, %v3775_v26  ;;  %v1927_v54 = vadd.f32 %v2759_v15, %v1913_v16 }
 0xbcc   : > { %v1912_v49 = vadd.f32 %v1883_v22, %v3771_v7  ;;  %v1925_v63 = vadd.f32 %v2759_v15, %v1911_v1 }
 0xbcd   : > { %v1928_v8 = vadd.f32 %v2759_v15, %v1914_v57  ;;  %v1939_v52 = vsel %vm784_vm0, %v1927_v54, 0.0 }
 0xbce   : > { %v1933_v23 = vsel %vm784_vm0, %v1925_v63, 0.0  ;;  %v1926_v35 = vadd.f32 %v2759_v15, %v1912_v49 }
 0xbcf   : > { %1934 = vadd.xlane.f32.xlu0 %v1933_v23  ;;  %v1942_v10 = vsel %vm784_vm0, %v1928_v8, 0.0 }
 0xbd0   : > { %v1936_v41 = vsel %vm784_vm0, %v1926_v35, 0.0 }
 0xbd1   : > { %v2960_v14 = vpop.f32.mrb[36].mxu1  ;;  %1937 = vadd.xlane.f32.xlu1 %v1936_v41  ;;  %v681_v41 = vld [vmem:[%s4381_s13 + $0x8] sm:$0xff] }
 0xbd2   : > { %v1896_v25 = vpop.f32.mrb[37].mxu1  ;;  %v1917_v27 = vadd.f32 %v2960_v14, %v3789_v34  ;;  %v682_v14 = vld [vmem:[%s4381_s13 + $0x10] sm:$0xff] }
 0xbd3   : > { %v1915_v26 = vadd.f32 %v1896_v25, %v3785_v37  ;;  %v2961_v28 = vpop.f32.mrb[38].mxu1  ;;  %1940 = vadd.xlane.f32.xlu0 %v1939_v52  ;;  %v683_v25 = vld [vmem:[%s4381_s13 + $0x18] sm:$0xff] }
 0xbd4   : > { %v1899_v7 = vpop.f32.mrb[39].mxu1  ;;  %v1918_v30 = vadd.f32 %v2961_v28, %v3795_v29  ;;  %v1931_v33 = vadd.f32 %v2759_v15, %v1917_v27  ;;  %v2066_v52 = vpack.c.bf16 %v683_v25, %v682_v14  ;;  %v684_v27 = vld [vmem:[%s4381_s13 + $0x20] sm:$0xff] }
 0xbd5   : > { %v1916_v32 = vadd.f32 %v1899_v7, %v3791_v36  ;;  %1943 = vadd.xlane.f32.xlu1 %v1942_v10  ;;  %v1929_v21 = vadd.f32 %v2759_v15, %v1915_v26  ;;  %v685_v26 = vld [vmem:[%s4381_s13 + $0x28] sm:$0xff]  ;;  %v686_v7 = vld [vmem:[%s4381_s13 + $0x30] sm:$0xff]  ;;  %v687_v10 = vld [vmem:[%s4381_s13 + $0x38] sm:$0xff] }
 0xbd6   : > { %v1932_v24 = vadd.f32 %v2759_v15, %v1918_v30  ;;  %v1951_v37 = vsel %vm784_vm0, %v1931_v33, 0.0  ;;  %v2067_v28 = vpack.c.bf16 %v685_v26, %v684_v27  ;;  %v2068_v30 = vpack.c.bf16 %v687_v10, %v686_v7 }
 0xbd7   : > { %v1945_v48 = vsel %vm784_vm0, %v1929_v21, 0.0  ;;  %v1930_v18 = vadd.f32 %v2759_v15, %v1916_v32 }
 0xbd8   : > { %1946 = vadd.xlane.f32.xlu0 %v1945_v48  ;;  %v1954_v39 = vsel %vm784_vm0, %v1932_v24, 0.0 }
 0xbd9   : > { %v1948_v34 = vsel %vm784_vm0, %v1930_v18, 0.0 }
 0xbda   : > { %1949 = vadd.xlane.f32.xlu1 %v1948_v34 }
 0xbdc   : > { %1952 = vadd.xlane.f32.xlu0 %v1951_v37 }
 0xbde   : > { %1955 = vadd.xlane.f32.xlu1 %v1954_v39 }
 0xc5c   : > { %v1935_v29 = vpop.xlane.xlu0 %1934 }
 0xc5d   : > { %v1957_v53 = vmul.f32 0.015625, %v1935_v29 }
 0xc5e   : > { %v1938_v36 = vpop.xlane.xlu1 %1937 }
 0xc5f   : > { %v4019_v20 = vsub.f32 %v1925_v63, %v1957_v53  ;;  %v1958_v42 = vmul.f32 0.015625, %v1938_v36 }
 0xc60   : > { %v1941_v40 = vpop.xlane.xlu0 %1940 }
 0xc61   : > { %v4021_v3 = vsub.f32 %v1926_v35, %v1958_v42  ;;  %v1959_v43 = vmul.f32 0.015625, %v1941_v40  ;;  %v1973_v45 = vmul.f32 %v4019_v20, %v4019_v20  ;;  %v2039_v40 = vsub.s32 3, %v3508_v31 }
 0xc62   : > { %v1944_v46 = vpop.xlane.xlu1 %1943 }
 0xc63   : > { %v4025_v6 = vsub.f32 %v1927_v54, %v1959_v43  ;;  %v1960_v60 = vmul.f32 0.015625, %v1944_v46  ;;  %v1981_v19 = vsel %vm784_vm0, %v1973_v45, 0.0  ;;  %v1974_v50 = vmul.f32 %v4021_v3, %v4021_v3  ;;  %v680_v54 = vld [vmem:[%s4381_s13] sm:$0xff] }
 0xc64   : > { %1982 = vadd.xlane.f32.xlu0 %v1981_v19  ;;  %v2052_v31 = vrot.slane %v3886_v17, %v2039_v40 }
 0xc65   : > { %v4030_v56 = vsub.f32 %v1928_v8, %v1960_v60  ;;  %v1947_v58 = vpop.xlane.xlu0 %1946  ;;  %v1984_v51 = vsel %vm784_vm0, %v1974_v50, 0.0  ;;  %v1975_v59 = vmul.f32 %v4025_v6, %v4025_v6  ;;  %v2065_v8 = vpack.c.bf16 %v681_v41, %v680_v54 }
 0xc66   : > { %v1961_v61 = vmul.f32 0.015625, %v1947_v58  ;;  %1985 = vadd.xlane.f32.xlu1 %v1984_v51  ;;  %v2040_v50 = vrot.slane %v3879_v0, %v2039_v40  ;;  %v2328_v40 = vld [vmem:[%s4385_s17 + $0x108] sm:$0xff] }
 0xc67   : > { %v1950_v5 = vpop.xlane.xlu1 %1949  ;;  %v1987_v55 = vsel %vm784_vm0, %v1975_v59, 0.0  ;;  %v1976_v38 = vmul.f32 %v4030_v56, %v4030_v56  ;;  %2962 = vmatprep.subr.bf16.mxu0 %v2065_v8 }
 0xc68   : > { %v4038_v62 = vsub.f32 %v1929_v21, %v1961_v61  ;;  %v1962_v44 = vmul.f32 0.015625, %v1950_v5  ;;  %1988 = vadd.xlane.f32.xlu0 %v1987_v55  ;;  %2963 = vmatpush3.bf16.msra.mxu0 %v2065_v8 }
 0xc69   : > { %v1953_v2 = vpop.xlane.xlu0 %1952  ;;  %v1990_v4 = vsel %vm784_vm0, %v1976_v38, 0.0  ;;  %2964 = vmatprep.subr.bf16.mxu0 %v2066_v52 }
 0xc6a   : > { %v4041_v9 = vsub.f32 %v1930_v18, %v1962_v44  ;;  %v1963_v12 = vmul.f32 0.015625, %v1953_v2  ;;  %1991 = vadd.xlane.f32.xlu1 %v1990_v4  ;;  %v1977_v11 = vmul.f32 %v4038_v62, %v4038_v62 }
 0xc6b   : > { %v1956_v13 = vpop.xlane.xlu1 %1955 }
 0xc6c   : > { %v4045_v15 = vsub.f32 %v1931_v33, %v1963_v12  ;;  %v1964_v16 = vmul.f32 0.015625, %v1956_v13  ;;  %v1993_v1 = vsel %vm784_vm0, %v1977_v11, 0.0  ;;  %v1978_v47 = vmul.f32 %v4041_v9, %v4041_v9  ;;  %2965 = vmatpush3.bf16.msra.mxu0 %v2066_v52 }
 0xc6d   : > { %1994 = vadd.xlane.f32.xlu0 %v1993_v1  ;;  %2966 = vmatprep.subr.bf16.mxu0 %v2067_v28 }
 0xc6e   : > { %v4050_v22 = vsub.f32 %v1932_v24, %v1964_v16  ;;  %v1996_v57 = vsel %vm784_vm0, %v1978_v47, 0.0  ;;  %v1979_v49 = vmul.f32 %v4045_v15, %v4045_v15 }
 0xc6f   : > { %1997 = vadd.xlane.f32.xlu1 %v1996_v57 }
 0xc70   : > { %v1999_v63 = vsel %vm784_vm0, %v1979_v49, 0.0  ;;  %v1980_v23 = vmul.f32 %v4050_v22, %v4050_v22  ;;  %2967 = vmatpush3.bf16.msra.mxu0 %v2067_v28 }
 0xc71   : > { %2000 = vadd.xlane.f32.xlu0 %v1999_v63  ;;  %2968 = vmatprep.subr.bf16.mxu0 %v2068_v30 }
 0xc72   : > { %v2002_v35 = vsel %vm784_vm0, %v1980_v23, 0.0 }
 0xc73   : > { %2003 = vadd.xlane.f32.xlu1 %v2002_v35 }
 0xc74   : > { %2969 = vmatpush3.bf16.msra.mxu0 %v2068_v30 }
 0xcf1   : > { %v1983_v32 = vpop.xlane.xlu0 %1982 }
 0xcf2   : > { %v2005_v21 = vmul.f32 0.015625, %v1983_v32 }
 0xcf3   : > { %v1986_v48 = vpop.xlane.xlu1 %1985 }
 0xcf4   : > { %v2013_v18 = vadd.f32 1e-05, %v2005_v21  ;;  %v2006_v33 = vmul.f32 0.015625, %v1986_v48  ;;  %v3231_v21 = vmov 0.0|0.0   ;;  %v2304_v48 = vld [vmem:[%s4385_s17 + $0x48] sm:$0xff] }
 0xcf5   : > { %v1989_v34 = vpop.xlane.xlu0 %1988  ;;  %2997 = vmatprep.subr.bf16.mxu0 %v3231_v21 }
 0xcf6   : > { %3187 = vrsqrt.f32 %v2013_v18  ;;  %v2014_v24 = vadd.f32 1e-05, %v2006_v33  ;;  %v2007_v37 = vmul.f32 0.015625, %v1989_v34  ;;  %v2295_v18 = vld [vmem:[%s4385_s17] sm:$0xff] }
 0xcf7   : > { %v1992_v39 = vpop.xlane.xlu1 %1991  ;;  %v2303_v34 = vld [vmem:[%s4385_s17 + $0x40] sm:$0xff] }
 0xcf8   : > { %3189 = vrsqrt.f32 %v2014_v24  ;;  %v2015_v29 = vadd.f32 1e-05, %v2007_v37  ;;  %v2008_v53 = vmul.f32 0.015625, %v1992_v39  ;;  %v3011_v24 = vpack.c.bf16 %v2303_v34, %v2295_v18  ;;  %v2312_v37 = vld [vmem:[%s4385_s17 + $0x88] sm:$0xff] }
 0xcf9   : > { %v2320_v39 = vld [vmem:[%s4385_s17 + $0xc8] sm:$0xff] }
 0xcfa   : > { %3191 = vrsqrt.f32 %v2015_v29  ;;  %v2016_v36 = vadd.f32 1e-05, %v2008_v53  ;;  %v1995_v42 = vpop.xlane.xlu0 %1994  ;;  %v2311_v29 = vld [vmem:[%s4385_s17 + $0x80] sm:$0xff] }
 0xcfb   : > { %v2009_v43 = vmul.f32 0.015625, %v1995_v42  ;;  %v2319_v53 = vld [vmem:[%s4385_s17 + $0xc0] sm:$0xff] }
 0xcfc   : > { %3193 = vrsqrt.f32 %v2016_v36  ;;  %v1998_v45 = vpop.xlane.xlu1 %1997  ;;  %v3013_v36 = vpack.c.bf16 %v2320_v39, %v2312_v37  ;;  %v3015_v42 = vpack.c.bf16 %v2319_v53, %v2311_v29 }
 0xcfd   : > { %v2017_v46 = vadd.f32 1e-05, %v2009_v43  ;;  %v2010_v60 = vmul.f32 0.015625, %v1998_v45  ;;  %v2336_v43 = vld [vmem:[%s4385_s17 + $0x148] sm:$0xff] }
 0xcfe   : > { %v2001_v19 = vpop.xlane.xlu0 %2000  ;;  %v3017_v45 = vpack.c.bf16 %v2336_v43, %v2328_v40 }
 0xcff   : > { %3195 = vrsqrt.f32 %v2017_v46  ;;  %v2018_v58 = vadd.f32 1e-05, %v2010_v60  ;;  %v2011_v51 = vmul.f32 0.015625, %v2001_v19  ;;  %v2327_v46 = vld [vmem:[%s4385_s17 + $0x100] sm:$0xff] }
 0xd00   : > { %v3188_v59 = vpop.eup %3187  ;;  %v2004_v61 = vpop.xlane.xlu1 %2003  ;;  %v2335_v60 = vld [vmem:[%s4385_s17 + $0x140] sm:$0xff] }
 0xd01   : > { %v2029_v5 = vmul.f32 %v3188_v59, %v4019_v20  ;;  %3197 = vrsqrt.f32 %v2018_v58  ;;  %v2019_v55 = vadd.f32 1e-05, %v2011_v51  ;;  %v2012_v38 = vmul.f32 0.015625, %v2004_v61  ;;  %v2352_v58 = vld [vmem:[%s4385_s17 + $0x1c8] sm:$0xff]  ;;  %v2343_v51 = vld [vmem:[%s4385_s17 + $0x180] sm:$0xff] }
 0xd02   : > { %v3190_v44 = vpop.eup %3189  ;;  %v3019_v19 = vpack.c.bf16 %v2335_v60, %v2327_v46  ;;  %v2351_v61 = vld [vmem:[%s4385_s17 + $0x1c0] sm:$0xff] }
 0xd03   : > { %v2030_v2 = vmul.f32 %v3190_v44, %v4021_v3  ;;  %3199 = vrsqrt.f32 %v2019_v55  ;;  %v2020_v4 = vadd.f32 1e-05, %v2012_v38  ;;  %v2041_v12 = vmul.f32 %v2040_v50, %v2029_v5  ;;  %v2760_v55 = vld [vmem:[%s4382_s14] ss:$0 sm:$0xff] }
 0xd04   : > { %v3192_v11 = vpop.eup %3191  ;;  %v3023_v5 = vpack.c.bf16 %v2351_v61, %v2343_v51 }
 0xd05   : > { %v2031_v0 = vmul.f32 %v3192_v11, %v4025_v6  ;;  %3201 = vrsqrt.f32 %v2020_v4  ;;  %v2042_v13 = vmul.f32 %v2040_v50, %v2030_v2  ;;  %v2053_v47 = vadd.f32 %v2052_v31, %v2041_v12 }
 0xd06   : > { %v3194_v16 = vpop.eup %3193 }
 0xd07   : > { %v2043_v1 = vmul.f32 %v2040_v50, %v2031_v0  ;;  %v2032_v20 = vmul.f32 %v3194_v16, %v4030_v56  ;;  %v2054_v57 = vadd.f32 %v2052_v31, %v2042_v13 }
 0xd09   : > { %v3196_v49 = vpop.eup %3195  ;;  %v2044_v63 = vmul.f32 %v2040_v50, %v2032_v20  ;;  %v2061_v23 = vpack.c.bf16 %v2054_v57, %v2053_v47  ;;  %v2055_v35 = vadd.f32 %v2052_v31, %v2043_v1 }
 0xd0a   : > { %v2033_v17 = vmul.f32 %v3196_v49, %v4038_v62 }
 0xd0b   : > { %v3198_v3 = vpop.eup %3197  ;;  %v2056_v54 = vadd.f32 %v2052_v31, %v2044_v63  ;;  %2970 = vmatprep.mubr.msk.bf16.mxu0 %vm784_vm0, %v2061_v23 }
 0xd0c   : > { %v2034_v6 = vmul.f32 %v3198_v3, %v4041_v9  ;;  %v2045_v41 = vmul.f32 %v2040_v50, %v2033_v17 }
 0xd0d   : > { %v3200_v8 = vpop.eup %3199  ;;  %v2062_v14 = vpack.c.bf16 %v2056_v54, %v2055_v35 }
 0xd0e   : > { %v2035_v25 = vmul.f32 %v3200_v8, %v4045_v15  ;;  %v2046_v56 = vmul.f32 %v2040_v50, %v2034_v6  ;;  %v2057_v26 = vadd.f32 %v2052_v31, %v2045_v41  ;;  %v3233_v15 = vmov 0.0  }
 0xd0f   : > { %v3202_v52 = vpop.eup %3201  ;;  %2971 = vmatmul.mubr.msk.bf16.vlgmr.msra.gmra.mrb[32].mxu0 %vm784_vm0, %v2062_v14  ;;  %2432 = vmatprep.mubr.f32.mxu1 %v3233_v15 }
 0xd10   : > { %v2036_v27 = vmul.f32 %v3202_v52, %v4050_v22  ;;  %v2058_v62 = vadd.f32 %v2052_v31, %v2046_v56  ;;  %v2047_v28 = vmul.f32 %v2040_v50, %v2035_v25  ;;  %v2296_v22 = vld [vmem:[%s4385_s17 + $0x8] sm:$0xff] }
 0xd11   : > { %v3009_v33 = vpack.c.bf16 %v2304_v48, %v2296_v22 }
 0xd12   : > { %v2063_v7 = vpack.c.bf16 %v2058_v62, %v2057_v26  ;;  %v2048_v10 = vmul.f32 %v2040_v50, %v2036_v27  ;;  %v2059_v30 = vadd.f32 %v2052_v31, %v2047_v28  ;;  %v2344_v50 = vld [vmem:[%s4385_s17 + $0x188] sm:$0xff] }
 0xd13   : > { %3010 = vmatprep.subr.bf16.mxu1 %v3009_v33  ;;  %v3021_v59 = vpack.c.bf16 %v2352_v58, %v2344_v50 }
 0xd14   : > { %2974 = vmatprep.mubr.msk.bf16.mxu0 %vm784_vm0, %v2063_v7  ;;  %v2060_v9 = vadd.f32 %v2052_v31, %v2048_v10  ;;  %3012 = vmatpush1.bf16.msra.mxu1 %v3011_v24 }
 0xd15   : > { %3014 = vmatprep.subr.bf16.mxu1 %v3013_v36 }
 0xd16   : > { %v2064_v32 = vpack.c.bf16 %v2060_v9, %v2059_v30 }
 0xd18   : > { %2975 = vmatmul.mubr.msk.bf16.gmra.mrb[36].mxu0 %vm784_vm0, %v2064_v32  ;;  %3016 = vmatpush1.bf16.msra.mxu1 %v3015_v42 }
 0xd19   : > { %2994 = vmatprep.mubr.msk.f32.mxu0 %vm3232_vm1, %v3233_v15  ;;  %3018 = vmatprep.subr.bf16.mxu1 %v3017_v45 }
 0xd1c   : > { %3020 = vmatpush1.bf16.msra.mxu1 %v3019_v19 }
 0xd1d   : > { %3022 = vmatprep.subr.bf16.mxu1 %v3021_v59 }
 0xd20   : > { %3024 = vmatpush1.bf16.msra.mxu1 %v3023_v5 }
 0xde2   : > { %v2972_v38 = vpop.f32.mrb[32].mxu0 }
 0xde3   : > { %v4152_v44 = vadd.f32 %v2972_v38, %v2760_v55  ;;  %v2121_v31 = vpop.f32.mrb[33].mxu0 }
 0xde4   : > { %v4154_v2 = vadd.f32 %v2760_v55, %v2121_v31  ;;  %v2973_v4 = vpop.f32.mrb[34].mxu0 }
 0xde5   : > { %v2154_v12 = vmul.f32 %v4152_v44, %v4152_v44  ;;  %v4158_v11 = vadd.f32 %v2973_v4, %v2760_v55  ;;  %v2124_v0 = vpop.f32.mrb[35].mxu0 }
 0xde6   : > { %v2152_v13 = vmul.f32 %v4154_v2, %v4154_v2  ;;  %v4162_v16 = vadd.f32 %v2760_v55, %v2124_v0 }
 0xde7   : > { %v2162_v1 = vmul.f32 %v2154_v12, %v4152_v44  ;;  %v2155_v20 = vmul.f32 %v4158_v11, %v4158_v11 }
 0xde8   : > { %v2160_v47 = vmul.f32 %v2152_v13, %v4154_v2  ;;  %v2153_v57 = vmul.f32 %v4162_v16, %v4162_v16 }
 0xde9   : > { %v2170_v49 = vmul.f32 0.044715, %v2162_v1  ;;  %v2163_v63 = vmul.f32 %v2155_v20, %v4158_v11 }
 0xdea   : > { %v2168_v23 = vmul.f32 0.044715, %v2160_v47  ;;  %v2161_v17 = vmul.f32 %v2153_v57, %v4162_v16 }
 0xdeb   : > { %v2178_v3 = vadd.f32 %v2170_v49, %v4152_v44  ;;  %v2171_v35 = vmul.f32 0.044715, %v2163_v63  ;;  %v2976_v54 = vpop.f32.mrb[36].mxu0 }
 0xdec   : > { %v2176_v6 = vadd.f32 %v2168_v23, %v4154_v2  ;;  %v2169_v41 = vmul.f32 0.044715, %v2161_v17  ;;  %v4174_v8 = vadd.f32 %v2976_v54, %v2760_v55  ;;  %v2137_v14 = vpop.f32.mrb[37].mxu0 }
 0xded   : > { %v2186_v25 = vmul.f32 0.7978846, %v2178_v3  ;;  %v2179_v56 = vadd.f32 %v2171_v35, %v4158_v11  ;;  %v4177_v52 = vadd.f32 %v2760_v55, %v2137_v14  ;;  %v2977_v27 = vpop.f32.mrb[38].mxu0 }
 0xdee   : > { %v2184_v26 = vmul.f32 0.7978846, %v2176_v6  ;;  %v2177_v62 = vadd.f32 %v2169_v41, %v4162_v16  ;;  %v2158_v28 = vmul.f32 %v4174_v8, %v4174_v8  ;;  %v4182_v7 = vadd.f32 %v2977_v27, %v2760_v55  ;;  %v2140_v10 = vpop.f32.mrb[39].mxu0 }
 0xdef   : > { %3203 = vtanh.f32 %v2186_v25  ;;  %v2187_v30 = vmul.f32 0.7978846, %v2179_v56  ;;  %v2156_v9 = vmul.f32 %v4177_v52, %v4177_v52  ;;  %v2141_v32 = vadd.f32 %v2760_v55, %v2140_v10  ;;  %v2300_v10 = vld [vmem:[%s4385_s17 + $0x28] sm:$0xff] }
 0xdf0   : > { %3205 = vtanh.f32 %v2184_v26  ;;  %v2185_v22 = vmul.f32 0.7978846, %v2177_v62  ;;  %v2166_v48 = vmul.f32 %v2158_v28, %v4174_v8  ;;  %v2159_v18 = vmul.f32 %v4182_v7, %v4182_v7 }
 0xdf1   : > { %3207 = vtanh.f32 %v2187_v30  ;;  %v2164_v33 = vmul.f32 %v2156_v9, %v4177_v52  ;;  %v2157_v34 = vmul.f32 %v2141_v32, %v2141_v32  ;;  %v2307_v30 = vld [vmem:[%s4385_s17 + $0x60] sm:$0xff]  ;;  %v2324_v9 = vld [vmem:[%s4385_s17 + $0xe8] sm:$0xff] }
 0xdf2   : > { %3209 = vtanh.f32 %v2185_v22  ;;  %v2174_v24 = vmul.f32 0.044715, %v2166_v48  ;;  %v2167_v37 = vmul.f32 %v2159_v18, %v4182_v7  ;;  %v2315_v18 = vld [vmem:[%s4385_s17 + $0xa0] sm:$0xff] }
 0xdf3   : > { %v2172_v39 = vmul.f32 0.044715, %v2164_v33  ;;  %v2165_v29 = vmul.f32 %v2157_v34, %v2141_v32  ;;  %v2323_v33 = vld [vmem:[%s4385_s17 + $0xe0] sm:$0xff]  ;;  %v2332_v34 = vld [vmem:[%s4385_s17 + $0x128] sm:$0xff] }
 0xdf4   : > { %v2182_v53 = vadd.f32 %v2174_v24, %v4174_v8  ;;  %v2175_v36 = vmul.f32 0.044715, %v2167_v37  ;;  %v2340_v24 = vld [vmem:[%s4385_s17 + $0x168] sm:$0xff]  ;;  %v3047_v37 = vpack.c.bf16 %v2323_v33, %v2315_v18  ;;  %v2357_v18 = vld [vmem:[%s4385_s17 + $0x1f0] sm:$0xff] }
 0xdf5   : > { %v2180_v42 = vadd.f32 %v2172_v39, %v4177_v52  ;;  %v2173_v40 = vmul.f32 0.044715, %v2165_v29  ;;  %v3049_v39 = vpack.c.bf16 %v2340_v24, %v2332_v34  ;;  %v2331_v29 = vld [vmem:[%s4385_s17 + $0x120] sm:$0xff] }
 0xdf6   : > { %v2190_v43 = vmul.f32 0.7978846, %v2182_v53  ;;  %v2183_v45 = vadd.f32 %v2175_v36, %v4182_v7  ;;  %v2339_v53 = vld [vmem:[%s4385_s17 + $0x160] sm:$0xff]  ;;  %v2348_v36 = vld [vmem:[%s4385_s17 + $0x1a8] sm:$0xff] }
 0xdf7   : > { %v2188_v46 = vmul.f32 0.7978846, %v2180_v42  ;;  %v2181_v60 = vadd.f32 %v2173_v40, %v2141_v32  ;;  %v2356_v42 = vld [vmem:[%s4385_s17 + $0x1e8] sm:$0xff]  ;;  %v3051_v40 = vpack.c.bf16 %v2339_v53, %v2331_v29 }
 0xdf8   : > { %3211 = vtanh.f32 %v2190_v43  ;;  %v2191_v19 = vmul.f32 0.7978846, %v2183_v45  ;;  %v3053_v43 = vpack.c.bf16 %v2356_v42, %v2348_v36  ;;  %v2347_v45 = vld [vmem:[%s4385_s17 + $0x1a0] sm:$0xff] }
 0xdf9   : > { %v3204_v50 = vpop.eup %3203  ;;  %3213 = vtanh.f32 %v2188_v46  ;;  %v2189_v58 = vmul.f32 0.7978846, %v2181_v60  ;;  %v2355_v46 = vld [vmem:[%s4385_s17 + $0x1e0] sm:$0xff] }
 0xdfa   : > { %v3206_v51 = vpop.eup %3205  ;;  %v2202_v59 = vadd.f32 1.0, %v3204_v50  ;;  %3215 = vtanh.f32 %v2191_v19  ;;  %v3055_v60 = vpack.c.bf16 %v2355_v46, %v2347_v45  ;;  %v2298_v19 = vld [vmem:[%s4385_s17 + $0x18] sm:$0xff] }
 0xdfb   : > { %v3208_v61 = vpop.eup %3207  ;;  %v2200_v5 = vadd.f32 1.0, %v3206_v51  ;;  %3217 = vtanh.f32 %v2189_v58  ;;  %v2306_v50 = vld [vmem:[%s4385_s17 + $0x58] sm:$0xff]  ;;  %v2359_v51 = vld [vmem:[%s4384_s16] sm:$0x7] }
 0xdfc   : > { %v3210_v55 = vpop.eup %3209  ;;  %v2210_v38 = vmul.f32 0.5, %v2202_v59  ;;  %v2203_v31 = vadd.f32 1.0, %v3208_v61  ;;  %v3025_v58 = vpack.c.bf16 %v2306_v50, %v2298_v19  ;;  %2362 = vperm.xlu0 %3090, %v2359_v51   ;;  %v2297_v59 = vld [vmem:[%s4385_s17 + $0x10] sm:$0xff] }
 0xdfd   : > { %v2208_v4 = vmul.f32 0.5, %v2200_v5  ;;  %v2201_v12 = vadd.f32 1.0, %v3210_v55  ;;  %v2305_v61 = vld [vmem:[%s4385_s17 + $0x50] sm:$0xff]  ;;  %v2314_v5 = vld [vmem:[%s4385_s17 + $0x98] sm:$0xff] }
 0xdfe   : > { %v2211_v0 = vmul.f32 0.5, %v2203_v31  ;;  %v2218_v1 = vmul.f32 %v2210_v38, %v4152_v44  ;;  %3026 = vmatprep.subr.bf16.mxu1 %v3025_v58  ;;  %v2322_v55 = vld [vmem:[%s4385_s17 + $0xd8] sm:$0xff]  ;;  %v3027_v38 = vpack.c.bf16 %v2305_v61, %v2297_v59 }
 0xdff   : > { %v2209_v13 = vmul.f32 0.5, %v2201_v12  ;;  %v2216_v47 = vmul.f32 %v2208_v4, %v4154_v2  ;;  %v3029_v31 = vpack.c.bf16 %v2322_v55, %v2314_v5  ;;  %v2313_v4 = vld [vmem:[%s4385_s17 + $0x90] sm:$0xff] }
 0xe00   : > { %v2219_v20 = vmul.f32 %v2211_v0, %v4158_v11  ;;  %v2321_v12 = vld [vmem:[%s4385_s17 + $0xd0] sm:$0xff] }
 0xe01   : > { %v2217_v57 = vmul.f32 %v2209_v13, %v4162_v16  ;;  %v2330_v13 = vld [vmem:[%s4385_s17 + $0x118] sm:$0xff] }
 0xe02   : > { %v3212_v49 = vpop.eup %3211  ;;  %v3001_v63 = vpack.c.bf16 %v2219_v20, %v2218_v1  ;;  %v2338_v1 = vld [vmem:[%s4385_s17 + $0x158] sm:$0xff] }
 0xe03   : > { %v3214_v23 = vpop.eup %3213  ;;  %v2206_v17 = vadd.f32 1.0, %v3212_v49  ;;  %v2998_v3 = vpack.c.bf16 %v2217_v57, %v2216_v47  ;;  %v3031_v47 = vpack.c.bf16 %v2321_v12, %v2313_v4  ;;  %v3033_v57 = vpack.c.bf16 %v2338_v1, %v2330_v13  ;;  %v2329_v49 = vld [vmem:[%s4385_s17 + $0x110] sm:$0xff] }
 0xe04   : > { %v3216_v35 = vpop.eup %3215  ;;  %v2204_v54 = vadd.f32 1.0, %v3214_v23  ;;  %v2346_v23 = vld [vmem:[%s4385_s17 + $0x198] sm:$0xff] }
 0xe05   : > { %v3218_v6 = vpop.eup %3217  ;;  %v2214_v41 = vmul.f32 0.5, %v2206_v17  ;;  %v2207_v14 = vadd.f32 1.0, %v3216_v35  ;;  %2999 = vmatpush3.bf16.xpose.msra.mxu0 %v2998_v3  ;;  %v2354_v17 = vld [vmem:[%s4385_s17 + $0x1d8] sm:$0xff] }
 0xe06   : > { %v2212_v25 = vmul.f32 0.5, %v2204_v54  ;;  %v2205_v56 = vadd.f32 1.0, %v3218_v6  ;;  %3000 = vmatprep.subr.bf16.mxu0 %v3231_v21  ;;  %v3037_v35 = vpack.c.bf16 %v2354_v17, %v2346_v23  ;;  %v2345_v54 = vld [vmem:[%s4385_s17 + $0x190] sm:$0xff] }
 0xe07   : > { %v2215_v44 = vmul.f32 0.5, %v2207_v14  ;;  %v2222_v2 = vmul.f32 %v2214_v41, %v4174_v8  ;;  %v2308_v8 = vld [vmem:[%s4385_s17 + $0x68] sm:$0xff]  ;;  %v2353_v6 = vld [vmem:[%s4385_s17 + $0x1d0] sm:$0xff]  ;;  %v2302_v41 = vld [vmem:[%s4385_s17 + $0x38] sm:$0xff] }
 0xe08   : > { %v2213_v11 = vmul.f32 0.5, %v2205_v56  ;;  %v2220_v27 = vmul.f32 %v2212_v25, %v4177_v52  ;;  %v2299_v52 = vld [vmem:[%s4385_s17 + $0x20] sm:$0xff]  ;;  %v2310_v14 = vld [vmem:[%s4385_s17 + $0x78] sm:$0xff]  ;;  %v3039_v25 = vpack.c.bf16 %v2353_v6, %v2345_v54 }
 0xe09   : > { %v2223_v16 = vmul.f32 %v2215_v44, %v4182_v7  ;;  %v3041_v7 = vpack.c.bf16 %v2308_v8, %v2300_v10  ;;  %v3043_v22 = vpack.c.bf16 %v2307_v30, %v2299_v52  ;;  %v3057_v56 = vpack.c.bf16 %v2310_v14, %v2302_v41  ;;  %v2301_v44 = vld [vmem:[%s4385_s17 + $0x30] sm:$0xff]  ;;  %v2334_v10 = vld [vmem:[%s4385_s17 + $0x138] sm:$0xff] }
 0xe0a   : > { %v2221_v26 = vmul.f32 %v2213_v11, %v2141_v32  ;;  %v2224_v32 = vld [vmem:[%s4383_s15] sm:$0x7]  ;;  %v2309_v11 = vld [vmem:[%s4385_s17 + $0x70] sm:$0xff]  ;;  %v2342_v8 = vld [vmem:[%s4385_s17 + $0x178] sm:$0xff] }
 0xe0b   : > { %v3007_v62 = vpack.c.bf16 %v2223_v16, %v2222_v2  ;;  %v2318_v2 = vld [vmem:[%s4385_s17 + $0xb8] sm:$0xff]  ;;  %v3065_v52 = vpack.c.bf16 %v2342_v8, %v2334_v10  ;;  %v2333_v30 = vld [vmem:[%s4385_s17 + $0x130] sm:$0xff] }
 0xe0c   : > { %v3004_v28 = vpack.c.bf16 %v2221_v26, %v2220_v27  ;;  %v2326_v16 = vld [vmem:[%s4385_s17 + $0xf8] sm:$0xff]  ;;  %v3059_v27 = vpack.c.bf16 %v2309_v11, %v2301_v44 }
 0xe0d   : > { %3002 = vmatpush3.bf16.xpose.msra.mxu0 %v3001_v63  ;;  %v2337_v63 = vld [vmem:[%s4385_s17 + $0x150] sm:$0xff]  ;;  %v3061_v26 = vpack.c.bf16 %v2326_v16, %v2318_v2 }
 0xe0e   : > { %3003 = vmatprep.subr.bf16.mxu0 %v3231_v21  ;;  %v3035_v3 = vpack.c.bf16 %v2337_v63, %v2329_v49 }
 0xe15   : > { %3005 = vmatpush3.bf16.xpose.msra.mxu0 %v3004_v28  ;;  %v2325_v28 = vld [vmem:[%s4385_s17 + $0xf0] sm:$0xff] }
 0xe16   : > { %3006 = vmatprep.subr.bf16.mxu0 %v3231_v21  ;;  %v2316_v21 = vld [vmem:[%s4385_s17 + $0xa8] sm:$0xff] }
 0xe17   : > { %v3045_v48 = vpack.c.bf16 %v2324_v9, %v2316_v21  ;;  %v2341_v21 = vld [vmem:[%s4385_s17 + $0x170] sm:$0xff]  ;;  %v2350_v9 = vld [vmem:[%s4385_s17 + $0x1b8] sm:$0xff] }
 0xe1d   : > { %3008 = vmatpush3.bf16.xpose.msra.mxu0 %v3007_v62  ;;  %v2317_v62 = vld [vmem:[%s4385_s17 + $0xb0] sm:$0xff] }
 0xe1e   : > { %3042 = vmatprep.subr.bf16.mxu0 %v3041_v7  ;;  %v3063_v7 = vpack.c.bf16 %v2325_v28, %v2317_v62 }
 0xe24   : > { %2995 = vmatmul.mubr.f32.vlgmr.msra.gmra.mrb[40].mxu0 %v2224_v32  ;;  %v2358_v32 = vld [vmem:[%s4385_s17 + $0x1f8] sm:$0xff] }
 0xe25   : > { %3044 = vmatpush1.bf16.msra.mxu0 %v3043_v22  ;;  %2574 = vmatprep.mubr.f32.mxu0 %v3233_v15  ;;  %v3069_v22 = vpack.c.bf16 %v2358_v32, %v2350_v9 }
 0xe26   : > { %3046 = vmatprep.subr.bf16.mxu0 %v3045_v48  ;;  %v2349_v48 = vld [vmem:[%s4385_s17 + $0x1b0] sm:$0xff] }
 0xe27   : > { %v3071_v33 = vpack.c.bf16 %v2357_v18, %v2349_v48 }
 0xe29   : > { %3048 = vmatpush1.bf16.msra.mxu0 %v3047_v37 }
 0xe2a   : > { %3050 = vmatprep.subr.bf16.mxu0 %v3049_v39 }
 0xe2d   : > { %3052 = vmatpush1.bf16.msra.mxu0 %v3051_v40 }
 0xe2e   : > { %3054 = vmatprep.subr.bf16.mxu0 %v3053_v43 }
 0xe31   : > { %3056 = vmatpush1.bf16.msra.mxu0 %v3055_v60 }
 0xe7b   : > { %v2363_v34 = vpop.permute.xlu0 %2362 }
 0xef7   : > { %v2291_v0 = vpop.f32.mrb[40].mxu0 }
 0xef8   : > { %v2996_v20 = vpop.f32.mrb[41].mxu0  ;;  %2765 = vmatmul.mubr.msk.f32.vlgmr.msra.gmra.mrb[40].mxu1 %vm784_vm0, %v2291_v0  ;;  %2767 = vmatmul.mubr.msk.f32.vlgmr.msra.gmra.mrb[42].mxu0 %vm784_vm0, %v2291_v0 }
 0xef9   : > { %3028 = vmatpush1.bf16.msra.mxu1 %v3027_v38  ;;  %2503 = vmatprep.mubr.f32.mxu1 %v3233_v15 }
 0xefa   : > { %3030 = vmatprep.subr.bf16.mxu1 %v3029_v31 }
 0xefd   : > { %3032 = vmatpush1.bf16.msra.mxu1 %v3031_v47 }
 0xefe   : > { %3034 = vmatprep.subr.bf16.mxu1 %v3033_v57 }
 0xf01   : > { %3036 = vmatpush1.bf16.msra.mxu1 %v3035_v3 }
 0xf02   : > { %3038 = vmatprep.subr.bf16.mxu1 %v3037_v35 }
 0xf05   : > { %3040 = vmatpush1.bf16.msra.mxu1 %v3039_v25 }
 0xf06   : > { %3058 = vmatprep.subr.bf16.mxu1 %v3057_v56 }
 0xf08   : > { %2766 = vmatmul.mubr.msk.f32.vlgmr.msra.gmra.mrb[42].mxu1 %vm784_vm0, %v2291_v0 }
 0xf09   : > { %3060 = vmatpush1.bf16.msra.mxu1 %v3059_v27  ;;  %2645 = vmatprep.mubr.f32.mxu1 %v3233_v15  ;;  %v3067_v15 = vpack.c.bf16 %v2341_v21, %v2333_v30 }
 0xf0a   : > { %3062 = vmatprep.subr.bf16.mxu1 %v3061_v26 }
 0xf0d   : > { %3064 = vmatpush1.bf16.msra.mxu1 %v3063_v7 }
 0xf0e   : > { %3066 = vmatprep.subr.bf16.mxu1 %v3065_v52 }
 0xf11   : > { %3068 = vmatpush1.bf16.msra.mxu1 %v3067_v15 }
 0xf12   : > { %3070 = vmatprep.subr.bf16.mxu1 %v3069_v22 }
 0xf15   : > { %3072 = vmatpush1.bf16.msra.mxu1 %v3071_v33 }
 0xf18   : > { %2768 = vmatmul.mubr.msk.f32.vlgmr.msra.gmra.mrb[44].mxu1 %vm784_vm0, %v2291_v0 }
 0xfcb   : > { %v2434_v24 = vpop.f32.mrb[40].mxu1  ;;  %v2576_v37 = vpop.f32.mrb[42].mxu0 }
 0xfcc   : > { %v2435_v39 = vadd.f32 %v2434_v24, %v2363_v34  ;;  %v2436_v29 = vpop.f32.mrb[41].mxu1  ;;  %v2577_v53 = vadd.f32 %v2576_v37, %v2363_v34  ;;  %v2578_v36 = vpop.f32.mrb[43].mxu0 }
 0xfcd   : > { %v2437_v42 = vadd.f32 %v2436_v29, %v2363_v34  ;;  %v2579_v40 = vadd.f32 %v2578_v36, %v2363_v34 }
 0xfcf   : > { %v2660_v43 = vcombine.low %v2435_v39, %v2437_v42  ;;  %v2662_v45 = vcombine.low %v2577_v53, %v2579_v40 }
 0xfd1   : > { %2668 = vst [vmem:[%s575_s20] sm:$0x77] %v2660_v43  ;;  %2670 = vst [vmem:[%s575_s20 + $0x10] sm:$0x77] %v2662_v45 }
 0xfdb   : > { %v2505_v46 = vpop.f32.mrb[42].mxu1 }
 0xfdc   : > { %v2506_v60 = vadd.f32 %v2505_v46, %v2363_v34  ;;  %v2507_v19 = vpop.f32.mrb[43].mxu1 }
 0xfdd   : > { %v2508_v50 = vadd.f32 %v2507_v19, %v2363_v34 }
 0xfdf   : > { %v2661_v58 = vcombine.low %v2506_v60, %v2508_v50 }
 0xfe1   : > { %2669 = vst [vmem:[%s575_s20 + $0x8] sm:$0x77] %v2661_v58 }
 0xfeb   : > { %v2647_v51 = vpop.f32.mrb[44].mxu1 }
 0xfec   : > { %v2648_v59 = vadd.f32 %v2647_v51, %v2363_v34  ;;  %v2649_v61 = vpop.f32.mrb[45].mxu1 }
 0xfed   : > { %v2650_v5 = vadd.f32 %v2649_v61, %v2363_v34 }
 0xfef   : > { %v2663_v55 = vcombine.low %v2648_v59, %v2650_v5 }
 0xff1   : > { %2671 = vst [vmem:[%s575_s20 + $0x18] sm:$0x77] %v2663_v55 }
 0xff2 PF: > { %s4396_s28 = sld [smem:[#allocation2_spill]] }
 0xff8   : > { %s28_s27 = sadd.s32 1, %s4396_s28  }
 0xff9   : > { %p25_p4 = scmp.ge.s32.totalorder %s28_s27, 4  }
 0xffb   :  { %27 = sbr.rel (!%p25_p4) target bundleno = 4 (0x4), region = 122 }

</bundles_post_ra>
